<compile_context>
chip_gen: v5e
topology: v5e:2x2
jax: 0.10.0
libtpu: 0.0.40
codegen_flags: <defaults>
</compile_context>

<pallas_src>
import functools
import math

import jax
import jax.numpy as jnp
from jax.experimental import pallas as pl
from jax.experimental.pallas import tpu as pltpu


# ----------------------------------------------------------------------------- in-kernel helpers

def _layer_norm(y, g, b, eps):
    # biased variance + eps, like torch.nn.LayerNorm
    mu = jnp.mean(y, axis=-1, keepdims=True)
    var = jnp.mean((y - mu) ** 2, axis=-1, keepdims=True)
    return (y - mu) * jax.lax.rsqrt(var + eps) * g + b


def _softmax_rows(s):
    m = jnp.max(s, axis=-1, keepdims=True)
    p = jnp.exp(s - m)
    return p * pl.reciprocal(jnp.sum(p, axis=-1, keepdims=True), approx=True)


def _mha_self(x, qkv_w, qkv_b, wo, bo, nhead, mask=None):
    # x: (L, D); qkv_w: (D, 3D) stored (Din, Dout); wo: (D, D) stored (Din, Dout)
    l, d = x.shape
    dh = d // nhead
    scale = 1.0 / math.sqrt(dh)
    qkv = jnp.dot(x, qkv_w, preferred_element_type=jnp.float32) + qkv_b   # (L, 3D)
    out = jnp.zeros((l, d), jnp.float32)
    for h in range(nhead):
        qh = qkv[:, h * dh:(h + 1) * dh]
        kh = qkv[:, d + h * dh:d + (h + 1) * dh]
        vh = qkv[:, 2 * d + h * dh:2 * d + (h + 1) * dh]
        s = jax.lax.dot_general(qh, kh, (((1,), (1,)), ((), ())),
                                preferred_element_type=jnp.float32) * scale
        if mask is not None:
            s = s + mask
        oh = jnp.dot(_softmax_rows(s), vh, preferred_element_type=jnp.float32)
        # concat(heads) @ Wo  ==  sum_h  oh @ Wo[h*dh:(h+1)*dh, :]   (no concat/transpose)
        out = out + jnp.dot(oh, wo[h * dh:(h + 1) * dh, :],
                            preferred_element_type=jnp.float32)
    return out + bo


def _mha_cross(xq, xkv, wq, bq, wkv, bkv, wo, bo, nhead):
    lq, d = xq.shape
    dh = d // nhead
    scale = 1.0 / math.sqrt(dh)
    q = jnp.dot(xq, wq, preferred_element_type=jnp.float32) + bq          # (Lq, D)
    kv = jnp.dot(xkv, wkv, preferred_element_type=jnp.float32) + bkv      # (Lk, 2D)
    out = jnp.zeros((lq, d), jnp.float32)
    for h in range(nhead):
        qh = q[:, h * dh:(h + 1) * dh]
        kh = kv[:, h * dh:(h + 1) * dh]
        vh = kv[:, d + h * dh:d + (h + 1) * dh]
        s = jax.lax.dot_general(qh, kh, (((1,), (1,)), ((), ())),
                                preferred_element_type=jnp.float32) * scale
        oh = jnp.dot(_softmax_rows(s), vh, preferred_element_type=jnp.float32)
        out = out + jnp.dot(oh, wo[h * dh:(h + 1) * dh, :],
                            preferred_element_type=jnp.float32)
    return out + bo


# ----------------------------------------------------------------------------- fused kernels

def _preprocess_kernel(x_ref, pe_ref, wp_ref, bp_ref, g_ref, b_ref, o_ref, *, scale, eps):
    # LayerNorm(Linear(x) * sqrt(d_model) + pe)
    x = x_ref[0]                                                          # (L, F)
    y = jnp.dot(x, wp_ref[...], preferred_element_type=jnp.float32) + bp_ref[...]
    y = y * scale + pe_ref[...]
    o_ref[0] = _layer_norm(y, g_ref[...], b_ref[...], eps)


def _encoder_layer_kernel(*refs, nhead, eps, fuse_final):
    if fuse_final:
        (x_ref, wqkv, bqkv, wo, bo, g1, b1, wf1, bf1, wf2, bf2, g2, b2,
         gf, bf_, o_ref) = refs
    else:
        (x_ref, wqkv, bqkv, wo, bo, g1, b1, wf1, bf1, wf2, bf2, g2, b2,
         o_ref) = refs
    x = x_ref[0]                                                          # (L, D)
    a = _mha_self(x, wqkv[...], bqkv[...], wo[...], bo[...], nhead)
    x1 = _layer_norm(x + a, g1[...], b1[...], eps)
    h = jnp.maximum(jnp.dot(x1, wf1[...], preferred_element_type=jnp.float32)
                    + bf1[...], 0.0)
    h = jnp.dot(h, wf2[...], preferred_element_type=jnp.float32) + bf2[...]
    y = _layer_norm(x1 + h, g2[...], b2[...], eps)
    if fuse_final:
        # encoder-stack final LayerNorm fused into the last layer
        y = _layer_norm(y, gf[...], bf_[...], eps)
    o_ref[0] = y


def _decoder_layer_kernel(*refs, nhead, eps, fuse_final):
    if fuse_final:
        (x_ref, mem_ref, mask_ref,
         wqkv, bqkv, wo_s, bo_s, g1, b1,
         wq_c, bq_c, wkv_c, bkv_c, wo_c, bo_c, g2, b2,
         wf1, bf1, wf2, bf2, g3, b3,
         gf, bf_, w_out, b_out, o_ref) = refs
    else:
        (x_ref, mem_ref, mask_ref,
         wqkv, bqkv, wo_s, bo_s, g1, b1,
         wq_c, bq_c, wkv_c, bkv_c, wo_c, bo_c, g2, b2,
         wf1, bf1, wf2, bf2, g3, b3, o_ref) = refs
    x = x_ref[0]                                                          # (Lt, D)
    mem = mem_ref[0]                                                      # (Ls, D)
    a = _mha_self(x, wqkv[...], bqkv[...], wo_s[...], bo_s[...], nhead,
                  mask=mask_ref[...])
    x1 = _layer_norm(x + a, g1[...], b1[...], eps)
    c = _mha_cross(x1, mem, wq_c[...], bq_c[...], wkv_c[...], bkv_c[...],
                   wo_c[...], bo_c[...], nhead)
    x2 = _layer_norm(x1 + c, g2[...], b2[...], eps)
    h = jnp.maximum(jnp.dot(x2, wf1[...], preferred_element_type=jnp.float32)
                    + bf1[...], 0.0)
    h = jnp.dot(h, wf2[...], preferred_element_type=jnp.float32) + bf2[...]
    y = _layer_norm(x2 + h, g3[...], b3[...], eps)
    if fuse_final:
        # decoder-stack final LayerNorm + output projection fused into the last layer
        y = _layer_norm(y, gf[...], bf_[...], eps)
        y = jnp.dot(y, w_out[...], preferred_element_type=jnp.float32) + b_out[...]
    o_ref[0] = y


# fallbacks only used if a stack has zero layers (degenerate config)
def _layernorm_kernel(x_ref, g_ref, b_ref, o_ref, *, eps):
    o_ref[...] = _layer_norm(x_ref[...], g_ref[...], b_ref[...], eps)


def _norm_linear_kernel(x_ref, g_ref, b_ref, w_ref, wb_ref, o_ref, *, eps):
    y = _layer_norm(x_ref[...], g_ref[...], b_ref[...], eps)
    o_ref[...] = jnp.dot(y, w_ref[...], preferred_element_type=jnp.float32) + wb_ref[...]


# ----------------------------------------------------------------------------- wrappers

def _rep_spec(arr):
    # full-array block, same block every grid step (DMA'd once, stays resident)
    zeros = (0,) * arr.ndim
    return pl.BlockSpec(arr.shape, lambda i, _z=zeros: _z)


_PARALLEL = pltpu.CompilerParams(dimension_semantics=("parallel",))


def preprocess(seq, params, d_model, eps=1e-5):
    b, l, f = seq.shape
    pe = params["pe"][:l]
    return pl.pallas_call(
        functools.partial(_preprocess_kernel, scale=math.sqrt(d_model), eps=eps),
        out_shape=jax.ShapeDtypeStruct((b, l, d_model), jnp.float32),
        grid=(b,),
        in_specs=[pl.BlockSpec((1, l, f), lambda i: (i, 0, 0)),
                  _rep_spec(pe), _rep_spec(params["proj_w"]), _rep_spec(params["proj_b"]),
                  _rep_spec(params["norm_g"]), _rep_spec(params["norm_b"])],
        out_specs=pl.BlockSpec((1, l, d_model), lambda i: (i, 0, 0)),
        compiler_params=_PARALLEL,
    )(seq, pe, params["proj_w"], params["proj_b"], params["norm_g"], params["norm_b"])


def encoder_layer(x, p, nhead, final_norm=None, eps=1e-5):
    b, l, d = x.shape
    order = ("wqkv", "bqkv", "wo", "bo", "g1", "b1",
             "wf1", "bf1", "wf2", "bf2", "g2", "b2")
    args = [p[k] for k in order]
    fuse = final_norm is not None
    if fuse:
        args += list(final_norm)                      # (gf, bf)
    return pl.pallas_call(
        functools.partial(_encoder_layer_kernel, nhead=nhead, eps=eps, fuse_final=fuse),
        out_shape=jax.ShapeDtypeStruct((b, l, d), jnp.float32),
        grid=(b,),
        in_specs=[pl.BlockSpec((1, l, d), lambda i: (i, 0, 0))]
                 + [_rep_spec(a) for a in args],
        out_specs=pl.BlockSpec((1, l, d), lambda i: (i, 0, 0)),
        compiler_params=_PARALLEL,
    )(x, *args)


def decoder_layer(x, memory, mask, p, nhead, final=None, eps=1e-5):
    b, l, d = x.shape
    ls = memory.shape[1]
    order = ("wqkv", "bqkv", "wo_s", "bo_s", "g1", "b1",
             "wq_c", "bq_c", "wkv_c", "bkv_c", "wo_c", "bo_c", "g2", "b2",
             "wf1", "bf1", "wf2", "bf2", "g3", "b3")
    args = [p[k] for k in order]
    fuse = final is not None
    d_out = d
    if fuse:
        args += list(final)                           # (gf, bf, out_w, out_b)
        d_out = final[2].shape[1]                     # n_features
    return pl.pallas_call(
        functools.partial(_decoder_layer_kernel, nhead=nhead, eps=eps, fuse_final=fuse),
        out_shape=jax.ShapeDtypeStruct((b, l, d_out), jnp.float32),
        grid=(b,),
        in_specs=[pl.BlockSpec((1, l, d), lambda i: (i, 0, 0)),
                  pl.BlockSpec((1, ls, d), lambda i: (i, 0, 0)),
                  _rep_spec(mask)] + [_rep_spec(a) for a in args],
        out_specs=pl.BlockSpec((1, l, d_out), lambda i: (i, 0, 0)),
        compiler_params=_PARALLEL,
    )(x, memory, mask, *args)


def layer_norm_2d(x2d, g, b, eps=1e-5):
    m, d = x2d.shape
    return pl.pallas_call(
        functools.partial(_layernorm_kernel, eps=eps),
        out_shape=jax.ShapeDtypeStruct((m, d), jnp.float32),
        grid=(1,),
        in_specs=[_rep_spec(x2d), _rep_spec(g), _rep_spec(b)],
        out_specs=pl.BlockSpec((m, d), lambda i: (0, 0)),
    )(x2d, g, b)


def norm_linear(x2d, g, b, w, wb, eps=1e-5):
    m, d = x2d.shape
    n = w.shape[1]
    return pl.pallas_call(
        functools.partial(_norm_linear_kernel, eps=eps),
        out_shape=jax.ShapeDtypeStruct((m, n), jnp.float32),
        grid=(1,),
        in_specs=[_rep_spec(x2d), _rep_spec(g), _rep_spec(b), _rep_spec(w), _rep_spec(wb)],
        out_specs=pl.BlockSpec((m, n), lambda i: (0, 0)),
    )(x2d, g, b, w, wb)


# ----------------------------------------------------------------------------- model forward

def transformer_model_forward(X, params, *, input_len, target_len, d_model, nhead):
    b = X.shape[0]
    n_features = X.shape[-1]

    source_seq = X[:, :input_len, :]
    shifted_target_seq = X[:, input_len - 1:-1, :]

    # generate_square_subsequent_mask(target_len): 0 on/below diag, -inf above
    # (-1e9 gives identical softmax after the max-subtraction)
    idx = jnp.arange(target_len)
    trg_mask = jnp.where(idx[None, :] > idx[:, None], -1e9, 0.0).astype(jnp.float32)

    src = preprocess(source_seq, params, d_model)
    tgt = preprocess(shifted_target_seq, params, d_model)

    enc_layers = params["enc_layers"]
    mem = src
    for li, lp in enumerate(enc_layers):
        fn = ((params["enc_norm_g"], params["enc_norm_b"])
              if li == len(enc_layers) - 1 else None)
        mem = encoder_layer(mem, lp, nhead, final_norm=fn)
    if not enc_layers:   # degenerate: 0 encoder layers
        mem = layer_norm_2d(mem.reshape(b * input_len, d_model),
                            params["enc_norm_g"], params["enc_norm_b"]
                            ).reshape(b, input_len, d_model)

    dec_layers = params["dec_layers"]
    out = tgt
    for li, lp in enumerate(dec_layers):
        fn = ((params["dec_norm_g"], params["dec_norm_b"],
               params["out_w"], params["out_b"])
              if li == len(dec_layers) - 1 else None)
        out = decoder_layer(out, mem, trg_mask, lp, nhead, final=fn)
    if not dec_layers:   # degenerate: 0 decoder layers
        out = norm_linear(out.reshape(b * target_len, d_model),
                          params["dec_norm_g"], params["dec_norm_b"],
                          params["out_w"], params["out_b"]
                          ).reshape(b, target_len, n_features)
    return out           # (B, target_len, n_features)


# ----------------------------------------------------------------------------- parameters

def init_params(key, *, n_features, d_model, nhead, dff, n_enc, n_dec, max_len):
    keys = iter(jax.random.split(key, 256))

    def w(din, dout):
        # weights stored transposed vs. PyTorch: (Din, Dout) -> lane-dense (M,K)x(K,N) dot
        return jax.random.normal(next(keys), (din, dout), jnp.float32) * 0.02

    def zeros(dout):
        return jnp.zeros((1, dout), jnp.float32)

    def ones(dout):
        return jnp.ones((1, dout), jnp.float32)

    def enc_layer_params():
        return dict(wqkv=w(d_model, 3 * d_model), bqkv=zeros(3 * d_model),
                    wo=w(d_model, d_model), bo=zeros(d_model),
                    g1=ones(d_model), b1=zeros(d_model),
                    wf1=w(d_model, dff), bf1=zeros(dff),
                    wf2=w(dff, d_model), bf2=zeros(d_model),
                    g2=ones(d_model), b2=zeros(d_model))

    def dec_layer_params():
        return dict(wqkv=w(d_model, 3 * d_model), bqkv=zeros(3 * d_model),
                    wo_s=w(d_model, d_model), bo_s=zeros(d_model),
                    g1=ones(d_model), b1=zeros(d_model),
                    wq_c=w(d_model, d_model), bq_c=zeros(d_model),
                    wkv_c=w(d_model, 2 * d_model), bkv_c=zeros(2 * d_model),
                    wo_c=w(d_model, d_model), bo_c=zeros(d_model),
                    g2=ones(d_model), b2=zeros(d_model),
                    wf1=w(d_model, dff), bf1=zeros(dff),
                    wf2=w(dff, d_model), bf2=zeros(d_model),
                    g3=ones(d_model), b3=zeros(d_model))

    # sinusoidal positional encoding buffer (same construction as the book's PE)
    position = jnp.arange(max_len, dtype=jnp.float32)[:, None]
    ang = jnp.exp(jnp.arange(0, d_model, 2, dtype=jnp.float32)
                  * (-math.log(10000.0) / d_model))
    pe = jnp.zeros((max_len, d_model), jnp.float32)
    pe = pe.at[:, 0::2].set(jnp.sin(position * ang))
    pe = pe.at[:, 1::2].set(jnp.cos(position * ang))

    return dict(
        proj_w=w(n_features, d_model), proj_b=zeros(d_model),
        norm_g=ones(d_model), norm_b=zeros(d_model),
        pe=pe,
        enc_layers=[enc_layer_params() for _ in range(n_enc)],
        dec_layers=[dec_layer_params() for _ in range(n_dec)],
        enc_norm_g=ones(d_model), enc_norm_b=zeros(d_model),
        dec_norm_g=ones(d_model), dec_norm_b=zeros(d_model),
        out_w=w(d_model, n_features), out_b=zeros(n_features),
    )


# ----------------------------------------------------------------------------- main

if __name__ == "__main__":
    B = 2
    input_len, target_len, n_features = 8, 8, 4
    d_model, nhead, dff = 32, 4, 64
    n_enc, n_dec = 2, 2

    key = jax.random.PRNGKey(0)
    k_x, k_p = jax.random.split(key)
    X = jax.random.normal(k_x, (B, input_len + target_len, n_features), jnp.float32)
    params = init_params(k_p, n_features=n_features, d_model=d_model, nhead=nhead,
                         dff=dff, n_enc=n_enc, n_dec=n_dec,
                         max_len=max(input_len, target_len))

    fwd = jax.jit(functools.partial(
        transformer_model_forward,
        input_len=input_len, target_len=target_len, d_model=d_model, nhead=nhead))

    out = jax.block_until_ready(fwd(X, params))
    assert out.shape == (B, target_len, n_features), out.shape
    assert bool(jnp.all(jnp.isfinite(out)))
    print("KERNEL_OK")
</pallas_src>

<mosaic_0001>
module attributes {stable_mosaic.version = 11 : i64} {
  func.func @_preprocess_kernel(%arg0: i32, %arg1: memref<1x8x4xf32, #tpu.memory_space<vmem>>, %arg2: memref<8x32xf32, #tpu.memory_space<vmem>>, %arg3: memref<4x32xf32, #tpu.memory_space<vmem>>, %arg4: memref<1x32xf32, #tpu.memory_space<vmem>>, %arg5: memref<1x32xf32, #tpu.memory_space<vmem>>, %arg6: memref<1x32xf32, #tpu.memory_space<vmem>>, %arg7: memref<1x8x32xf32, #tpu.memory_space<vmem>>) attributes {dimension_semantics = [#tpu.dimension_semantics<parallel>], iteration_bounds = array<i64: 2>, scalar_prefetch = 0 : i64, scratch_operands = 0 : i64, tpu.core_type = #tpu.core_type<tc>, window_params = [{transform_indices = @transform_0, window_bounds = array<i64: 1, 8, 4>}, {pipeline_mode = #tpu.pipeline_mode<synchronous>, transform_indices = @transform_1, window_bounds = array<i64: 8, 32>}, {pipeline_mode = #tpu.pipeline_mode<synchronous>, transform_indices = @transform_2, window_bounds = array<i64: 4, 32>}, {pipeline_mode = #tpu.pipeline_mode<synchronous>, transform_indices = @transform_3, window_bounds = array<i64: 1, 32>}, {pipeline_mode = #tpu.pipeline_mode<synchronous>, transform_indices = @transform_4, window_bounds = array<i64: 1, 32>}, {pipeline_mode = #tpu.pipeline_mode<synchronous>, transform_indices = @transform_5, window_bounds = array<i64: 1, 32>}, {transform_indices = @transform_6, window_bounds = array<i64: 1, 8, 32>}]} {
    %c0 = arith.constant 0 : index
    %c0_0 = arith.constant 0 : index
    %c0_1 = arith.constant 0 : index
    %0 = vector.load %arg1[%c0, %c0_0, %c0_1] : memref<1x8x4xf32, #tpu.memory_space<vmem>>, vector<1x8x4xf32>
    %1 = vector.shape_cast %0 : vector<1x8x4xf32> to vector<8x4xf32>
    %c0_2 = arith.constant 0 : index
    %c0_3 = arith.constant 0 : index
    %2 = vector.load %arg3[%c0_2, %c0_3] : memref<4x32xf32, #tpu.memory_space<vmem>>, vector<4x32xf32>
    %cst = arith.constant dense<0.000000e+00> : vector<8x32xf32>
    %3 = tpu.matmul %1, %2, %cst {dimension_numbers = #tpu.dot_dimension_numbers<[1], [0], [0], [1], [0, 0, 1, 1], [], []>} : vector<8x4xf32>, vector<4x32xf32>, vector<8x32xf32> -> vector<8x32xf32>
    %c0_4 = arith.constant 0 : index
    %c0_5 = arith.constant 0 : index
    %4 = vector.load %arg4[%c0_4, %c0_5] : memref<1x32xf32, #tpu.memory_space<vmem>>, vector<1x32xf32>
    %5 = vector.broadcast %4 : vector<1x32xf32> to vector<8x32xf32>
    %6 = arith.addf %3, %5 : vector<8x32xf32>
    %cst_6 = arith.constant 5.65685415 : f32
    %7 = vector.broadcast %cst_6 : f32 to vector<8x32xf32>
    %8 = arith.mulf %6, %7 : vector<8x32xf32>
    %c0_7 = arith.constant 0 : index
    %c0_8 = arith.constant 0 : index
    %9 = vector.load %arg2[%c0_7, %c0_8] : memref<8x32xf32, #tpu.memory_space<vmem>>, vector<8x32xf32>
    %10 = arith.addf %8, %9 : vector<8x32xf32>
    %c0_9 = arith.constant 0 : index
    %c0_10 = arith.constant 0 : index
    %11 = vector.load %arg5[%c0_9, %c0_10] : memref<1x32xf32, #tpu.memory_space<vmem>>, vector<1x32xf32>
    %c0_11 = arith.constant 0 : index
    %c0_12 = arith.constant 0 : index
    %12 = vector.load %arg6[%c0_11, %c0_12] : memref<1x32xf32, #tpu.memory_space<vmem>>, vector<1x32xf32>
    %cst_13 = arith.constant dense<0.000000e+00> : vector<8xf32>
    %13 = vector.multi_reduction <add>, %10, %cst_13 [1] : vector<8x32xf32> to vector<8xf32>
    %14 = vector.shape_cast %13 : vector<8xf32> to vector<8x1xf32>
    %cst_14 = arith.constant 3.200000e+01 : f32
    %15 = vector.broadcast %cst_14 : f32 to vector<8x1xf32>
    %16 = arith.divf %14, %15 : vector<8x1xf32>
    %17 = vector.broadcast %16 : vector<8x1xf32> to vector<8x32xf32>
    %18 = arith.subf %10, %17 : vector<8x32xf32>
    %19 = arith.mulf %18, %18 : vector<8x32xf32>
    %cst_15 = arith.constant dense<0.000000e+00> : vector<8xf32>
    %20 = vector.multi_reduction <add>, %19, %cst_15 [1] : vector<8x32xf32> to vector<8xf32>
    %21 = vector.shape_cast %20 : vector<8xf32> to vector<8x1xf32>
    %cst_16 = arith.constant 3.200000e+01 : f32
    %22 = vector.broadcast %cst_16 : f32 to vector<8x1xf32>
    %23 = arith.divf %21, %22 : vector<8x1xf32>
    %24 = vector.broadcast %16 : vector<8x1xf32> to vector<8x32xf32>
    %25 = arith.subf %10, %24 : vector<8x32xf32>
    %cst_17 = arith.constant 9.99999974E-6 : f32
    %26 = vector.broadcast %cst_17 : f32 to vector<8x1xf32>
    %27 = arith.addf %23, %26 : vector<8x1xf32>
    %28 = math.rsqrt %27 : vector<8x1xf32>
    %29 = vector.broadcast %28 : vector<8x1xf32> to vector<8x32xf32>
    %30 = arith.mulf %25, %29 : vector<8x32xf32>
    %31 = vector.broadcast %11 : vector<1x32xf32> to vector<8x32xf32>
    %32 = arith.mulf %30, %31 : vector<8x32xf32>
    %33 = vector.broadcast %12 : vector<1x32xf32> to vector<8x32xf32>
    %34 = arith.addf %32, %33 : vector<8x32xf32>
    %c0_18 = arith.constant 0 : index
    %c0_19 = arith.constant 0 : index
    %c0_20 = arith.constant 0 : index
    %35 = vector.load %arg7[%c0_18, %c0_19, %c0_20] : memref<1x8x32xf32, #tpu.memory_space<vmem>>, vector<1x8x32xf32>
    %36 = vector.shape_cast %35 : vector<1x8x32xf32> to vector<8x32xf32>
    %37 = vector.shape_cast %34 : vector<8x32xf32> to vector<1x8x32xf32>
    tpu.vector_store %arg7[%c0_18, %c0_19, %c0_20], %37 {strides = array<i32>} : memref<1x8x32xf32, #tpu.memory_space<vmem>>, vector<1x8x32xf32>,
    return
  }
  func.func @transform_0(%arg0: i32) -> (i32, i32, i32) {
    %c0_i32 = arith.constant 0 : i32
    %c0_i32_0 = arith.constant 0 : i32
    %c0_i32_1 = arith.constant 0 : i32
    return %arg0, %c0_i32, %c0_i32_0 : i32, i32, i32
  }
  func.func @transform_1(%arg0: i32) -> (i32, i32) {
    %c0_i32 = arith.constant 0 : i32
    %c0_i32_0 = arith.constant 0 : i32
    %c0_i32_1 = arith.constant 0 : i32
    return %c0_i32, %c0_i32_0 : i32, i32
  }
  func.func @transform_2(%arg0: i32) -> (i32, i32) {
    %c0_i32 = arith.constant 0 : i32
    %c0_i32_0 = arith.constant 0 : i32
    %c0_i32_1 = arith.constant 0 : i32
    return %c0_i32, %c0_i32_0 : i32, i32
  }
  func.func @transform_3(%arg0: i32) -> (i32, i32) {
    %c0_i32 = arith.constant 0 : i32
    %c0_i32_0 = arith.constant 0 : i32
    %c0_i32_1 = arith.constant 0 : i32
    return %c0_i32, %c0_i32_0 : i32, i32
  }
  func.func @transform_4(%arg0: i32) -> (i32, i32) {
    %c0_i32 = arith.constant 0 : i32
    %c0_i32_0 = arith.constant 0 : i32
    %c0_i32_1 = arith.constant 0 : i32
    return %c0_i32, %c0_i32_0 : i32, i32
  }
  func.func @transform_5(%arg0: i32) -> (i32, i32) {
    %c0_i32 = arith.constant 0 : i32
    %c0_i32_0 = arith.constant 0 : i32
    %c0_i32_1 = arith.constant 0 : i32
    return %c0_i32, %c0_i32_0 : i32, i32
  }
  func.func @transform_6(%arg0: i32) -> (i32, i32, i32) {
    %c0_i32 = arith.constant 0 : i32
    %c0_i32_0 = arith.constant 0 : i32
    %c0_i32_1 = arith.constant 0 : i32
    return %arg0, %c0_i32, %c0_i32_0 : i32, i32, i32
  }
}

module attributes {stable_mosaic.version = 11 : i64} {
  func.func @_encoder_layer_kernel(%arg0: i32, %arg1: memref<1x8x32xf32, #tpu.memory_space<vmem>>, %arg2: memref<32x96xf32, #tpu.memory_space<vmem>>, %arg3: memref<1x96xf32, #tpu.memory_space<vmem>>, %arg4: memref<32x32xf32, #tpu.memory_space<vmem>>, %arg5: memref<1x32xf32, #tpu.memory_space<vmem>>, %arg6: memref<1x32xf32, #tpu.memory_space<vmem>>, %arg7: memref<1x32xf32, #tpu.memory_space<vmem>>, %arg8: memref<32x64xf32, #tpu.memory_space<vmem>>, %arg9: memref<1x64xf32, #tpu.memory_space<vmem>>, %arg10: memref<64x32xf32, #tpu.memory_space<vmem>>, %arg11: memref<1x32xf32, #tpu.memory_space<vmem>>, %arg12: memref<1x32xf32, #tpu.memory_space<vmem>>, %arg13: memref<1x32xf32, #tpu.memory_space<vmem>>, %arg14: memref<1x8x32xf32, #tpu.memory_space<vmem>>) attributes {dimension_semantics = [#tpu.dimension_semantics<parallel>], iteration_bounds = array<i64: 2>, scalar_prefetch = 0 : i64, scratch_operands = 0 : i64, tpu.core_type = #tpu.core_type<tc>, window_params = [{transform_indices = @transform_0, window_bounds = array<i64: 1, 8, 32>}, {pipeline_mode = #tpu.pipeline_mode<synchronous>, transform_indices = @transform_1, window_bounds = array<i64: 32, 96>}, {pipeline_mode = #tpu.pipeline_mode<synchronous>, transform_indices = @transform_2, window_bounds = array<i64: 1, 96>}, {pipeline_mode = #tpu.pipeline_mode<synchronous>, transform_indices = @transform_3, window_bounds = array<i64: 32, 32>}, {pipeline_mode = #tpu.pipeline_mode<synchronous>, transform_indices = @transform_4, window_bounds = array<i64: 1, 32>}, {pipeline_mode = #tpu.pipeline_mode<synchronous>, transform_indices = @transform_5, window_bounds = array<i64: 1, 32>}, {pipeline_mode = #tpu.pipeline_mode<synchronous>, transform_indices = @transform_6, window_bounds = array<i64: 1, 32>}, {pipeline_mode = #tpu.pipeline_mode<synchronous>, transform_indices = @transform_7, window_bounds = array<i64: 32, 64>}, {pipeline_mode = #tpu.pipeline_mode<synchronous>, transform_indices = @transform_8, window_bounds = array<i64: 1, 64>}, {pipeline_mode = #tpu.pipeline_mode<synchronous>, transform_indices = @transform_9, window_bounds = array<i64: 64, 32>}, {pipeline_mode = #tpu.pipeline_mode<synchronous>, transform_indices = @transform_10, window_bounds = array<i64: 1, 32>}, {pipeline_mode = #tpu.pipeline_mode<synchronous>, transform_indices = @transform_11, window_bounds = array<i64: 1, 32>}, {pipeline_mode = #tpu.pipeline_mode<synchronous>, transform_indices = @transform_12, window_bounds = array<i64: 1, 32>}, {transform_indices = @transform_13, window_bounds = array<i64: 1, 8, 32>}]} {
    %c0 = arith.constant 0 : index
    %c0_0 = arith.constant 0 : index
    %c0_1 = arith.constant 0 : index
    %0 = vector.load %arg1[%c0, %c0_0, %c0_1] : memref<1x8x32xf32, #tpu.memory_space<vmem>>, vector<1x8x32xf32>
    %1 = vector.shape_cast %0 : vector<1x8x32xf32> to vector<8x32xf32>
    %c0_2 = arith.constant 0 : index
    %c0_3 = arith.constant 0 : index
    %2 = vector.load %arg2[%c0_2, %c0_3] : memref<32x96xf32, #tpu.memory_space<vmem>>, vector<32x96xf32>
    %c0_4 = arith.constant 0 : index
    %c0_5 = arith.constant 0 : index
    %3 = vector.load %arg3[%c0_4, %c0_5] : memref<1x96xf32, #tpu.memory_space<vmem>>, vector<1x96xf32>
    %c0_6 = arith.constant 0 : index
    %c0_7 = arith.constant 0 : index
    %4 = vector.load %arg4[%c0_6, %c0_7] : memref<32x32xf32, #tpu.memory_space<vmem>>, vector<32x32xf32>
    %c0_8 = arith.constant 0 : index
    %c0_9 = arith.constant 0 : index
    %5 = vector.load %arg5[%c0_8, %c0_9] : memref<1x32xf32, #tpu.memory_space<vmem>>, vector<1x32xf32>
    %cst = arith.constant dense<0.000000e+00> : vector<8x96xf32>
    %6 = tpu.matmul %1, %2, %cst {dimension_numbers = #tpu.dot_dimension_numbers<[1], [0], [0], [1], [0, 0, 1, 1], [], []>} : vector<8x32xf32>, vector<32x96xf32>, vector<8x96xf32> -> vector<8x96xf32>
    %7 = vector.broadcast %3 : vector<1x96xf32> to vector<8x96xf32>
    %8 = arith.addf %6, %7 : vector<8x96xf32>
    %cst_10 = arith.constant 0.000000e+00 : f32
    %9 = vector.broadcast %cst_10 : f32 to vector<8x32xf32>
    %10 = vector.extract_strided_slice %8 {offsets = [0, 0], sizes = [8, 8], strides = [1, 1]} : vector<8x96xf32> to vector<8x8xf32>
    %11 = vector.extract_strided_slice %8 {offsets = [0, 32], sizes = [8, 8], strides = [1, 1]} : vector<8x96xf32> to vector<8x8xf32>
    %12 = vector.extract_strided_slice %8 {offsets = [0, 64], sizes = [8, 8], strides = [1, 1]} : vector<8x96xf32> to vector<8x8xf32>
    %cst_11 = arith.constant dense<0.000000e+00> : vector<8x8xf32>
    %13 = tpu.matmul %10, %11, %cst_11 {dimension_numbers = #tpu.dot_dimension_numbers<[1], [1], [0], [0], [0, 0, 1, 0], [], []>} : vector<8x8xf32>, vector<8x8xf32>, vector<8x8xf32> -> vector<8x8xf32>
    %cst_12 = arith.constant 0.353553385 : f32
    %14 = vector.broadcast %cst_12 : f32 to vector<8x8xf32>
    %15 = arith.mulf %13, %14 : vector<8x8xf32>
    %cst_13 = arith.constant dense<0xFF800000> : vector<8xf32>
    %16 = vector.multi_reduction <maximumf>, %15, %cst_13 [1] : vector<8x8xf32> to vector<8xf32>
    %17 = vector.shape_cast %16 : vector<8xf32> to vector<8x1xf32>
    %18 = vector.broadcast %17 : vector<8x1xf32> to vector<8x8xf32>
    %19 = arith.subf %15, %18 : vector<8x8xf32>
    %20 = math.exp %19 : vector<8x8xf32>
    %cst_14 = arith.constant dense<0.000000e+00> : vector<8xf32>
    %21 = vector.multi_reduction <add>, %20, %cst_14 [1] : vector<8x8xf32> to vector<8xf32>
    %22 = vector.shape_cast %21 : vector<8xf32> to vector<8x1xf32>
    %23 = tpu.reciprocal %22 {approx = true} : vector<8x1xf32> -> vector<8x1xf32>
    %24 = vector.broadcast %23 : vector<8x1xf32> to vector<8x8xf32>
    %25 = arith.mulf %20, %24 : vector<8x8xf32>
    %cst_15 = arith.constant dense<0.000000e+00> : vector<8x8xf32>
    %26 = tpu.matmul %25, %12, %cst_15 {dimension_numbers = #tpu.dot_dimension_numbers<[1], [0], [0], [1], [0, 0, 1, 1], [], []>} : vector<8x8xf32>, vector<8x8xf32>, vector<8x8xf32> -> vector<8x8xf32>
    %27 = vector.extract_strided_slice %4 {offsets = [0, 0], sizes = [8, 32], strides = [1, 1]} : vector<32x32xf32> to vector<8x32xf32>
    %cst_16 = arith.constant dense<0.000000e+00> : vector<8x32xf32>
    %28 = tpu.matmul %26, %27, %cst_16 {dimension_numbers = #tpu.dot_dimension_numbers<[1], [0], [0], [1], [0, 0, 1, 1], [], []>} : vector<8x8xf32>, vector<8x32xf32>, vector<8x32xf32> -> vector<8x32xf32>
    %29 = arith.addf %9, %28 : vector<8x32xf32>
    %30 = vector.extract_strided_slice %8 {offsets = [0, 8], sizes = [8, 8], strides = [1, 1]} : vector<8x96xf32> to vector<8x8xf32>
    %31 = vector.extract_strided_slice %8 {offsets = [0, 40], sizes = [8, 8], strides = [1, 1]} : vector<8x96xf32> to vector<8x8xf32>
    %32 = vector.extract_strided_slice %8 {offsets = [0, 72], sizes = [8, 8], strides = [1, 1]} : vector<8x96xf32> to vector<8x8xf32>
    %cst_17 = arith.constant dense<0.000000e+00> : vector<8x8xf32>
    %33 = tpu.matmul %30, %31, %cst_17 {dimension_numbers = #tpu.dot_dimension_numbers<[1], [1], [0], [0], [0, 0, 1, 0], [], []>} : vector<8x8xf32>, vector<8x8xf32>, vector<8x8xf32> -> vector<8x8xf32>
    %cst_18 = arith.constant 0.353553385 : f32
    %34 = vector.broadcast %cst_18 : f32 to vector<8x8xf32>
    %35 = arith.mulf %33, %34 : vector<8x8xf32>
    %cst_19 = arith.constant dense<0xFF800000> : vector<8xf32>
    %36 = vector.multi_reduction <maximumf>, %35, %cst_19 [1] : vector<8x8xf32> to vector<8xf32>
    %37 = vector.shape_cast %36 : vector<8xf32> to vector<8x1xf32>
    %38 = vector.broadcast %37 : vector<8x1xf32> to vector<8x8xf32>
    %39 = arith.subf %35, %38 : vector<8x8xf32>
    %40 = math.exp %39 : vector<8x8xf32>
    %cst_20 = arith.constant dense<0.000000e+00> : vector<8xf32>
    %41 = vector.multi_reduction <add>, %40, %cst_20 [1] : vector<8x8xf32> to vector<8xf32>
    %42 = vector.shape_cast %41 : vector<8xf32> to vector<8x1xf32>
    %43 = tpu.reciprocal %42 {approx = true} : vector<8x1xf32> -> vector<8x1xf32>
    %44 = vector.broadcast %43 : vector<8x1xf32> to vector<8x8xf32>
    %45 = arith.mulf %40, %44 : vector<8x8xf32>
    %cst_21 = arith.constant dense<0.000000e+00> : vector<8x8xf32>
    %46 = tpu.matmul %45, %32, %cst_21 {dimension_numbers = #tpu.dot_dimension_numbers<[1], [0], [0], [1], [0, 0, 1, 1], [], []>} : vector<8x8xf32>, vector<8x8xf32>, vector<8x8xf32> -> vector<8x8xf32>
    %47 = vector.extract_strided_slice %4 {offsets = [8, 0], sizes = [8, 32], strides = [1, 1]} : vector<32x32xf32> to vector<8x32xf32>
    %cst_22 = arith.constant dense<0.000000e+00> : vector<8x32xf32>
    %48 = tpu.matmul %46, %47, %cst_22 {dimension_numbers = #tpu.dot_dimension_numbers<[1], [0], [0], [1], [0, 0, 1, 1], [], []>} : vector<8x8xf32>, vector<8x32xf32>, vector<8x32xf32> -> vector<8x32xf32>
    %49 = arith.addf %29, %48 : vector<8x32xf32>
    %50 = vector.extract_strided_slice %8 {offsets = [0, 16], sizes = [8, 8], strides = [1, 1]} : vector<8x96xf32> to vector<8x8xf32>
    %51 = vector.extract_strided_slice %8 {offsets = [0, 48], sizes = [8, 8], strides = [1, 1]} : vector<8x96xf32> to vector<8x8xf32>
    %52 = vector.extract_strided_slice %8 {offsets = [0, 80], sizes = [8, 8], strides = [1, 1]} : vector<8x96xf32> to vector<8x8xf32>
    %cst_23 = arith.constant dense<0.000000e+00> : vector<8x8xf32>
    %53 = tpu.matmul %50, %51, %cst_23 {dimension_numbers = #tpu.dot_dimension_numbers<[1], [1], [0], [0], [0, 0, 1, 0], [], []>} : vector<8x8xf32>, vector<8x8xf32>, vector<8x8xf32> -> vector<8x8xf32>
    %cst_24 = arith.constant 0.353553385 : f32
    %54 = vector.broadcast %cst_24 : f32 to vector<8x8xf32>
    %55 = arith.mulf %53, %54 : vector<8x8xf32>
    %cst_25 = arith.constant dense<0xFF800000> : vector<8xf32>
    %56 = vector.multi_reduction <maximumf>, %55, %cst_25 [1] : vector<8x8xf32> to vector<8xf32>
    %57 = vector.shape_cast %56 : vector<8xf32> to vector<8x1xf32>
    %58 = vector.broadcast %57 : vector<8x1xf32> to vector<8x8xf32>
    %59 = arith.subf %55, %58 : vector<8x8xf32>
    %60 = math.exp %59 : vector<8x8xf32>
    %cst_26 = arith.constant dense<0.000000e+00> : vector<8xf32>
    %61 = vector.multi_reduction <add>, %60, %cst_26 [1] : vector<8x8xf32> to vector<8xf32>
    %62 = vector.shape_cast %61 : vector<8xf32> to vector<8x1xf32>
    %63 = tpu.reciprocal %62 {approx = true} : vector<8x1xf32> -> vector<8x1xf32>
    %64 = vector.broadcast %63 : vector<8x1xf32> to vector<8x8xf32>
    %65 = arith.mulf %60, %64 : vector<8x8xf32>
    %cst_27 = arith.constant dense<0.000000e+00> : vector<8x8xf32>
    %66 = tpu.matmul %65, %52, %cst_27 {dimension_numbers = #tpu.dot_dimension_numbers<[1], [0], [0], [1], [0, 0, 1, 1], [], []>} : vector<8x8xf32>, vector<8x8xf32>, vector<8x8xf32> -> vector<8x8xf32>
    %67 = vector.extract_strided_slice %4 {offsets = [16, 0], sizes = [8, 32], strides = [1, 1]} : vector<32x32xf32> to vector<8x32xf32>
    %cst_28 = arith.constant dense<0.000000e+00> : vector<8x32xf32>
    %68 = tpu.matmul %66, %67, %cst_28 {dimension_numbers = #tpu.dot_dimension_numbers<[1], [0], [0], [1], [0, 0, 1, 1], [], []>} : vector<8x8xf32>, vector<8x32xf32>, vector<8x32xf32> -> vector<8x32xf32>
    %69 = arith.addf %49, %68 : vector<8x32xf32>
    %70 = vector.extract_strided_slice %8 {offsets = [0, 24], sizes = [8, 8], strides = [1, 1]} : vector<8x96xf32> to vector<8x8xf32>
    %71 = vector.extract_strided_slice %8 {offsets = [0, 56], sizes = [8, 8], strides = [1, 1]} : vector<8x96xf32> to vector<8x8xf32>
    %72 = vector.extract_strided_slice %8 {offsets = [0, 88], sizes = [8, 8], strides = [1, 1]} : vector<8x96xf32> to vector<8x8xf32>
    %cst_29 = arith.constant dense<0.000000e+00> : vector<8x8xf32>
    %73 = tpu.matmul %70, %71, %cst_29 {dimension_numbers = #tpu.dot_dimension_numbers<[1], [1], [0], [0], [0, 0, 1, 0], [], []>} : vector<8x8xf32>, vector<8x8xf32>, vector<8x8xf32> -> vector<8x8xf32>
    %cst_30 = arith.constant 0.353553385 : f32
    %74 = vector.broadcast %cst_30 : f32 to vector<8x8xf32>
    %75 = arith.mulf %73, %74 : vector<8x8xf32>
    %cst_31 = arith.constant dense<0xFF800000> : vector<8xf32>
    %76 = vector.multi_reduction <maximumf>, %75, %cst_31 [1] : vector<8x8xf32> to vector<8xf32>
    %77 = vector.shape_cast %76 : vector<8xf32> to vector<8x1xf32>
    %78 = vector.broadcast %77 : vector<8x1xf32> to vector<8x8xf32>
    %79 = arith.subf %75, %78 : vector<8x8xf32>
    %80 = math.exp %79 : vector<8x8xf32>
    %cst_32 = arith.constant dense<0.000000e+00> : vector<8xf32>
    %81 = vector.multi_reduction <add>, %80, %cst_32 [1] : vector<8x8xf32> to vector<8xf32>
    %82 = vector.shape_cast %81 : vector<8xf32> to vector<8x1xf32>
    %83 = tpu.reciprocal %82 {approx = true} : vector<8x1xf32> -> vector<8x1xf32>
    %84 = vector.broadcast %83 : vector<8x1xf32> to vector<8x8xf32>
    %85 = arith.mulf %80, %84 : vector<8x8xf32>
    %cst_33 = arith.constant dense<0.000000e+00> : vector<8x8xf32>
    %86 = tpu.matmul %85, %72, %cst_33 {dimension_numbers = #tpu.dot_dimension_numbers<[1], [0], [0], [1], [0, 0, 1, 1], [], []>} : vector<8x8xf32>, vector<8x8xf32>, vector<8x8xf32> -> vector<8x8xf32>
    %87 = vector.extract_strided_slice %4 {offsets = [24, 0], sizes = [8, 32], strides = [1, 1]} : vector<32x32xf32> to vector<8x32xf32>
    %cst_34 = arith.constant dense<0.000000e+00> : vector<8x32xf32>
    %88 = tpu.matmul %86, %87, %cst_34 {dimension_numbers = #tpu.dot_dimension_numbers<[1], [0], [0], [1], [0, 0, 1, 1], [], []>} : vector<8x8xf32>, vector<8x32xf32>, vector<8x32xf32> -> vector<8x32xf32>
    %89 = arith.addf %69, %88 : vector<8x32xf32>
    %90 = vector.broadcast %5 : vector<1x32xf32> to vector<8x32xf32>
    %91 = arith.addf %89, %90 : vector<8x32xf32>
    %92 = arith.addf %1, %91 : vector<8x32xf32>
    %c0_35 = arith.constant 0 : index
    %c0_36 = arith.constant 0 : index
    %93 = vector.load %arg6[%c0_35, %c0_36] : memref<1x32xf32, #tpu.memory_space<vmem>>, vector<1x32xf32>
    %c0_37 = arith.constant 0 : index
    %c0_38 = arith.constant 0 : index
    %94 = vector.load %arg7[%c0_37, %c0_38] : memref<1x32xf32, #tpu.memory_space<vmem>>, vector<1x32xf32>
    %cst_39 = arith.constant dense<0.000000e+00> : vector<8xf32>
    %95 = vector.multi_reduction <add>, %92, %cst_39 [1] : vector<8x32xf32> to vector<8xf32>
    %96 = vector.shape_cast %95 : vector<8xf32> to vector<8x1xf32>
    %cst_40 = arith.constant 3.200000e+01 : f32
    %97 = vector.broadcast %cst_40 : f32 to vector<8x1xf32>
    %98 = arith.divf %96, %97 : vector<8x1xf32>
    %99 = vector.broadcast %98 : vector<8x1xf32> to vector<8x32xf32>
    %100 = arith.subf %92, %99 : vector<8x32xf32>
    %101 = arith.mulf %100, %100 : vector<8x32xf32>
    %cst_41 = arith.constant dense<0.000000e+00> : vector<8xf32>
    %102 = vector.multi_reduction <add>, %101, %cst_41 [1] : vector<8x32xf32> to vector<8xf32>
    %103 = vector.shape_cast %102 : vector<8xf32> to vector<8x1xf32>
    %cst_42 = arith.constant 3.200000e+01 : f32
    %104 = vector.broadcast %cst_42 : f32 to vector<8x1xf32>
    %105 = arith.divf %103, %104 : vector<8x1xf32>
    %106 = vector.broadcast %98 : vector<8x1xf32> to vector<8x32xf32>
    %107 = arith.subf %92, %106 : vector<8x32xf32>
    %cst_43 = arith.constant 9.99999974E-6 : f32
    %108 = vector.broadcast %cst_43 : f32 to vector<8x1xf32>
    %109 = arith.addf %105, %108 : vector<8x1xf32>
    %110 = math.rsqrt %109 : vector<8x1xf32>
    %111 = vector.broadcast %110 : vector<8x1xf32> to vector<8x32xf32>
    %112 = arith.mulf %107, %111 : vector<8x32xf32>
    %113 = vector.broadcast %93 : vector<1x32xf32> to vector<8x32xf32>
    %114 = arith.mulf %112, %113 : vector<8x32xf32>
    %115 = vector.broadcast %94 : vector<1x32xf32> to vector<8x32xf32>
    %116 = arith.addf %114, %115 : vector<8x32xf32>
    %c0_44 = arith.constant 0 : index
    %c0_45 = arith.constant 0 : index
    %117 = vector.load %arg8[%c0_44, %c0_45] : memref<32x64xf32, #tpu.memory_space<vmem>>, vector<32x64xf32>
    %cst_46 = arith.constant dense<0.000000e+00> : vector<8x64xf32>
    %118 = tpu.matmul %116, %117, %cst_46 {dimension_numbers = #tpu.dot_dimension_numbers<[1], [0], [0], [1], [0, 0, 1, 1], [], []>} : vector<8x32xf32>, vector<32x64xf32>, vector<8x64xf32> -> vector<8x64xf32>
    %c0_47 = arith.constant 0 : index
    %c0_48 = arith.constant 0 : index
    %119 = vector.load %arg9[%c0_47, %c0_48] : memref<1x64xf32, #tpu.memory_space<vmem>>, vector<1x64xf32>
    %120 = vector.broadcast %119 : vector<1x64xf32> to vector<8x64xf32>
    %121 = arith.addf %118, %120 : vector<8x64xf32>
    %cst_49 = arith.constant 0.000000e+00 : f32
    %122 = vector.broadcast %cst_49 : f32 to vector<8x64xf32>
    %123 = arith.maximumf %121, %122 : vector<8x64xf32>
    %c0_50 = arith.constant 0 : index
    %c0_51 = arith.constant 0 : index
    %124 = vector.load %arg10[%c0_50, %c0_51] : memref<64x32xf32, #tpu.memory_space<vmem>>, vector<64x32xf32>
    %cst_52 = arith.constant dense<0.000000e+00> : vector<8x32xf32>
    %125 = tpu.matmul %123, %124, %cst_52 {dimension_numbers = #tpu.dot_dimension_numbers<[1], [0], [0], [1], [0, 0, 1, 1], [], []>} : vector<8x64xf32>, vector<64x32xf32>, vector<8x32xf32> -> vector<8x32xf32>
    %c0_53 = arith.constant 0 : index
    %c0_54 = arith.constant 0 : index
    %126 = vector.load %arg11[%c0_53, %c0_54] : memref<1x32xf32, #tpu.memory_space<vmem>>, vector<1x32xf32>
    %127 = vector.broadcast %126 : vector<1x32xf32> to vector<8x32xf32>
    %128 = arith.addf %125, %127 : vector<8x32xf32>
    %129 = arith.addf %116, %128 : vector<8x32xf32>
    %c0_55 = arith.constant 0 : index
    %c0_56 = arith.constant 0 : index
    %130 = vector.load %arg12[%c0_55, %c0_56] : memref<1x32xf32, #tpu.memory_space<vmem>>, vector<1x32xf32>
    %c0_57 = arith.constant 0 : index
    %c0_58 = arith.constant 0 : index
    %131 = vector.load %arg13[%c0_57, %c0_58] : memref<1x32xf32, #tpu.memory_space<vmem>>, vector<1x32xf32>
    %cst_59 = arith.constant dense<0.000000e+00> : vector<8xf32>
    %132 = vector.multi_reduction <add>, %129, %cst_59 [1] : vector<8x32xf32> to vector<8xf32>
    %133 = vector.shape_cast %132 : vector<8xf32> to vector<8x1xf32>
    %cst_60 = arith.constant 3.200000e+01 : f32
    %134 = vector.broadcast %cst_60 : f32 to vector<8x1xf32>
    %135 = arith.divf %133, %134 : vector<8x1xf32>
    %136 = vector.broadcast %135 : vector<8x1xf32> to vector<8x32xf32>
    %137 = arith.subf %129, %136 : vector<8x32xf32>
    %138 = arith.mulf %137, %137 : vector<8x32xf32>
    %cst_61 = arith.constant dense<0.000000e+00> : vector<8xf32>
    %139 = vector.multi_reduction <add>, %138, %cst_61 [1] : vector<8x32xf32> to vector<8xf32>
    %140 = vector.shape_cast %139 : vector<8xf32> to vector<8x1xf32>
    %cst_62 = arith.constant 3.200000e+01 : f32
    %141 = vector.broadcast %cst_62 : f32 to vector<8x1xf32>
    %142 = arith.divf %140, %141 : vector<8x1xf32>
    %143 = vector.broadcast %135 : vector<8x1xf32> to vector<8x32xf32>
    %144 = arith.subf %129, %143 : vector<8x32xf32>
    %cst_63 = arith.constant 9.99999974E-6 : f32
    %145 = vector.broadcast %cst_63 : f32 to vector<8x1xf32>
    %146 = arith.addf %142, %145 : vector<8x1xf32>
    %147 = math.rsqrt %146 : vector<8x1xf32>
    %148 = vector.broadcast %147 : vector<8x1xf32> to vector<8x32xf32>
    %149 = arith.mulf %144, %148 : vector<8x32xf32>
    %150 = vector.broadcast %130 : vector<1x32xf32> to vector<8x32xf32>
    %151 = arith.mulf %149, %150 : vector<8x32xf32>
    %152 = vector.broadcast %131 : vector<1x32xf32> to vector<8x32xf32>
    %153 = arith.addf %151, %152 : vector<8x32xf32>
    %c0_64 = arith.constant 0 : index
    %c0_65 = arith.constant 0 : index
    %c0_66 = arith.constant 0 : index
    %154 = vector.load %arg14[%c0_64, %c0_65, %c0_66] : memref<1x8x32xf32, #tpu.memory_space<vmem>>, vector<1x8x32xf32>
    %155 = vector.shape_cast %154 : vector<1x8x32xf32> to vector<8x32xf32>
    %156 = vector.shape_cast %153 : vector<8x32xf32> to vector<1x8x32xf32>
    tpu.vector_store %arg14[%c0_64, %c0_65, %c0_66], %156 {strides = array<i32>} : memref<1x8x32xf32, #tpu.memory_space<vmem>>, vector<1x8x32xf32>,
    return
  }
  func.func @transform_0(%arg0: i32) -> (i32, i32, i32) {
    %c0_i32 = arith.constant 0 : i32
    %c0_i32_0 = arith.constant 0 : i32
    %c0_i32_1 = arith.constant 0 : i32
    return %arg0, %c0_i32, %c0_i32_0 : i32, i32, i32
  }
  func.func @transform_1(%arg0: i32) -> (i32, i32) {
    %c0_i32 = arith.constant 0 : i32
    %c0_i32_0 = arith.constant 0 : i32
    %c0_i32_1 = arith.constant 0 : i32
    return %c0_i32, %c0_i32_0 : i32, i32
  }
  func.func @transform_2(%arg0: i32) -> (i32, i32) {
    %c0_i32 = arith.constant 0 : i32
    %c0_i32_0 = arith.constant 0 : i32
    %c0_i32_1 = arith.constant 0 : i32
    return %c0_i32, %c0_i32_0 : i32, i32
  }
  func.func @transform_3(%arg0: i32) -> (i32, i32) {
    %c0_i32 = arith.constant 0 : i32
    %c0_i32_0 = arith.constant 0 : i32
    %c0_i32_1 = arith.constant 0 : i32
    return %c0_i32, %c0_i32_0 : i32, i32
  }
  func.func @transform_4(%arg0: i32) -> (i32, i32) {
    %c0_i32 = arith.constant 0 : i32
    %c0_i32_0 = arith.constant 0 : i32
    %c0_i32_1 = arith.constant 0 : i32
    return %c0_i32, %c0_i32_0 : i32, i32
  }
  func.func @transform_5(%arg0: i32) -> (i32, i32) {
    %c0_i32 = arith.constant 0 : i32
    %c0_i32_0 = arith.constant 0 : i32
    %c0_i32_1 = arith.constant 0 : i32
    return %c0_i32, %c0_i32_0 : i32, i32
  }
  func.func @transform_6(%arg0: i32) -> (i32, i32) {
    %c0_i32 = arith.constant 0 : i32
    %c0_i32_0 = arith.constant 0 : i32
    %c0_i32_1 = arith.constant 0 : i32
    return %c0_i32, %c0_i32_0 : i32, i32
  }
  func.func @transform_7(%arg0: i32) -> (i32, i32) {
    %c0_i32 = arith.constant 0 : i32
    %c0_i32_0 = arith.constant 0 : i32
    %c0_i32_1 = arith.constant 0 : i32
    return %c0_i32, %c0_i32_0 : i32, i32
  }
  func.func @transform_8(%arg0: i32) -> (i32, i32) {
    %c0_i32 = arith.constant 0 : i32
    %c0_i32_0 = arith.constant 0 : i32
    %c0_i32_1 = arith.constant 0 : i32
    return %c0_i32, %c0_i32_0 : i32, i32
  }
  func.func @transform_9(%arg0: i32) -> (i32, i32) {
    %c0_i32 = arith.constant 0 : i32
    %c0_i32_0 = arith.constant 0 : i32
    %c0_i32_1 = arith.constant 0 : i32
    return %c0_i32, %c0_i32_0 : i32, i32
  }
  func.func @transform_10(%arg0: i32) -> (i32, i32) {
    %c0_i32 = arith.constant 0 : i32
    %c0_i32_0 = arith.constant 0 : i32
    %c0_i32_1 = arith.constant 0 : i32
    return %c0_i32, %c0_i32_0 : i32, i32
  }
  func.func @transform_11(%arg0: i32) -> (i32, i32) {
    %c0_i32 = arith.constant 0 : i32
    %c0_i32_0 = arith.constant 0 : i32
    %c0_i32_1 = arith.constant 0 : i32
    return %c0_i32, %c0_i32_0 : i32, i32
  }
  func.func @transform_12(%arg0: i32) -> (i32, i32) {
    %c0_i32 = arith.constant 0 : i32
    %c0_i32_0 = arith.constant 0 : i32
    %c0_i32_1 = arith.constant 0 : i32
    return %c0_i32, %c0_i32_0 : i32, i32
  }
  func.func @transform_13(%arg0: i32) -> (i32, i32, i32) {
    %c0_i32 = arith.constant 0 : i32
    %c0_i32_0 = arith.constant 0 : i32
    %c0_i32_1 = arith.constant 0 : i32
    return %arg0, %c0_i32, %c0_i32_0 : i32, i32, i32
  }
}

module attributes {stable_mosaic.version = 11 : i64} {
  func.func @_encoder_layer_kernel(%arg0: i32, %arg1: memref<1x8x32xf32, #tpu.memory_space<vmem>>, %arg2: memref<32x96xf32, #tpu.memory_space<vmem>>, %arg3: memref<1x96xf32, #tpu.memory_space<vmem>>, %arg4: memref<32x32xf32, #tpu.memory_space<vmem>>, %arg5: memref<1x32xf32, #tpu.memory_space<vmem>>, %arg6: memref<1x32xf32, #tpu.memory_space<vmem>>, %arg7: memref<1x32xf32, #tpu.memory_space<vmem>>, %arg8: memref<32x64xf32, #tpu.memory_space<vmem>>, %arg9: memref<1x64xf32, #tpu.memory_space<vmem>>, %arg10: memref<64x32xf32, #tpu.memory_space<vmem>>, %arg11: memref<1x32xf32, #tpu.memory_space<vmem>>, %arg12: memref<1x32xf32, #tpu.memory_space<vmem>>, %arg13: memref<1x32xf32, #tpu.memory_space<vmem>>, %arg14: memref<1x32xf32, #tpu.memory_space<vmem>>, %arg15: memref<1x32xf32, #tpu.memory_space<vmem>>, %arg16: memref<1x8x32xf32, #tpu.memory_space<vmem>>) attributes {dimension_semantics = [#tpu.dimension_semantics<parallel>], iteration_bounds = array<i64: 2>, scalar_prefetch = 0 : i64, scratch_operands = 0 : i64, tpu.core_type = #tpu.core_type<tc>, window_params = [{transform_indices = @transform_0, window_bounds = array<i64: 1, 8, 32>}, {pipeline_mode = #tpu.pipeline_mode<synchronous>, transform_indices = @transform_1, window_bounds = array<i64: 32, 96>}, {pipeline_mode = #tpu.pipeline_mode<synchronous>, transform_indices = @transform_2, window_bounds = array<i64: 1, 96>}, {pipeline_mode = #tpu.pipeline_mode<synchronous>, transform_indices = @transform_3, window_bounds = array<i64: 32, 32>}, {pipeline_mode = #tpu.pipeline_mode<synchronous>, transform_indices = @transform_4, window_bounds = array<i64: 1, 32>}, {pipeline_mode = #tpu.pipeline_mode<synchronous>, transform_indices = @transform_5, window_bounds = array<i64: 1, 32>}, {pipeline_mode = #tpu.pipeline_mode<synchronous>, transform_indices = @transform_6, window_bounds = array<i64: 1, 32>}, {pipeline_mode = #tpu.pipeline_mode<synchronous>, transform_indices = @transform_7, window_bounds = array<i64: 32, 64>}, {pipeline_mode = #tpu.pipeline_mode<synchronous>, transform_indices = @transform_8, window_bounds = array<i64: 1, 64>}, {pipeline_mode = #tpu.pipeline_mode<synchronous>, transform_indices = @transform_9, window_bounds = array<i64: 64, 32>}, {pipeline_mode = #tpu.pipeline_mode<synchronous>, transform_indices = @transform_10, window_bounds = array<i64: 1, 32>}, {pipeline_mode = #tpu.pipeline_mode<synchronous>, transform_indices = @transform_11, window_bounds = array<i64: 1, 32>}, {pipeline_mode = #tpu.pipeline_mode<synchronous>, transform_indices = @transform_12, window_bounds = array<i64: 1, 32>}, {pipeline_mode = #tpu.pipeline_mode<synchronous>, transform_indices = @transform_13, window_bounds = array<i64: 1, 32>}, {pipeline_mode = #tpu.pipeline_mode<synchronous>, transform_indices = @transform_14, window_bounds = array<i64: 1, 32>}, {transform_indices = @transform_15, window_bounds = array<i64: 1, 8, 32>}]} {
    %c0 = arith.constant 0 : index
    %c0_0 = arith.constant 0 : index
    %c0_1 = arith.constant 0 : index
    %0 = vector.load %arg1[%c0, %c0_0, %c0_1] : memref<1x8x32xf32, #tpu.memory_space<vmem>>, vector<1x8x32xf32>
    %1 = vector.shape_cast %0 : vector<1x8x32xf32> to vector<8x32xf32>
    %c0_2 = arith.constant 0 : index
    %c0_3 = arith.constant 0 : index
    %2 = vector.load %arg2[%c0_2, %c0_3] : memref<32x96xf32, #tpu.memory_space<vmem>>, vector<32x96xf32>
    %c0_4 = arith.constant 0 : index
    %c0_5 = arith.constant 0 : index
    %3 = vector.load %arg3[%c0_4, %c0_5] : memref<1x96xf32, #tpu.memory_space<vmem>>, vector<1x96xf32>
    %c0_6 = arith.constant 0 : index
    %c0_7 = arith.constant 0 : index
    %4 = vector.load %arg4[%c0_6, %c0_7] : memref<32x32xf32, #tpu.memory_space<vmem>>, vector<32x32xf32>
    %c0_8 = arith.constant 0 : index
    %c0_9 = arith.constant 0 : index
    %5 = vector.load %arg5[%c0_8, %c0_9] : memref<1x32xf32, #tpu.memory_space<vmem>>, vector<1x32xf32>
    %cst = arith.constant dense<0.000000e+00> : vector<8x96xf32>
    %6 = tpu.matmul %1, %2, %cst {dimension_numbers = #tpu.dot_dimension_numbers<[1], [0], [0], [1], [0, 0, 1, 1], [], []>} : vector<8x32xf32>, vector<32x96xf32>, vector<8x96xf32> -> vector<8x96xf32>
    %7 = vector.broadcast %3 : vector<1x96xf32> to vector<8x96xf32>
    %8 = arith.addf %6, %7 : vector<8x96xf32>
    %cst_10 = arith.constant 0.000000e+00 : f32
    %9 = vector.broadcast %cst_10 : f32 to vector<8x32xf32>
    %10 = vector.extract_strided_slice %8 {offsets = [0, 0], sizes = [8, 8], strides = [1, 1]} : vector<8x96xf32> to vector<8x8xf32>
    %11 = vector.extract_strided_slice %8 {offsets = [0, 32], sizes = [8, 8], strides = [1, 1]} : vector<8x96xf32> to vector<8x8xf32>
    %12 = vector.extract_strided_slice %8 {offsets = [0, 64], sizes = [8, 8], strides = [1, 1]} : vector<8x96xf32> to vector<8x8xf32>
    %cst_11 = arith.constant dense<0.000000e+00> : vector<8x8xf32>
    %13 = tpu.matmul %10, %11, %cst_11 {dimension_numbers = #tpu.dot_dimension_numbers<[1], [1], [0], [0], [0, 0, 1, 0], [], []>} : vector<8x8xf32>, vector<8x8xf32>, vector<8x8xf32> -> vector<8x8xf32>
    %cst_12 = arith.constant 0.353553385 : f32
    %14 = vector.broadcast %cst_12 : f32 to vector<8x8xf32>
    %15 = arith.mulf %13, %14 : vector<8x8xf32>
    %cst_13 = arith.constant dense<0xFF800000> : vector<8xf32>
    %16 = vector.multi_reduction <maximumf>, %15, %cst_13 [1] : vector<8x8xf32> to vector<8xf32>
    %17 = vector.shape_cast %16 : vector<8xf32> to vector<8x1xf32>
    %18 = vector.broadcast %17 : vector<8x1xf32> to vector<8x8xf32>
    %19 = arith.subf %15, %18 : vector<8x8xf32>
    %20 = math.exp %19 : vector<8x8xf32>
    %cst_14 = arith.constant dense<0.000000e+00> : vector<8xf32>
    %21 = vector.multi_reduction <add>, %20, %cst_14 [1] : vector<8x8xf32> to vector<8xf32>
    %22 = vector.shape_cast %21 : vector<8xf32> to vector<8x1xf32>
    %23 = tpu.reciprocal %22 {approx = true} : vector<8x1xf32> -> vector<8x1xf32>
    %24 = vector.broadcast %23 : vector<8x1xf32> to vector<8x8xf32>
    %25 = arith.mulf %20, %24 : vector<8x8xf32>
    %cst_15 = arith.constant dense<0.000000e+00> : vector<8x8xf32>
    %26 = tpu.matmul %25, %12, %cst_15 {dimension_numbers = #tpu.dot_dimension_numbers<[1], [0], [0], [1], [0, 0, 1, 1], [], []>} : vector<8x8xf32>, vector<8x8xf32>, vector<8x8xf32> -> vector<8x8xf32>
    %27 = vector.extract_strided_slice %4 {offsets = [0, 0], sizes = [8, 32], strides = [1, 1]} : vector<32x32xf32> to vector<8x32xf32>
    %cst_16 = arith.constant dense<0.000000e+00> : vector<8x32xf32>
    %28 = tpu.matmul %26, %27, %cst_16 {dimension_numbers = #tpu.dot_dimension_numbers<[1], [0], [0], [1], [0, 0, 1, 1], [], []>} : vector<8x8xf32>, vector<8x32xf32>, vector<8x32xf32> -> vector<8x32xf32>
    %29 = arith.addf %9, %28 : vector<8x32xf32>
    %30 = vector.extract_strided_slice %8 {offsets = [0, 8], sizes = [8, 8], strides = [1, 1]} : vector<8x96xf32> to vector<8x8xf32>
    %31 = vector.extract_strided_slice %8 {offsets = [0, 40], sizes = [8, 8], strides = [1, 1]} : vector<8x96xf32> to vector<8x8xf32>
    %32 = vector.extract_strided_slice %8 {offsets = [0, 72], sizes = [8, 8], strides = [1, 1]} : vector<8x96xf32> to vector<8x8xf32>
    %cst_17 = arith.constant dense<0.000000e+00> : vector<8x8xf32>
    %33 = tpu.matmul %30, %31, %cst_17 {dimension_numbers = #tpu.dot_dimension_numbers<[1], [1], [0], [0], [0, 0, 1, 0], [], []>} : vector<8x8xf32>, vector<8x8xf32>, vector<8x8xf32> -> vector<8x8xf32>
    %cst_18 = arith.constant 0.353553385 : f32
    %34 = vector.broadcast %cst_18 : f32 to vector<8x8xf32>
    %35 = arith.mulf %33, %34 : vector<8x8xf32>
    %cst_19 = arith.constant dense<0xFF800000> : vector<8xf32>
    %36 = vector.multi_reduction <maximumf>, %35, %cst_19 [1] : vector<8x8xf32> to vector<8xf32>
    %37 = vector.shape_cast %36 : vector<8xf32> to vector<8x1xf32>
    %38 = vector.broadcast %37 : vector<8x1xf32> to vector<8x8xf32>
    %39 = arith.subf %35, %38 : vector<8x8xf32>
    %40 = math.exp %39 : vector<8x8xf32>
    %cst_20 = arith.constant dense<0.000000e+00> : vector<8xf32>
    %41 = vector.multi_reduction <add>, %40, %cst_20 [1] : vector<8x8xf32> to vector<8xf32>
    %42 = vector.shape_cast %41 : vector<8xf32> to vector<8x1xf32>
    %43 = tpu.reciprocal %42 {approx = true} : vector<8x1xf32> -> vector<8x1xf32>
    %44 = vector.broadcast %43 : vector<8x1xf32> to vector<8x8xf32>
    %45 = arith.mulf %40, %44 : vector<8x8xf32>
    %cst_21 = arith.constant dense<0.000000e+00> : vector<8x8xf32>
    %46 = tpu.matmul %45, %32, %cst_21 {dimension_numbers = #tpu.dot_dimension_numbers<[1], [0], [0], [1], [0, 0, 1, 1], [], []>} : vector<8x8xf32>, vector<8x8xf32>, vector<8x8xf32> -> vector<8x8xf32>
    %47 = vector.extract_strided_slice %4 {offsets = [8, 0], sizes = [8, 32], strides = [1, 1]} : vector<32x32xf32> to vector<8x32xf32>
    %cst_22 = arith.constant dense<0.000000e+00> : vector<8x32xf32>
    %48 = tpu.matmul %46, %47, %cst_22 {dimension_numbers = #tpu.dot_dimension_numbers<[1], [0], [0], [1], [0, 0, 1, 1], [], []>} : vector<8x8xf32>, vector<8x32xf32>, vector<8x32xf32> -> vector<8x32xf32>
    %49 = arith.addf %29, %48 : vector<8x32xf32>
    %50 = vector.extract_strided_slice %8 {offsets = [0, 16], sizes = [8, 8], strides = [1, 1]} : vector<8x96xf32> to vector<8x8xf32>
    %51 = vector.extract_strided_slice %8 {offsets = [0, 48], sizes = [8, 8], strides = [1, 1]} : vector<8x96xf32> to vector<8x8xf32>
    %52 = vector.extract_strided_slice %8 {offsets = [0, 80], sizes = [8, 8], strides = [1, 1]} : vector<8x96xf32> to vector<8x8xf32>
    %cst_23 = arith.constant dense<0.000000e+00> : vector<8x8xf32>
    %53 = tpu.matmul %50, %51, %cst_23 {dimension_numbers = #tpu.dot_dimension_numbers<[1], [1], [0], [0], [0, 0, 1, 0], [], []>} : vector<8x8xf32>, vector<8x8xf32>, vector<8x8xf32> -> vector<8x8xf32>
    %cst_24 = arith.constant 0.353553385 : f32
    %54 = vector.broadcast %cst_24 : f32 to vector<8x8xf32>
    %55 = arith.mulf %53, %54 : vector<8x8xf32>
    %cst_25 = arith.constant dense<0xFF800000> : vector<8xf32>
    %56 = vector.multi_reduction <maximumf>, %55, %cst_25 [1] : vector<8x8xf32> to vector<8xf32>
    %57 = vector.shape_cast %56 : vector<8xf32> to vector<8x1xf32>
    %58 = vector.broadcast %57 : vector<8x1xf32> to vector<8x8xf32>
    %59 = arith.subf %55, %58 : vector<8x8xf32>
    %60 = math.exp %59 : vector<8x8xf32>
    %cst_26 = arith.constant dense<0.000000e+00> : vector<8xf32>
    %61 = vector.multi_reduction <add>, %60, %cst_26 [1] : vector<8x8xf32> to vector<8xf32>
    %62 = vector.shape_cast %61 : vector<8xf32> to vector<8x1xf32>
    %63 = tpu.reciprocal %62 {approx = true} : vector<8x1xf32> -> vector<8x1xf32>
    %64 = vector.broadcast %63 : vector<8x1xf32> to vector<8x8xf32>
    %65 = arith.mulf %60, %64 : vector<8x8xf32>
    %cst_27 = arith.constant dense<0.000000e+00> : vector<8x8xf32>
    %66 = tpu.matmul %65, %52, %cst_27 {dimension_numbers = #tpu.dot_dimension_numbers<[1], [0], [0], [1], [0, 0, 1, 1], [], []>} : vector<8x8xf32>, vector<8x8xf32>, vector<8x8xf32> -> vector<8x8xf32>
    %67 = vector.extract_strided_slice %4 {offsets = [16, 0], sizes = [8, 32], strides = [1, 1]} : vector<32x32xf32> to vector<8x32xf32>
    %cst_28 = arith.constant dense<0.000000e+00> : vector<8x32xf32>
    %68 = tpu.matmul %66, %67, %cst_28 {dimension_numbers = #tpu.dot_dimension_numbers<[1], [0], [0], [1], [0, 0, 1, 1], [], []>} : vector<8x8xf32>, vector<8x32xf32>, vector<8x32xf32> -> vector<8x32xf32>
    %69 = arith.addf %49, %68 : vector<8x32xf32>
    %70 = vector.extract_strided_slice %8 {offsets = [0, 24], sizes = [8, 8], strides = [1, 1]} : vector<8x96xf32> to vector<8x8xf32>
    %71 = vector.extract_strided_slice %8 {offsets = [0, 56], sizes = [8, 8], strides = [1, 1]} : vector<8x96xf32> to vector<8x8xf32>
    %72 = vector.extract_strided_slice %8 {offsets = [0, 88], sizes = [8, 8], strides = [1, 1]} : vector<8x96xf32> to vector<8x8xf32>
    %cst_29 = arith.constant dense<0.000000e+00> : vector<8x8xf32>
    %73 = tpu.matmul %70, %71, %cst_29 {dimension_numbers = #tpu.dot_dimension_numbers<[1], [1], [0], [0], [0, 0, 1, 0], [], []>} : vector<8x8xf32>, vector<8x8xf32>, vector<8x8xf32> -> vector<8x8xf32>
    %cst_30 = arith.constant 0.353553385 : f32
    %74 = vector.broadcast %cst_30 : f32 to vector<8x8xf32>
    %75 = arith.mulf %73, %74 : vector<8x8xf32>
    %cst_31 = arith.constant dense<0xFF800000> : vector<8xf32>
    %76 = vector.multi_reduction <maximumf>, %75, %cst_31 [1] : vector<8x8xf32> to vector<8xf32>
    %77 = vector.shape_cast %76 : vector<8xf32> to vector<8x1xf32>
    %78 = vector.broadcast %77 : vector<8x1xf32> to vector<8x8xf32>
    %79 = arith.subf %75, %78 : vector<8x8xf32>
    %80 = math.exp %79 : vector<8x8xf32>
    %cst_32 = arith.constant dense<0.000000e+00> : vector<8xf32>
    %81 = vector.multi_reduction <add>, %80, %cst_32 [1] : vector<8x8xf32> to vector<8xf32>
    %82 = vector.shape_cast %81 : vector<8xf32> to vector<8x1xf32>
    %83 = tpu.reciprocal %82 {approx = true} : vector<8x1xf32> -> vector<8x1xf32>
    %84 = vector.broadcast %83 : vector<8x1xf32> to vector<8x8xf32>
    %85 = arith.mulf %80, %84 : vector<8x8xf32>
    %cst_33 = arith.constant dense<0.000000e+00> : vector<8x8xf32>
    %86 = tpu.matmul %85, %72, %cst_33 {dimension_numbers = #tpu.dot_dimension_numbers<[1], [0], [0], [1], [0, 0, 1, 1], [], []>} : vector<8x8xf32>, vector<8x8xf32>, vector<8x8xf32> -> vector<8x8xf32>
    %87 = vector.extract_strided_slice %4 {offsets = [24, 0], sizes = [8, 32], strides = [1, 1]} : vector<32x32xf32> to vector<8x32xf32>
    %cst_34 = arith.constant dense<0.000000e+00> : vector<8x32xf32>
    %88 = tpu.matmul %86, %87, %cst_34 {dimension_numbers = #tpu.dot_dimension_numbers<[1], [0], [0], [1], [0, 0, 1, 1], [], []>} : vector<8x8xf32>, vector<8x32xf32>, vector<8x32xf32> -> vector<8x32xf32>
    %89 = arith.addf %69, %88 : vector<8x32xf32>
    %90 = vector.broadcast %5 : vector<1x32xf32> to vector<8x32xf32>
    %91 = arith.addf %89, %90 : vector<8x32xf32>
    %92 = arith.addf %1, %91 : vector<8x32xf32>
    %c0_35 = arith.constant 0 : index
    %c0_36 = arith.constant 0 : index
    %93 = vector.load %arg6[%c0_35, %c0_36] : memref<1x32xf32, #tpu.memory_space<vmem>>, vector<1x32xf32>
    %c0_37 = arith.constant 0 : index
    %c0_38 = arith.constant 0 : index
    %94 = vector.load %arg7[%c0_37, %c0_38] : memref<1x32xf32, #tpu.memory_space<vmem>>, vector<1x32xf32>
    %cst_39 = arith.constant dense<0.000000e+00> : vector<8xf32>
    %95 = vector.multi_reduction <add>, %92, %cst_39 [1] : vector<8x32xf32> to vector<8xf32>
    %96 = vector.shape_cast %95 : vector<8xf32> to vector<8x1xf32>
    %cst_40 = arith.constant 3.200000e+01 : f32
    %97 = vector.broadcast %cst_40 : f32 to vector<8x1xf32>
    %98 = arith.divf %96, %97 : vector<8x1xf32>
    %99 = vector.broadcast %98 : vector<8x1xf32> to vector<8x32xf32>
    %100 = arith.subf %92, %99 : vector<8x32xf32>
    %101 = arith.mulf %100, %100 : vector<8x32xf32>
    %cst_41 = arith.constant dense<0.000000e+00> : vector<8xf32>
    %102 = vector.multi_reduction <add>, %101, %cst_41 [1] : vector<8x32xf32> to vector<8xf32>
    %103 = vector.shape_cast %102 : vector<8xf32> to vector<8x1xf32>
    %cst_42 = arith.constant 3.200000e+01 : f32
    %104 = vector.broadcast %cst_42 : f32 to vector<8x1xf32>
    %105 = arith.divf %103, %104 : vector<8x1xf32>
    %106 = vector.broadcast %98 : vector<8x1xf32> to vector<8x32xf32>
    %107 = arith.subf %92, %106 : vector<8x32xf32>
    %cst_43 = arith.constant 9.99999974E-6 : f32
    %108 = vector.broadcast %cst_43 : f32 to vector<8x1xf32>
    %109 = arith.addf %105, %108 : vector<8x1xf32>
    %110 = math.rsqrt %109 : vector<8x1xf32>
    %111 = vector.broadcast %110 : vector<8x1xf32> to vector<8x32xf32>
    %112 = arith.mulf %107, %111 : vector<8x32xf32>
    %113 = vector.broadcast %93 : vector<1x32xf32> to vector<8x32xf32>
    %114 = arith.mulf %112, %113 : vector<8x32xf32>
    %115 = vector.broadcast %94 : vector<1x32xf32> to vector<8x32xf32>
    %116 = arith.addf %114, %115 : vector<8x32xf32>
    %c0_44 = arith.constant 0 : index
    %c0_45 = arith.constant 0 : index
    %117 = vector.load %arg8[%c0_44, %c0_45] : memref<32x64xf32, #tpu.memory_space<vmem>>, vector<32x64xf32>
    %cst_46 = arith.constant dense<0.000000e+00> : vector<8x64xf32>
    %118 = tpu.matmul %116, %117, %cst_46 {dimension_numbers = #tpu.dot_dimension_numbers<[1], [0], [0], [1], [0, 0, 1, 1], [], []>} : vector<8x32xf32>, vector<32x64xf32>, vector<8x64xf32> -> vector<8x64xf32>
    %c0_47 = arith.constant 0 : index
    %c0_48 = arith.constant 0 : index
    %119 = vector.load %arg9[%c0_47, %c0_48] : memref<1x64xf32, #tpu.memory_space<vmem>>, vector<1x64xf32>
    %120 = vector.broadcast %119 : vector<1x64xf32> to vector<8x64xf32>
    %121 = arith.addf %118, %120 : vector<8x64xf32>
    %cst_49 = arith.constant 0.000000e+00 : f32
    %122 = vector.broadcast %cst_49 : f32 to vector<8x64xf32>
    %123 = arith.maximumf %121, %122 : vector<8x64xf32>
    %c0_50 = arith.constant 0 : index
    %c0_51 = arith.constant 0 : index
    %124 = vector.load %arg10[%c0_50, %c0_51] : memref<64x32xf32, #tpu.memory_space<vmem>>, vector<64x32xf32>
    %cst_52 = arith.constant dense<0.000000e+00> : vector<8x32xf32>
    %125 = tpu.matmul %123, %124, %cst_52 {dimension_numbers = #tpu.dot_dimension_numbers<[1], [0], [0], [1], [0, 0, 1, 1], [], []>} : vector<8x64xf32>, vector<64x32xf32>, vector<8x32xf32> -> vector<8x32xf32>
    %c0_53 = arith.constant 0 : index
    %c0_54 = arith.constant 0 : index
    %126 = vector.load %arg11[%c0_53, %c0_54] : memref<1x32xf32, #tpu.memory_space<vmem>>, vector<1x32xf32>
    %127 = vector.broadcast %126 : vector<1x32xf32> to vector<8x32xf32>
    %128 = arith.addf %125, %127 : vector<8x32xf32>
    %129 = arith.addf %116, %128 : vector<8x32xf32>
    %c0_55 = arith.constant 0 : index
    %c0_56 = arith.constant 0 : index
    %130 = vector.load %arg12[%c0_55, %c0_56] : memref<1x32xf32, #tpu.memory_space<vmem>>, vector<1x32xf32>
    %c0_57 = arith.constant 0 : index
    %c0_58 = arith.constant 0 : index
    %131 = vector.load %arg13[%c0_57, %c0_58] : memref<1x32xf32, #tpu.memory_space<vmem>>, vector<1x32xf32>
    %cst_59 = arith.constant dense<0.000000e+00> : vector<8xf32>
    %132 = vector.multi_reduction <add>, %129, %cst_59 [1] : vector<8x32xf32> to vector<8xf32>
    %133 = vector.shape_cast %132 : vector<8xf32> to vector<8x1xf32>
    %cst_60 = arith.constant 3.200000e+01 : f32
    %134 = vector.broadcast %cst_60 : f32 to vector<8x1xf32>
    %135 = arith.divf %133, %134 : vector<8x1xf32>
    %136 = vector.broadcast %135 : vector<8x1xf32> to vector<8x32xf32>
    %137 = arith.subf %129, %136 : vector<8x32xf32>
    %138 = arith.mulf %137, %137 : vector<8x32xf32>
    %cst_61 = arith.constant dense<0.000000e+00> : vector<8xf32>
    %139 = vector.multi_reduction <add>, %138, %cst_61 [1] : vector<8x32xf32> to vector<8xf32>
    %140 = vector.shape_cast %139 : vector<8xf32> to vector<8x1xf32>
    %cst_62 = arith.constant 3.200000e+01 : f32
    %141 = vector.broadcast %cst_62 : f32 to vector<8x1xf32>
    %142 = arith.divf %140, %141 : vector<8x1xf32>
    %143 = vector.broadcast %135 : vector<8x1xf32> to vector<8x32xf32>
    %144 = arith.subf %129, %143 : vector<8x32xf32>
    %cst_63 = arith.constant 9.99999974E-6 : f32
    %145 = vector.broadcast %cst_63 : f32 to vector<8x1xf32>
    %146 = arith.addf %142, %145 : vector<8x1xf32>
    %147 = math.rsqrt %146 : vector<8x1xf32>
    %148 = vector.broadcast %147 : vector<8x1xf32> to vector<8x32xf32>
    %149 = arith.mulf %144, %148 : vector<8x32xf32>
    %150 = vector.broadcast %130 : vector<1x32xf32> to vector<8x32xf32>
    %151 = arith.mulf %149, %150 : vector<8x32xf32>
    %152 = vector.broadcast %131 : vector<1x32xf32> to vector<8x32xf32>
    %153 = arith.addf %151, %152 : vector<8x32xf32>
    %c0_64 = arith.constant 0 : index
    %c0_65 = arith.constant 0 : index
    %154 = vector.load %arg14[%c0_64, %c0_65] : memref<1x32xf32, #tpu.memory_space<vmem>>, vector<1x32xf32>
    %c0_66 = arith.constant 0 : index
    %c0_67 = arith.constant 0 : index
    %155 = vector.load %arg15[%c0_66, %c0_67] : memref<1x32xf32, #tpu.memory_space<vmem>>, vector<1x32xf32>
    %cst_68 = arith.constant dense<0.000000e+00> : vector<8xf32>
    %156 = vector.multi_reduction <add>, %153, %cst_68 [1] : vector<8x32xf32> to vector<8xf32>
    %157 = vector.shape_cast %156 : vector<8xf32> to vector<8x1xf32>
    %cst_69 = arith.constant 3.200000e+01 : f32
    %158 = vector.broadcast %cst_69 : f32 to vector<8x1xf32>
    %159 = arith.divf %157, %158 : vector<8x1xf32>
    %160 = vector.broadcast %159 : vector<8x1xf32> to vector<8x32xf32>
    %161 = arith.subf %153, %160 : vector<8x32xf32>
    %162 = arith.mulf %161, %161 : vector<8x32xf32>
    %cst_70 = arith.constant dense<0.000000e+00> : vector<8xf32>
    %163 = vector.multi_reduction <add>, %162, %cst_70 [1] : vector<8x32xf32> to vector<8xf32>
    %164 = vector.shape_cast %163 : vector<8xf32> to vector<8x1xf32>
    %cst_71 = arith.constant 3.200000e+01 : f32
    %165 = vector.broadcast %cst_71 : f32 to vector<8x1xf32>
    %166 = arith.divf %164, %165 : vector<8x1xf32>
    %167 = vector.broadcast %159 : vector<8x1xf32> to vector<8x32xf32>
    %168 = arith.subf %153, %167 : vector<8x32xf32>
    %cst_72 = arith.constant 9.99999974E-6 : f32
    %169 = vector.broadcast %cst_72 : f32 to vector<8x1xf32>
    %170 = arith.addf %166, %169 : vector<8x1xf32>
    %171 = math.rsqrt %170 : vector<8x1xf32>
    %172 = vector.broadcast %171 : vector<8x1xf32> to vector<8x32xf32>
    %173 = arith.mulf %168, %172 : vector<8x32xf32>
    %174 = vector.broadcast %154 : vector<1x32xf32> to vector<8x32xf32>
    %175 = arith.mulf %173, %174 : vector<8x32xf32>
    %176 = vector.broadcast %155 : vector<1x32xf32> to vector<8x32xf32>
    %177 = arith.addf %175, %176 : vector<8x32xf32>
    %c0_73 = arith.constant 0 : index
    %c0_74 = arith.constant 0 : index
    %c0_75 = arith.constant 0 : index
    %178 = vector.load %arg16[%c0_73, %c0_74, %c0_75] : memref<1x8x32xf32, #tpu.memory_space<vmem>>, vector<1x8x32xf32>
    %179 = vector.shape_cast %178 : vector<1x8x32xf32> to vector<8x32xf32>
    %180 = vector.shape_cast %177 : vector<8x32xf32> to vector<1x8x32xf32>
    tpu.vector_store %arg16[%c0_73, %c0_74, %c0_75], %180 {strides = array<i32>} : memref<1x8x32xf32, #tpu.memory_space<vmem>>, vector<1x8x32xf32>,
    return
  }
  func.func @transform_0(%arg0: i32) -> (i32, i32, i32) {
    %c0_i32 = arith.constant 0 : i32
    %c0_i32_0 = arith.constant 0 : i32
    %c0_i32_1 = arith.constant 0 : i32
    return %arg0, %c0_i32, %c0_i32_0 : i32, i32, i32
  }
  func.func @transform_1(%arg0: i32) -> (i32, i32) {
    %c0_i32 = arith.constant 0 : i32
    %c0_i32_0 = arith.constant 0 : i32
    %c0_i32_1 = arith.constant 0 : i32
    return %c0_i32, %c0_i32_0 : i32, i32
  }
  func.func @transform_2(%arg0: i32) -> (i32, i32) {
    %c0_i32 = arith.constant 0 : i32
    %c0_i32_0 = arith.constant 0 : i32
    %c0_i32_1 = arith.constant 0 : i32
    return %c0_i32, %c0_i32_0 : i32, i32
  }
  func.func @transform_3(%arg0: i32) -> (i32, i32) {
    %c0_i32 = arith.constant 0 : i32
    %c0_i32_0 = arith.constant 0 : i32
    %c0_i32_1 = arith.constant 0 : i32
    return %c0_i32, %c0_i32_0 : i32, i32
  }
  func.func @transform_4(%arg0: i32) -> (i32, i32) {
    %c0_i32 = arith.constant 0 : i32
    %c0_i32_0 = arith.constant 0 : i32
    %c0_i32_1 = arith.constant 0 : i32
    return %c0_i32, %c0_i32_0 : i32, i32
  }
  func.func @transform_5(%arg0: i32) -> (i32, i32) {
    %c0_i32 = arith.constant 0 : i32
    %c0_i32_0 = arith.constant 0 : i32
    %c0_i32_1 = arith.constant 0 : i32
    return %c0_i32, %c0_i32_0 : i32, i32
  }
  func.func @transform_6(%arg0: i32) -> (i32, i32) {
    %c0_i32 = arith.constant 0 : i32
    %c0_i32_0 = arith.constant 0 : i32
    %c0_i32_1 = arith.constant 0 : i32
    return %c0_i32, %c0_i32_0 : i32, i32
  }
  func.func @transform_7(%arg0: i32) -> (i32, i32) {
    %c0_i32 = arith.constant 0 : i32
    %c0_i32_0 = arith.constant 0 : i32
    %c0_i32_1 = arith.constant 0 : i32
    return %c0_i32, %c0_i32_0 : i32, i32
  }
  func.func @transform_8(%arg0: i32) -> (i32, i32) {
    %c0_i32 = arith.constant 0 : i32
    %c0_i32_0 = arith.constant 0 : i32
    %c0_i32_1 = arith.constant 0 : i32
    return %c0_i32, %c0_i32_0 : i32, i32
  }
  func.func @transform_9(%arg0: i32) -> (i32, i32) {
    %c0_i32 = arith.constant 0 : i32
    %c0_i32_0 = arith.constant 0 : i32
    %c0_i32_1 = arith.constant 0 : i32
    return %c0_i32, %c0_i32_0 : i32, i32
  }
  func.func @transform_10(%arg0: i32) -> (i32, i32) {
    %c0_i32 = arith.constant 0 : i32
    %c0_i32_0 = arith.constant 0 : i32
    %c0_i32_1 = arith.constant 0 : i32
    return %c0_i32, %c0_i32_0 : i32, i32
  }
  func.func @transform_11(%arg0: i32) -> (i32, i32) {
    %c0_i32 = arith.constant 0 : i32
    %c0_i32_0 = arith.constant 0 : i32
    %c0_i32_1 = arith.constant 0 : i32
    return %c0_i32, %c0_i32_0 : i32, i32
  }
  func.func @transform_12(%arg0: i32) -> (i32, i32) {
    %c0_i32 = arith.constant 0 : i32
    %c0_i32_0 = arith.constant 0 : i32
    %c0_i32_1 = arith.constant 0 : i32
    return %c0_i32, %c0_i32_0 : i32, i32
  }
  func.func @transform_13(%arg0: i32) -> (i32, i32) {
    %c0_i32 = arith.constant 0 : i32
    %c0_i32_0 = arith.constant 0 : i32
    %c0_i32_1 = arith.constant 0 : i32
    return %c0_i32, %c0_i32_0 : i32, i32
  }
  func.func @transform_14(%arg0: i32) -> (i32, i32) {
    %c0_i32 = arith.constant 0 : i32
    %c0_i32_0 = arith.constant 0 : i32
    %c0_i32_1 = arith.constant 0 : i32
    return %c0_i32, %c0_i32_0 : i32, i32
  }
  func.func @transform_15(%arg0: i32) -> (i32, i32, i32) {
    %c0_i32 = arith.constant 0 : i32
    %c0_i32_0 = arith.constant 0 : i32
    %c0_i32_1 = arith.constant 0 : i32
    return %arg0, %c0_i32, %c0_i32_0 : i32, i32, i32
  }
}

module attributes {stable_mosaic.version = 11 : i64} {
  func.func @_decoder_layer_kernel(%arg0: i32, %arg1: memref<1x8x32xf32, #tpu.memory_space<vmem>>, %arg2: memref<1x8x32xf32, #tpu.memory_space<vmem>>, %arg3: memref<8x8xf32, #tpu.memory_space<vmem>>, %arg4: memref<32x96xf32, #tpu.memory_space<vmem>>, %arg5: memref<1x96xf32, #tpu.memory_space<vmem>>, %arg6: memref<32x32xf32, #tpu.memory_space<vmem>>, %arg7: memref<1x32xf32, #tpu.memory_space<vmem>>, %arg8: memref<1x32xf32, #tpu.memory_space<vmem>>, %arg9: memref<1x32xf32, #tpu.memory_space<vmem>>, %arg10: memref<32x32xf32, #tpu.memory_space<vmem>>, %arg11: memref<1x32xf32, #tpu.memory_space<vmem>>, %arg12: memref<32x64xf32, #tpu.memory_space<vmem>>, %arg13: memref<1x64xf32, #tpu.memory_space<vmem>>, %arg14: memref<32x32xf32, #tpu.memory_space<vmem>>, %arg15: memref<1x32xf32, #tpu.memory_space<vmem>>, %arg16: memref<1x32xf32, #tpu.memory_space<vmem>>, %arg17: memref<1x32xf32, #tpu.memory_space<vmem>>, %arg18: memref<32x64xf32, #tpu.memory_space<vmem>>, %arg19: memref<1x64xf32, #tpu.memory_space<vmem>>, %arg20: memref<64x32xf32, #tpu.memory_space<vmem>>, %arg21: memref<1x32xf32, #tpu.memory_space<vmem>>, %arg22: memref<1x32xf32, #tpu.memory_space<vmem>>, %arg23: memref<1x32xf32, #tpu.memory_space<vmem>>, %arg24: memref<1x8x32xf32, #tpu.memory_space<vmem>>) attributes {dimension_semantics = [#tpu.dimension_semantics<parallel>], iteration_bounds = array<i64: 2>, scalar_prefetch = 0 : i64, scratch_operands = 0 : i64, tpu.core_type = #tpu.core_type<tc>, window_params = [{transform_indices = @transform_0, window_bounds = array<i64: 1, 8, 32>}, {transform_indices = @transform_1, window_bounds = array<i64: 1, 8, 32>}, {pipeline_mode = #tpu.pipeline_mode<synchronous>, transform_indices = @transform_2, window_bounds = array<i64: 8, 8>}, {pipeline_mode = #tpu.pipeline_mode<synchronous>, transform_indices = @transform_3, window_bounds = array<i64: 32, 96>}, {pipeline_mode = #tpu.pipeline_mode<synchronous>, transform_indices = @transform_4, window_bounds = array<i64: 1, 96>}, {pipeline_mode = #tpu.pipeline_mode<synchronous>, transform_indices = @transform_5, window_bounds = array<i64: 32, 32>}, {pipeline_mode = #tpu.pipeline_mode<synchronous>, transform_indices = @transform_6, window_bounds = array<i64: 1, 32>}, {pipeline_mode = #tpu.pipeline_mode<synchronous>, transform_indices = @transform_7, window_bounds = array<i64: 1, 32>}, {pipeline_mode = #tpu.pipeline_mode<synchronous>, transform_indices = @transform_8, window_bounds = array<i64: 1, 32>}, {pipeline_mode = #tpu.pipeline_mode<synchronous>, transform_indices = @transform_9, window_bounds = array<i64: 32, 32>}, {pipeline_mode = #tpu.pipeline_mode<synchronous>, transform_indices = @transform_10, window_bounds = array<i64: 1, 32>}, {pipeline_mode = #tpu.pipeline_mode<synchronous>, transform_indices = @transform_11, window_bounds = array<i64: 32, 64>}, {pipeline_mode = #tpu.pipeline_mode<synchronous>, transform_indices = @transform_12, window_bounds = array<i64: 1, 64>}, {pipeline_mode = #tpu.pipeline_mode<synchronous>, transform_indices = @transform_13, window_bounds = array<i64: 32, 32>}, {pipeline_mode = #tpu.pipeline_mode<synchronous>, transform_indices = @transform_14, window_bounds = array<i64: 1, 32>}, {pipeline_mode = #tpu.pipeline_mode<synchronous>, transform_indices = @transform_15, window_bounds = array<i64: 1, 32>}, {pipeline_mode = #tpu.pipeline_mode<synchronous>, transform_indices = @transform_16, window_bounds = array<i64: 1, 32>}, {pipeline_mode = #tpu.pipeline_mode<synchronous>, transform_indices = @transform_17, window_bounds = array<i64: 32, 64>}, {pipeline_mode = #tpu.pipeline_mode<synchronous>, transform_indices = @transform_18, window_bounds = array<i64: 1, 64>}, {pipeline_mode = #tpu.pipeline_mode<synchronous>, transform_indices = @transform_19, window_bounds = array<i64: 64, 32>}, {pipeline_mode = #tpu.pipeline_mode<synchronous>, transform_indices = @transform_20, window_bounds = array<i64: 1, 32>}, {pipeline_mode = #tpu.pipeline_mode<synchronous>, transform_indices = @transform_21, window_bounds = array<i64: 1, 32>}, {pipeline_mode = #tpu.pipeline_mode<synchronous>, transform_indices = @transform_22, window_bounds = array<i64: 1, 32>}, {transform_indices = @transform_23, window_bounds = array<i64: 1, 8, 32>}]} {
    %c0 = arith.constant 0 : index
    %c0_0 = arith.constant 0 : index
    %c0_1 = arith.constant 0 : index
    %0 = vector.load %arg1[%c0, %c0_0, %c0_1] : memref<1x8x32xf32, #tpu.memory_space<vmem>>, vector<1x8x32xf32>
    %1 = vector.shape_cast %0 : vector<1x8x32xf32> to vector<8x32xf32>
    %c0_2 = arith.constant 0 : index
    %c0_3 = arith.constant 0 : index
    %c0_4 = arith.constant 0 : index
    %2 = vector.load %arg2[%c0_2, %c0_3, %c0_4] : memref<1x8x32xf32, #tpu.memory_space<vmem>>, vector<1x8x32xf32>
    %3 = vector.shape_cast %2 : vector<1x8x32xf32> to vector<8x32xf32>
    %c0_5 = arith.constant 0 : index
    %c0_6 = arith.constant 0 : index
    %4 = vector.load %arg4[%c0_5, %c0_6] : memref<32x96xf32, #tpu.memory_space<vmem>>, vector<32x96xf32>
    %c0_7 = arith.constant 0 : index
    %c0_8 = arith.constant 0 : index
    %5 = vector.load %arg5[%c0_7, %c0_8] : memref<1x96xf32, #tpu.memory_space<vmem>>, vector<1x96xf32>
    %c0_9 = arith.constant 0 : index
    %c0_10 = arith.constant 0 : index
    %6 = vector.load %arg6[%c0_9, %c0_10] : memref<32x32xf32, #tpu.memory_space<vmem>>, vector<32x32xf32>
    %c0_11 = arith.constant 0 : index
    %c0_12 = arith.constant 0 : index
    %7 = vector.load %arg7[%c0_11, %c0_12] : memref<1x32xf32, #tpu.memory_space<vmem>>, vector<1x32xf32>
    %c0_13 = arith.constant 0 : index
    %c0_14 = arith.constant 0 : index
    %8 = vector.load %arg3[%c0_13, %c0_14] : memref<8x8xf32, #tpu.memory_space<vmem>>, vector<8x8xf32>
    %cst = arith.constant dense<0.000000e+00> : vector<8x96xf32>
    %9 = tpu.matmul %1, %4, %cst {dimension_numbers = #tpu.dot_dimension_numbers<[1], [0], [0], [1], [0, 0, 1, 1], [], []>} : vector<8x32xf32>, vector<32x96xf32>, vector<8x96xf32> -> vector<8x96xf32>
    %10 = vector.broadcast %5 : vector<1x96xf32> to vector<8x96xf32>
    %11 = arith.addf %9, %10 : vector<8x96xf32>
    %cst_15 = arith.constant 0.000000e+00 : f32
    %12 = vector.broadcast %cst_15 : f32 to vector<8x32xf32>
    %13 = vector.extract_strided_slice %11 {offsets = [0, 0], sizes = [8, 8], strides = [1, 1]} : vector<8x96xf32> to vector<8x8xf32>
    %14 = vector.extract_strided_slice %11 {offsets = [0, 32], sizes = [8, 8], strides = [1, 1]} : vector<8x96xf32> to vector<8x8xf32>
    %15 = vector.extract_strided_slice %11 {offsets = [0, 64], sizes = [8, 8], strides = [1, 1]} : vector<8x96xf32> to vector<8x8xf32>
    %cst_16 = arith.constant dense<0.000000e+00> : vector<8x8xf32>
    %16 = tpu.matmul %13, %14, %cst_16 {dimension_numbers = #tpu.dot_dimension_numbers<[1], [1], [0], [0], [0, 0, 1, 0], [], []>} : vector<8x8xf32>, vector<8x8xf32>, vector<8x8xf32> -> vector<8x8xf32>
    %cst_17 = arith.constant 0.353553385 : f32
    %17 = vector.broadcast %cst_17 : f32 to vector<8x8xf32>
    %18 = arith.mulf %16, %17 : vector<8x8xf32>
    %19 = arith.addf %18, %8 : vector<8x8xf32>
    %cst_18 = arith.constant dense<0xFF800000> : vector<8xf32>
    %20 = vector.multi_reduction <maximumf>, %19, %cst_18 [1] : vector<8x8xf32> to vector<8xf32>
    %21 = vector.shape_cast %20 : vector<8xf32> to vector<8x1xf32>
    %22 = vector.broadcast %21 : vector<8x1xf32> to vector<8x8xf32>
    %23 = arith.subf %19, %22 : vector<8x8xf32>
    %24 = math.exp %23 : vector<8x8xf32>
    %cst_19 = arith.constant dense<0.000000e+00> : vector<8xf32>
    %25 = vector.multi_reduction <add>, %24, %cst_19 [1] : vector<8x8xf32> to vector<8xf32>
    %26 = vector.shape_cast %25 : vector<8xf32> to vector<8x1xf32>
    %27 = tpu.reciprocal %26 {approx = true} : vector<8x1xf32> -> vector<8x1xf32>
    %28 = vector.broadcast %27 : vector<8x1xf32> to vector<8x8xf32>
    %29 = arith.mulf %24, %28 : vector<8x8xf32>
    %cst_20 = arith.constant dense<0.000000e+00> : vector<8x8xf32>
    %30 = tpu.matmul %29, %15, %cst_20 {dimension_numbers = #tpu.dot_dimension_numbers<[1], [0], [0], [1], [0, 0, 1, 1], [], []>} : vector<8x8xf32>, vector<8x8xf32>, vector<8x8xf32> -> vector<8x8xf32>
    %31 = vector.extract_strided_slice %6 {offsets = [0, 0], sizes = [8, 32], strides = [1, 1]} : vector<32x32xf32> to vector<8x32xf32>
    %cst_21 = arith.constant dense<0.000000e+00> : vector<8x32xf32>
    %32 = tpu.matmul %30, %31, %cst_21 {dimension_numbers = #tpu.dot_dimension_numbers<[1], [0], [0], [1], [0, 0, 1, 1], [], []>} : vector<8x8xf32>, vector<8x32xf32>, vector<8x32xf32> -> vector<8x32xf32>
    %33 = arith.addf %12, %32 : vector<8x32xf32>
    %34 = vector.extract_strided_slice %11 {offsets = [0, 8], sizes = [8, 8], strides = [1, 1]} : vector<8x96xf32> to vector<8x8xf32>
    %35 = vector.extract_strided_slice %11 {offsets = [0, 40], sizes = [8, 8], strides = [1, 1]} : vector<8x96xf32> to vector<8x8xf32>
    %36 = vector.extract_strided_slice %11 {offsets = [0, 72], sizes = [8, 8], strides = [1, 1]} : vector<8x96xf32> to vector<8x8xf32>
    %cst_22 = arith.constant dense<0.000000e+00> : vector<8x8xf32>
    %37 = tpu.matmul %34, %35, %cst_22 {dimension_numbers = #tpu.dot_dimension_numbers<[1], [1], [0], [0], [0, 0, 1, 0], [], []>} : vector<8x8xf32>, vector<8x8xf32>, vector<8x8xf32> -> vector<8x8xf32>
    %cst_23 = arith.constant 0.353553385 : f32
    %38 = vector.broadcast %cst_23 : f32 to vector<8x8xf32>
    %39 = arith.mulf %37, %38 : vector<8x8xf32>
    %40 = arith.addf %39, %8 : vector<8x8xf32>
    %cst_24 = arith.constant dense<0xFF800000> : vector<8xf32>
    %41 = vector.multi_reduction <maximumf>, %40, %cst_24 [1] : vector<8x8xf32> to vector<8xf32>
    %42 = vector.shape_cast %41 : vector<8xf32> to vector<8x1xf32>
    %43 = vector.broadcast %42 : vector<8x1xf32> to vector<8x8xf32>
    %44 = arith.subf %40, %43 : vector<8x8xf32>
    %45 = math.exp %44 : vector<8x8xf32>
    %cst_25 = arith.constant dense<0.000000e+00> : vector<8xf32>
    %46 = vector.multi_reduction <add>, %45, %cst_25 [1] : vector<8x8xf32> to vector<8xf32>
    %47 = vector.shape_cast %46 : vector<8xf32> to vector<8x1xf32>
    %48 = tpu.reciprocal %47 {approx = true} : vector<8x1xf32> -> vector<8x1xf32>
    %49 = vector.broadcast %48 : vector<8x1xf32> to vector<8x8xf32>
    %50 = arith.mulf %45, %49 : vector<8x8xf32>
    %cst_26 = arith.constant dense<0.000000e+00> : vector<8x8xf32>
    %51 = tpu.matmul %50, %36, %cst_26 {dimension_numbers = #tpu.dot_dimension_numbers<[1], [0], [0], [1], [0, 0, 1, 1], [], []>} : vector<8x8xf32>, vector<8x8xf32>, vector<8x8xf32> -> vector<8x8xf32>
    %52 = vector.extract_strided_slice %6 {offsets = [8, 0], sizes = [8, 32], strides = [1, 1]} : vector<32x32xf32> to vector<8x32xf32>
    %cst_27 = arith.constant dense<0.000000e+00> : vector<8x32xf32>
    %53 = tpu.matmul %51, %52, %cst_27 {dimension_numbers = #tpu.dot_dimension_numbers<[1], [0], [0], [1], [0, 0, 1, 1], [], []>} : vector<8x8xf32>, vector<8x32xf32>, vector<8x32xf32> -> vector<8x32xf32>
    %54 = arith.addf %33, %53 : vector<8x32xf32>
    %55 = vector.extract_strided_slice %11 {offsets = [0, 16], sizes = [8, 8], strides = [1, 1]} : vector<8x96xf32> to vector<8x8xf32>
    %56 = vector.extract_strided_slice %11 {offsets = [0, 48], sizes = [8, 8], strides = [1, 1]} : vector<8x96xf32> to vector<8x8xf32>
    %57 = vector.extract_strided_slice %11 {offsets = [0, 80], sizes = [8, 8], strides = [1, 1]} : vector<8x96xf32> to vector<8x8xf32>
    %cst_28 = arith.constant dense<0.000000e+00> : vector<8x8xf32>
    %58 = tpu.matmul %55, %56, %cst_28 {dimension_numbers = #tpu.dot_dimension_numbers<[1], [1], [0], [0], [0, 0, 1, 0], [], []>} : vector<8x8xf32>, vector<8x8xf32>, vector<8x8xf32> -> vector<8x8xf32>
    %cst_29 = arith.constant 0.353553385 : f32
    %59 = vector.broadcast %cst_29 : f32 to vector<8x8xf32>
    %60 = arith.mulf %58, %59 : vector<8x8xf32>
    %61 = arith.addf %60, %8 : vector<8x8xf32>
    %cst_30 = arith.constant dense<0xFF800000> : vector<8xf32>
    %62 = vector.multi_reduction <maximumf>, %61, %cst_30 [1] : vector<8x8xf32> to vector<8xf32>
    %63 = vector.shape_cast %62 : vector<8xf32> to vector<8x1xf32>
    %64 = vector.broadcast %63 : vector<8x1xf32> to vector<8x8xf32>
    %65 = arith.subf %61, %64 : vector<8x8xf32>
    %66 = math.exp %65 : vector<8x8xf32>
    %cst_31 = arith.constant dense<0.000000e+00> : vector<8xf32>
    %67 = vector.multi_reduction <add>, %66, %cst_31 [1] : vector<8x8xf32> to vector<8xf32>
    %68 = vector.shape_cast %67 : vector<8xf32> to vector<8x1xf32>
    %69 = tpu.reciprocal %68 {approx = true} : vector<8x1xf32> -> vector<8x1xf32>
    %70 = vector.broadcast %69 : vector<8x1xf32> to vector<8x8xf32>
    %71 = arith.mulf %66, %70 : vector<8x8xf32>
    %cst_32 = arith.constant dense<0.000000e+00> : vector<8x8xf32>
    %72 = tpu.matmul %71, %57, %cst_32 {dimension_numbers = #tpu.dot_dimension_numbers<[1], [0], [0], [1], [0, 0, 1, 1], [], []>} : vector<8x8xf32>, vector<8x8xf32>, vector<8x8xf32> -> vector<8x8xf32>
    %73 = vector.extract_strided_slice %6 {offsets = [16, 0], sizes = [8, 32], strides = [1, 1]} : vector<32x32xf32> to vector<8x32xf32>
    %cst_33 = arith.constant dense<0.000000e+00> : vector<8x32xf32>
    %74 = tpu.matmul %72, %73, %cst_33 {dimension_numbers = #tpu.dot_dimension_numbers<[1], [0], [0], [1], [0, 0, 1, 1], [], []>} : vector<8x8xf32>, vector<8x32xf32>, vector<8x32xf32> -> vector<8x32xf32>
    %75 = arith.addf %54, %74 : vector<8x32xf32>
    %76 = vector.extract_strided_slice %11 {offsets = [0, 24], sizes = [8, 8], strides = [1, 1]} : vector<8x96xf32> to vector<8x8xf32>
    %77 = vector.extract_strided_slice %11 {offsets = [0, 56], sizes = [8, 8], strides = [1, 1]} : vector<8x96xf32> to vector<8x8xf32>
    %78 = vector.extract_strided_slice %11 {offsets = [0, 88], sizes = [8, 8], strides = [1, 1]} : vector<8x96xf32> to vector<8x8xf32>
    %cst_34 = arith.constant dense<0.000000e+00> : vector<8x8xf32>
    %79 = tpu.matmul %76, %77, %cst_34 {dimension_numbers = #tpu.dot_dimension_numbers<[1], [1], [0], [0], [0, 0, 1, 0], [], []>} : vector<8x8xf32>, vector<8x8xf32>, vector<8x8xf32> -> vector<8x8xf32>
    %cst_35 = arith.constant 0.353553385 : f32
    %80 = vector.broadcast %cst_35 : f32 to vector<8x8xf32>
    %81 = arith.mulf %79, %80 : vector<8x8xf32>
    %82 = arith.addf %81, %8 : vector<8x8xf32>
    %cst_36 = arith.constant dense<0xFF800000> : vector<8xf32>
    %83 = vector.multi_reduction <maximumf>, %82, %cst_36 [1] : vector<8x8xf32> to vector<8xf32>
    %84 = vector.shape_cast %83 : vector<8xf32> to vector<8x1xf32>
    %85 = vector.broadcast %84 : vector<8x1xf32> to vector<8x8xf32>
    %86 = arith.subf %82, %85 : vector<8x8xf32>
    %87 = math.exp %86 : vector<8x8xf32>
    %cst_37 = arith.constant dense<0.000000e+00> : vector<8xf32>
    %88 = vector.multi_reduction <add>, %87, %cst_37 [1] : vector<8x8xf32> to vector<8xf32>
    %89 = vector.shape_cast %88 : vector<8xf32> to vector<8x1xf32>
    %90 = tpu.reciprocal %89 {approx = true} : vector<8x1xf32> -> vector<8x1xf32>
    %91 = vector.broadcast %90 : vector<8x1xf32> to vector<8x8xf32>
    %92 = arith.mulf %87, %91 : vector<8x8xf32>
    %cst_38 = arith.constant dense<0.000000e+00> : vector<8x8xf32>
    %93 = tpu.matmul %92, %78, %cst_38 {dimension_numbers = #tpu.dot_dimension_numbers<[1], [0], [0], [1], [0, 0, 1, 1], [], []>} : vector<8x8xf32>, vector<8x8xf32>, vector<8x8xf32> -> vector<8x8xf32>
    %94 = vector.extract_strided_slice %6 {offsets = [24, 0], sizes = [8, 32], strides = [1, 1]} : vector<32x32xf32> to vector<8x32xf32>
    %cst_39 = arith.constant dense<0.000000e+00> : vector<8x32xf32>
    %95 = tpu.matmul %93, %94, %cst_39 {dimension_numbers = #tpu.dot_dimension_numbers<[1], [0], [0], [1], [0, 0, 1, 1], [], []>} : vector<8x8xf32>, vector<8x32xf32>, vector<8x32xf32> -> vector<8x32xf32>
    %96 = arith.addf %75, %95 : vector<8x32xf32>
    %97 = vector.broadcast %7 : vector<1x32xf32> to vector<8x32xf32>
    %98 = arith.addf %96, %97 : vector<8x32xf32>
    %99 = arith.addf %1, %98 : vector<8x32xf32>
    %c0_40 = arith.constant 0 : index
    %c0_41 = arith.constant 0 : index
    %100 = vector.load %arg8[%c0_40, %c0_41] : memref<1x32xf32, #tpu.memory_space<vmem>>, vector<1x32xf32>
    %c0_42 = arith.constant 0 : index
    %c0_43 = arith.constant 0 : index
    %101 = vector.load %arg9[%c0_42, %c0_43] : memref<1x32xf32, #tpu.memory_space<vmem>>, vector<1x32xf32>
    %cst_44 = arith.constant dense<0.000000e+00> : vector<8xf32>
    %102 = vector.multi_reduction <add>, %99, %cst_44 [1] : vector<8x32xf32> to vector<8xf32>
    %103 = vector.shape_cast %102 : vector<8xf32> to vector<8x1xf32>
    %cst_45 = arith.constant 3.200000e+01 : f32
    %104 = vector.broadcast %cst_45 : f32 to vector<8x1xf32>
    %105 = arith.divf %103, %104 : vector<8x1xf32>
    %106 = vector.broadcast %105 : vector<8x1xf32> to vector<8x32xf32>
    %107 = arith.subf %99, %106 : vector<8x32xf32>
    %108 = arith.mulf %107, %107 : vector<8x32xf32>
    %cst_46 = arith.constant dense<0.000000e+00> : vector<8xf32>
    %109 = vector.multi_reduction <add>, %108, %cst_46 [1] : vector<8x32xf32> to vector<8xf32>
    %110 = vector.shape_cast %109 : vector<8xf32> to vector<8x1xf32>
    %cst_47 = arith.constant 3.200000e+01 : f32
    %111 = vector.broadcast %cst_47 : f32 to vector<8x1xf32>
    %112 = arith.divf %110, %111 : vector<8x1xf32>
    %113 = vector.broadcast %105 : vector<8x1xf32> to vector<8x32xf32>
    %114 = arith.subf %99, %113 : vector<8x32xf32>
    %cst_48 = arith.constant 9.99999974E-6 : f32
    %115 = vector.broadcast %cst_48 : f32 to vector<8x1xf32>
    %116 = arith.addf %112, %115 : vector<8x1xf32>
    %117 = math.rsqrt %116 : vector<8x1xf32>
    %118 = vector.broadcast %117 : vector<8x1xf32> to vector<8x32xf32>
    %119 = arith.mulf %114, %118 : vector<8x32xf32>
    %120 = vector.broadcast %100 : vector<1x32xf32> to vector<8x32xf32>
    %121 = arith.mulf %119, %120 : vector<8x32xf32>
    %122 = vector.broadcast %101 : vector<1x32xf32> to vector<8x32xf32>
    %123 = arith.addf %121, %122 : vector<8x32xf32>
    %c0_49 = arith.constant 0 : index
    %c0_50 = arith.constant 0 : index
    %124 = vector.load %arg10[%c0_49, %c0_50] : memref<32x32xf32, #tpu.memory_space<vmem>>, vector<32x32xf32>
    %c0_51 = arith.constant 0 : index
    %c0_52 = arith.constant 0 : index
    %125 = vector.load %arg11[%c0_51, %c0_52] : memref<1x32xf32, #tpu.memory_space<vmem>>, vector<1x32xf32>
    %c0_53 = arith.constant 0 : index
    %c0_54 = arith.constant 0 : index
    %126 = vector.load %arg12[%c0_53, %c0_54] : memref<32x64xf32, #tpu.memory_space<vmem>>, vector<32x64xf32>
    %c0_55 = arith.constant 0 : index
    %c0_56 = arith.constant 0 : index
    %127 = vector.load %arg13[%c0_55, %c0_56] : memref<1x64xf32, #tpu.memory_space<vmem>>, vector<1x64xf32>
    %c0_57 = arith.constant 0 : index
    %c0_58 = arith.constant 0 : index
    %128 = vector.load %arg14[%c0_57, %c0_58] : memref<32x32xf32, #tpu.memory_space<vmem>>, vector<32x32xf32>
    %c0_59 = arith.constant 0 : index
    %c0_60 = arith.constant 0 : index
    %129 = vector.load %arg15[%c0_59, %c0_60] : memref<1x32xf32, #tpu.memory_space<vmem>>, vector<1x32xf32>
    %cst_61 = arith.constant dense<0.000000e+00> : vector<8x32xf32>
    %130 = tpu.matmul %123, %124, %cst_61 {dimension_numbers = #tpu.dot_dimension_numbers<[1], [0], [0], [1], [0, 0, 1, 1], [], []>} : vector<8x32xf32>, vector<32x32xf32>, vector<8x32xf32> -> vector<8x32xf32>
    %131 = vector.broadcast %125 : vector<1x32xf32> to vector<8x32xf32>
    %132 = arith.addf %130, %131 : vector<8x32xf32>
    %cst_62 = arith.constant dense<0.000000e+00> : vector<8x64xf32>
    %133 = tpu.matmul %3, %126, %cst_62 {dimension_numbers = #tpu.dot_dimension_numbers<[1], [0], [0], [1], [0, 0, 1, 1], [], []>} : vector<8x32xf32>, vector<32x64xf32>, vector<8x64xf32> -> vector<8x64xf32>
    %134 = vector.broadcast %127 : vector<1x64xf32> to vector<8x64xf32>
    %135 = arith.addf %133, %134 : vector<8x64xf32>
    %cst_63 = arith.constant 0.000000e+00 : f32
    %136 = vector.broadcast %cst_63 : f32 to vector<8x32xf32>
    %137 = vector.extract_strided_slice %132 {offsets = [0, 0], sizes = [8, 8], strides = [1, 1]} : vector<8x32xf32> to vector<8x8xf32>
    %138 = vector.extract_strided_slice %135 {offsets = [0, 0], sizes = [8, 8], strides = [1, 1]} : vector<8x64xf32> to vector<8x8xf32>
    %139 = vector.extract_strided_slice %135 {offsets = [0, 32], sizes = [8, 8], strides = [1, 1]} : vector<8x64xf32> to vector<8x8xf32>
    %cst_64 = arith.constant dense<0.000000e+00> : vector<8x8xf32>
    %140 = tpu.matmul %137, %138, %cst_64 {dimension_numbers = #tpu.dot_dimension_numbers<[1], [1], [0], [0], [0, 0, 1, 0], [], []>} : vector<8x8xf32>, vector<8x8xf32>, vector<8x8xf32> -> vector<8x8xf32>
    %cst_65 = arith.constant 0.353553385 : f32
    %141 = vector.broadcast %cst_65 : f32 to vector<8x8xf32>
    %142 = arith.mulf %140, %141 : vector<8x8xf32>
    %cst_66 = arith.constant dense<0xFF800000> : vector<8xf32>
    %143 = vector.multi_reduction <maximumf>, %142, %cst_66 [1] : vector<8x8xf32> to vector<8xf32>
    %144 = vector.shape_cast %143 : vector<8xf32> to vector<8x1xf32>
    %145 = vector.broadcast %144 : vector<8x1xf32> to vector<8x8xf32>
    %146 = arith.subf %142, %145 : vector<8x8xf32>
    %147 = math.exp %146 : vector<8x8xf32>
    %cst_67 = arith.constant dense<0.000000e+00> : vector<8xf32>
    %148 = vector.multi_reduction <add>, %147, %cst_67 [1] : vector<8x8xf32> to vector<8xf32>
    %149 = vector.shape_cast %148 : vector<8xf32> to vector<8x1xf32>
    %150 = tpu.reciprocal %149 {approx = true} : vector<8x1xf32> -> vector<8x1xf32>
    %151 = vector.broadcast %150 : vector<8x1xf32> to vector<8x8xf32>
    %152 = arith.mulf %147, %151 : vector<8x8xf32>
    %cst_68 = arith.constant dense<0.000000e+00> : vector<8x8xf32>
    %153 = tpu.matmul %152, %139, %cst_68 {dimension_numbers = #tpu.dot_dimension_numbers<[1], [0], [0], [1], [0, 0, 1, 1], [], []>} : vector<8x8xf32>, vector<8x8xf32>, vector<8x8xf32> -> vector<8x8xf32>
    %154 = vector.extract_strided_slice %128 {offsets = [0, 0], sizes = [8, 32], strides = [1, 1]} : vector<32x32xf32> to vector<8x32xf32>
    %cst_69 = arith.constant dense<0.000000e+00> : vector<8x32xf32>
    %155 = tpu.matmul %153, %154, %cst_69 {dimension_numbers = #tpu.dot_dimension_numbers<[1], [0], [0], [1], [0, 0, 1, 1], [], []>} : vector<8x8xf32>, vector<8x32xf32>, vector<8x32xf32> -> vector<8x32xf32>
    %156 = arith.addf %136, %155 : vector<8x32xf32>
    %157 = vector.extract_strided_slice %132 {offsets = [0, 8], sizes = [8, 8], strides = [1, 1]} : vector<8x32xf32> to vector<8x8xf32>
    %158 = vector.extract_strided_slice %135 {offsets = [0, 8], sizes = [8, 8], strides = [1, 1]} : vector<8x64xf32> to vector<8x8xf32>
    %159 = vector.extract_strided_slice %135 {offsets = [0, 40], sizes = [8, 8], strides = [1, 1]} : vector<8x64xf32> to vector<8x8xf32>
    %cst_70 = arith.constant dense<0.000000e+00> : vector<8x8xf32>
    %160 = tpu.matmul %157, %158, %cst_70 {dimension_numbers = #tpu.dot_dimension_numbers<[1], [1], [0], [0], [0, 0, 1, 0], [], []>} : vector<8x8xf32>, vector<8x8xf32>, vector<8x8xf32> -> vector<8x8xf32>
    %cst_71 = arith.constant 0.353553385 : f32
    %161 = vector.broadcast %cst_71 : f32 to vector<8x8xf32>
    %162 = arith.mulf %160, %161 : vector<8x8xf32>
    %cst_72 = arith.constant dense<0xFF800000> : vector<8xf32>
    %163 = vector.multi_reduction <maximumf>, %162, %cst_72 [1] : vector<8x8xf32> to vector<8xf32>
    %164 = vector.shape_cast %163 : vector<8xf32> to vector<8x1xf32>
    %165 = vector.broadcast %164 : vector<8x1xf32> to vector<8x8xf32>
    %166 = arith.subf %162, %165 : vector<8x8xf32>
    %167 = math.exp %166 : vector<8x8xf32>
    %cst_73 = arith.constant dense<0.000000e+00> : vector<8xf32>
    %168 = vector.multi_reduction <add>, %167, %cst_73 [1] : vector<8x8xf32> to vector<8xf32>
    %169 = vector.shape_cast %168 : vector<8xf32> to vector<8x1xf32>
    %170 = tpu.reciprocal %169 {approx = true} : vector<8x1xf32> -> vector<8x1xf32>
    %171 = vector.broadcast %170 : vector<8x1xf32> to vector<8x8xf32>
    %172 = arith.mulf %167, %171 : vector<8x8xf32>
    %cst_74 = arith.constant dense<0.000000e+00> : vector<8x8xf32>
    %173 = tpu.matmul %172, %159, %cst_74 {dimension_numbers = #tpu.dot_dimension_numbers<[1], [0], [0], [1], [0, 0, 1, 1], [], []>} : vector<8x8xf32>, vector<8x8xf32>, vector<8x8xf32> -> vector<8x8xf32>
    %174 = vector.extract_strided_slice %128 {offsets = [8, 0], sizes = [8, 32], strides = [1, 1]} : vector<32x32xf32> to vector<8x32xf32>
    %cst_75 = arith.constant dense<0.000000e+00> : vector<8x32xf32>
    %175 = tpu.matmul %173, %174, %cst_75 {dimension_numbers = #tpu.dot_dimension_numbers<[1], [0], [0], [1], [0, 0, 1, 1], [], []>} : vector<8x8xf32>, vector<8x32xf32>, vector<8x32xf32> -> vector<8x32xf32>
    %176 = arith.addf %156, %175 : vector<8x32xf32>
    %177 = vector.extract_strided_slice %132 {offsets = [0, 16], sizes = [8, 8], strides = [1, 1]} : vector<8x32xf32> to vector<8x8xf32>
    %178 = vector.extract_strided_slice %135 {offsets = [0, 16], sizes = [8, 8], strides = [1, 1]} : vector<8x64xf32> to vector<8x8xf32>
    %179 = vector.extract_strided_slice %135 {offsets = [0, 48], sizes = [8, 8], strides = [1, 1]} : vector<8x64xf32> to vector<8x8xf32>
    %cst_76 = arith.constant dense<0.000000e+00> : vector<8x8xf32>
    %180 = tpu.matmul %177, %178, %cst_76 {dimension_numbers = #tpu.dot_dimension_numbers<[1], [1], [0], [0], [0, 0, 1, 0], [], []>} : vector<8x8xf32>, vector<8x8xf32>, vector<8x8xf32> -> vector<8x8xf32>
    %cst_77 = arith.constant 0.353553385 : f32
    %181 = vector.broadcast %cst_77 : f32 to vector<8x8xf32>
    %182 = arith.mulf %180, %181 : vector<8x8xf32>
    %cst_78 = arith.constant dense<0xFF800000> : vector<8xf32>
    %183 = vector.multi_reduction <maximumf>, %182, %cst_78 [1] : vector<8x8xf32> to vector<8xf32>
    %184 = vector.shape_cast %183 : vector<8xf32> to vector<8x1xf32>
    %185 = vector.broadcast %184 : vector<8x1xf32> to vector<8x8xf32>
    %186 = arith.subf %182, %185 : vector<8x8xf32>
    %187 = math.exp %186 : vector<8x8xf32>
    %cst_79 = arith.constant dense<0.000000e+00> : vector<8xf32>
    %188 = vector.multi_reduction <add>, %187, %cst_79 [1] : vector<8x8xf32> to vector<8xf32>
    %189 = vector.shape_cast %188 : vector<8xf32> to vector<8x1xf32>
    %190 = tpu.reciprocal %189 {approx = true} : vector<8x1xf32> -> vector<8x1xf32>
    %191 = vector.broadcast %190 : vector<8x1xf32> to vector<8x8xf32>
    %192 = arith.mulf %187, %191 : vector<8x8xf32>
    %cst_80 = arith.constant dense<0.000000e+00> : vector<8x8xf32>
    %193 = tpu.matmul %192, %179, %cst_80 {dimension_numbers = #tpu.dot_dimension_numbers<[1], [0], [0], [1], [0, 0, 1, 1], [], []>} : vector<8x8xf32>, vector<8x8xf32>, vector<8x8xf32> -> vector<8x8xf32>
    %194 = vector.extract_strided_slice %128 {offsets = [16, 0], sizes = [8, 32], strides = [1, 1]} : vector<32x32xf32> to vector<8x32xf32>
    %cst_81 = arith.constant dense<0.000000e+00> : vector<8x32xf32>
    %195 = tpu.matmul %193, %194, %cst_81 {dimension_numbers = #tpu.dot_dimension_numbers<[1], [0], [0], [1], [0, 0, 1, 1], [], []>} : vector<8x8xf32>, vector<8x32xf32>, vector<8x32xf32> -> vector<8x32xf32>
    %196 = arith.addf %176, %195 : vector<8x32xf32>
    %197 = vector.extract_strided_slice %132 {offsets = [0, 24], sizes = [8, 8], strides = [1, 1]} : vector<8x32xf32> to vector<8x8xf32>
    %198 = vector.extract_strided_slice %135 {offsets = [0, 24], sizes = [8, 8], strides = [1, 1]} : vector<8x64xf32> to vector<8x8xf32>
    %199 = vector.extract_strided_slice %135 {offsets = [0, 56], sizes = [8, 8], strides = [1, 1]} : vector<8x64xf32> to vector<8x8xf32>
    %cst_82 = arith.constant dense<0.000000e+00> : vector<8x8xf32>
    %200 = tpu.matmul %197, %198, %cst_82 {dimension_numbers = #tpu.dot_dimension_numbers<[1], [1], [0], [0], [0, 0, 1, 0], [], []>} : vector<8x8xf32>, vector<8x8xf32>, vector<8x8xf32> -> vector<8x8xf32>
    %cst_83 = arith.constant 0.353553385 : f32
    %201 = vector.broadcast %cst_83 : f32 to vector<8x8xf32>
    %202 = arith.mulf %200, %201 : vector<8x8xf32>
    %cst_84 = arith.constant dense<0xFF800000> : vector<8xf32>
    %203 = vector.multi_reduction <maximumf>, %202, %cst_84 [1] : vector<8x8xf32> to vector<8xf32>
    %204 = vector.shape_cast %203 : vector<8xf32> to vector<8x1xf32>
    %205 = vector.broadcast %204 : vector<8x1xf32> to vector<8x8xf32>
    %206 = arith.subf %202, %205 : vector<8x8xf32>
    %207 = math.exp %206 : vector<8x8xf32>
    %cst_85 = arith.constant dense<0.000000e+00> : vector<8xf32>
    %208 = vector.multi_reduction <add>, %207, %cst_85 [1] : vector<8x8xf32> to vector<8xf32>
    %209 = vector.shape_cast %208 : vector<8xf32> to vector<8x1xf32>
    %210 = tpu.reciprocal %209 {approx = true} : vector<8x1xf32> -> vector<8x1xf32>
    %211 = vector.broadcast %210 : vector<8x1xf32> to vector<8x8xf32>
    %212 = arith.mulf %207, %211 : vector<8x8xf32>
    %cst_86 = arith.constant dense<0.000000e+00> : vector<8x8xf32>
    %213 = tpu.matmul %212, %199, %cst_86 {dimension_numbers = #tpu.dot_dimension_numbers<[1], [0], [0], [1], [0, 0, 1, 1], [], []>} : vector<8x8xf32>, vector<8x8xf32>, vector<8x8xf32> -> vector<8x8xf32>
    %214 = vector.extract_strided_slice %128 {offsets = [24, 0], sizes = [8, 32], strides = [1, 1]} : vector<32x32xf32> to vector<8x32xf32>
    %cst_87 = arith.constant dense<0.000000e+00> : vector<8x32xf32>
    %215 = tpu.matmul %213, %214, %cst_87 {dimension_numbers = #tpu.dot_dimension_numbers<[1], [0], [0], [1], [0, 0, 1, 1], [], []>} : vector<8x8xf32>, vector<8x32xf32>, vector<8x32xf32> -> vector<8x32xf32>
    %216 = arith.addf %196, %215 : vector<8x32xf32>
    %217 = vector.broadcast %129 : vector<1x32xf32> to vector<8x32xf32>
    %218 = arith.addf %216, %217 : vector<8x32xf32>
    %219 = arith.addf %123, %218 : vector<8x32xf32>
    %c0_88 = arith.constant 0 : index
    %c0_89 = arith.constant 0 : index
    %220 = vector.load %arg16[%c0_88, %c0_89] : memref<1x32xf32, #tpu.memory_space<vmem>>, vector<1x32xf32>
    %c0_90 = arith.constant 0 : index
    %c0_91 = arith.constant 0 : index
    %221 = vector.load %arg17[%c0_90, %c0_91] : memref<1x32xf32, #tpu.memory_space<vmem>>, vector<1x32xf32>
    %cst_92 = arith.constant dense<0.000000e+00> : vector<8xf32>
    %222 = vector.multi_reduction <add>, %219, %cst_92 [1] : vector<8x32xf32> to vector<8xf32>
    %223 = vector.shape_cast %222 : vector<8xf32> to vector<8x1xf32>
    %cst_93 = arith.constant 3.200000e+01 : f32
    %224 = vector.broadcast %cst_93 : f32 to vector<8x1xf32>
    %225 = arith.divf %223, %224 : vector<8x1xf32>
    %226 = vector.broadcast %225 : vector<8x1xf32> to vector<8x32xf32>
    %227 = arith.subf %219, %226 : vector<8x32xf32>
    %228 = arith.mulf %227, %227 : vector<8x32xf32>
    %cst_94 = arith.constant dense<0.000000e+00> : vector<8xf32>
    %229 = vector.multi_reduction <add>, %228, %cst_94 [1] : vector<8x32xf32> to vector<8xf32>
    %230 = vector.shape_cast %229 : vector<8xf32> to vector<8x1xf32>
    %cst_95 = arith.constant 3.200000e+01 : f32
    %231 = vector.broadcast %cst_95 : f32 to vector<8x1xf32>
    %232 = arith.divf %230, %231 : vector<8x1xf32>
    %233 = vector.broadcast %225 : vector<8x1xf32> to vector<8x32xf32>
    %234 = arith.subf %219, %233 : vector<8x32xf32>
    %cst_96 = arith.constant 9.99999974E-6 : f32
    %235 = vector.broadcast %cst_96 : f32 to vector<8x1xf32>
    %236 = arith.addf %232, %235 : vector<8x1xf32>
    %237 = math.rsqrt %236 : vector<8x1xf32>
    %238 = vector.broadcast %237 : vector<8x1xf32> to vector<8x32xf32>
    %239 = arith.mulf %234, %238 : vector<8x32xf32>
    %240 = vector.broadcast %220 : vector<1x32xf32> to vector<8x32xf32>
    %241 = arith.mulf %239, %240 : vector<8x32xf32>
    %242 = vector.broadcast %221 : vector<1x32xf32> to vector<8x32xf32>
    %243 = arith.addf %241, %242 : vector<8x32xf32>
    %c0_97 = arith.constant 0 : index
    %c0_98 = arith.constant 0 : index
    %244 = vector.load %arg18[%c0_97, %c0_98] : memref<32x64xf32, #tpu.memory_space<vmem>>, vector<32x64xf32>
    %cst_99 = arith.constant dense<0.000000e+00> : vector<8x64xf32>
    %245 = tpu.matmul %243, %244, %cst_99 {dimension_numbers = #tpu.dot_dimension_numbers<[1], [0], [0], [1], [0, 0, 1, 1], [], []>} : vector<8x32xf32>, vector<32x64xf32>, vector<8x64xf32> -> vector<8x64xf32>
    %c0_100 = arith.constant 0 : index
    %c0_101 = arith.constant 0 : index
    %246 = vector.load %arg19[%c0_100, %c0_101] : memref<1x64xf32, #tpu.memory_space<vmem>>, vector<1x64xf32>
    %247 = vector.broadcast %246 : vector<1x64xf32> to vector<8x64xf32>
    %248 = arith.addf %245, %247 : vector<8x64xf32>
    %cst_102 = arith.constant 0.000000e+00 : f32
    %249 = vector.broadcast %cst_102 : f32 to vector<8x64xf32>
    %250 = arith.maximumf %248, %249 : vector<8x64xf32>
    %c0_103 = arith.constant 0 : index
    %c0_104 = arith.constant 0 : index
    %251 = vector.load %arg20[%c0_103, %c0_104] : memref<64x32xf32, #tpu.memory_space<vmem>>, vector<64x32xf32>
    %cst_105 = arith.constant dense<0.000000e+00> : vector<8x32xf32>
    %252 = tpu.matmul %250, %251, %cst_105 {dimension_numbers = #tpu.dot_dimension_numbers<[1], [0], [0], [1], [0, 0, 1, 1], [], []>} : vector<8x64xf32>, vector<64x32xf32>, vector<8x32xf32> -> vector<8x32xf32>
    %c0_106 = arith.constant 0 : index
    %c0_107 = arith.constant 0 : index
    %253 = vector.load %arg21[%c0_106, %c0_107] : memref<1x32xf32, #tpu.memory_space<vmem>>, vector<1x32xf32>
    %254 = vector.broadcast %253 : vector<1x32xf32> to vector<8x32xf32>
    %255 = arith.addf %252, %254 : vector<8x32xf32>
    %256 = arith.addf %243, %255 : vector<8x32xf32>
    %c0_108 = arith.constant 0 : index
    %c0_109 = arith.constant 0 : index
    %257 = vector.load %arg22[%c0_108, %c0_109] : memref<1x32xf32, #tpu.memory_space<vmem>>, vector<1x32xf32>
    %c0_110 = arith.constant 0 : index
    %c0_111 = arith.constant 0 : index
    %258 = vector.load %arg23[%c0_110, %c0_111] : memref<1x32xf32, #tpu.memory_space<vmem>>, vector<1x32xf32>
    %cst_112 = arith.constant dense<0.000000e+00> : vector<8xf32>
    %259 = vector.multi_reduction <add>, %256, %cst_112 [1] : vector<8x32xf32> to vector<8xf32>
    %260 = vector.shape_cast %259 : vector<8xf32> to vector<8x1xf32>
    %cst_113 = arith.constant 3.200000e+01 : f32
    %261 = vector.broadcast %cst_113 : f32 to vector<8x1xf32>
    %262 = arith.divf %260, %261 : vector<8x1xf32>
    %263 = vector.broadcast %262 : vector<8x1xf32> to vector<8x32xf32>
    %264 = arith.subf %256, %263 : vector<8x32xf32>
    %265 = arith.mulf %264, %264 : vector<8x32xf32>
    %cst_114 = arith.constant dense<0.000000e+00> : vector<8xf32>
    %266 = vector.multi_reduction <add>, %265, %cst_114 [1] : vector<8x32xf32> to vector<8xf32>
    %267 = vector.shape_cast %266 : vector<8xf32> to vector<8x1xf32>
    %cst_115 = arith.constant 3.200000e+01 : f32
    %268 = vector.broadcast %cst_115 : f32 to vector<8x1xf32>
    %269 = arith.divf %267, %268 : vector<8x1xf32>
    %270 = vector.broadcast %262 : vector<8x1xf32> to vector<8x32xf32>
    %271 = arith.subf %256, %270 : vector<8x32xf32>
    %cst_116 = arith.constant 9.99999974E-6 : f32
    %272 = vector.broadcast %cst_116 : f32 to vector<8x1xf32>
    %273 = arith.addf %269, %272 : vector<8x1xf32>
    %274 = math.rsqrt %273 : vector<8x1xf32>
    %275 = vector.broadcast %274 : vector<8x1xf32> to vector<8x32xf32>
    %276 = arith.mulf %271, %275 : vector<8x32xf32>
    %277 = vector.broadcast %257 : vector<1x32xf32> to vector<8x32xf32>
    %278 = arith.mulf %276, %277 : vector<8x32xf32>
    %279 = vector.broadcast %258 : vector<1x32xf32> to vector<8x32xf32>
    %280 = arith.addf %278, %279 : vector<8x32xf32>
    %c0_117 = arith.constant 0 : index
    %c0_118 = arith.constant 0 : index
    %c0_119 = arith.constant 0 : index
    %281 = vector.load %arg24[%c0_117, %c0_118, %c0_119] : memref<1x8x32xf32, #tpu.memory_space<vmem>>, vector<1x8x32xf32>
    %282 = vector.shape_cast %281 : vector<1x8x32xf32> to vector<8x32xf32>
    %283 = vector.shape_cast %280 : vector<8x32xf32> to vector<1x8x32xf32>
    tpu.vector_store %arg24[%c0_117, %c0_118, %c0_119], %283 {strides = array<i32>} : memref<1x8x32xf32, #tpu.memory_space<vmem>>, vector<1x8x32xf32>,
    return
  }
  func.func @transform_0(%arg0: i32) -> (i32, i32, i32) {
    %c0_i32 = arith.constant 0 : i32
    %c0_i32_0 = arith.constant 0 : i32
    %c0_i32_1 = arith.constant 0 : i32
    return %arg0, %c0_i32, %c0_i32_0 : i32, i32, i32
  }
  func.func @transform_1(%arg0: i32) -> (i32, i32, i32) {
    %c0_i32 = arith.constant 0 : i32
    %c0_i32_0 = arith.constant 0 : i32
    %c0_i32_1 = arith.constant 0 : i32
    return %arg0, %c0_i32, %c0_i32_0 : i32, i32, i32
  }
  func.func @transform_2(%arg0: i32) -> (i32, i32) {
    %c0_i32 = arith.constant 0 : i32
    %c0_i32_0 = arith.constant 0 : i32
    %c0_i32_1 = arith.constant 0 : i32
    return %c0_i32, %c0_i32_0 : i32, i32
  }
  func.func @transform_3(%arg0: i32) -> (i32, i32) {
    %c0_i32 = arith.constant 0 : i32
    %c0_i32_0 = arith.constant 0 : i32
    %c0_i32_1 = arith.constant 0 : i32
    return %c0_i32, %c0_i32_0 : i32, i32
  }
  func.func @transform_4(%arg0: i32) -> (i32, i32) {
    %c0_i32 = arith.constant 0 : i32
    %c0_i32_0 = arith.constant 0 : i32
    %c0_i32_1 = arith.constant 0 : i32
    return %c0_i32, %c0_i32_0 : i32, i32
  }
  func.func @transform_5(%arg0: i32) -> (i32, i32) {
    %c0_i32 = arith.constant 0 : i32
    %c0_i32_0 = arith.constant 0 : i32
    %c0_i32_1 = arith.constant 0 : i32
    return %c0_i32, %c0_i32_0 : i32, i32
  }
  func.func @transform_6(%arg0: i32) -> (i32, i32) {
    %c0_i32 = arith.constant 0 : i32
    %c0_i32_0 = arith.constant 0 : i32
    %c0_i32_1 = arith.constant 0 : i32
    return %c0_i32, %c0_i32_0 : i32, i32
  }
  func.func @transform_7(%arg0: i32) -> (i32, i32) {
    %c0_i32 = arith.constant 0 : i32
    %c0_i32_0 = arith.constant 0 : i32
    %c0_i32_1 = arith.constant 0 : i32
    return %c0_i32, %c0_i32_0 : i32, i32
  }
  func.func @transform_8(%arg0: i32) -> (i32, i32) {
    %c0_i32 = arith.constant 0 : i32
    %c0_i32_0 = arith.constant 0 : i32
    %c0_i32_1 = arith.constant 0 : i32
    return %c0_i32, %c0_i32_0 : i32, i32
  }
  func.func @transform_9(%arg0: i32) -> (i32, i32) {
    %c0_i32 = arith.constant 0 : i32
    %c0_i32_0 = arith.constant 0 : i32
    %c0_i32_1 = arith.constant 0 : i32
    return %c0_i32, %c0_i32_0 : i32, i32
  }
  func.func @transform_10(%arg0: i32) -> (i32, i32) {
    %c0_i32 = arith.constant 0 : i32
    %c0_i32_0 = arith.constant 0 : i32
    %c0_i32_1 = arith.constant 0 : i32
    return %c0_i32, %c0_i32_0 : i32, i32
  }
  func.func @transform_11(%arg0: i32) -> (i32, i32) {
    %c0_i32 = arith.constant 0 : i32
    %c0_i32_0 = arith.constant 0 : i32
    %c0_i32_1 = arith.constant 0 : i32
    return %c0_i32, %c0_i32_0 : i32, i32
  }
  func.func @transform_12(%arg0: i32) -> (i32, i32) {
    %c0_i32 = arith.constant 0 : i32
    %c0_i32_0 = arith.constant 0 : i32
    %c0_i32_1 = arith.constant 0 : i32
    return %c0_i32, %c0_i32_0 : i32, i32
  }
  func.func @transform_13(%arg0: i32) -> (i32, i32) {
    %c0_i32 = arith.constant 0 : i32
    %c0_i32_0 = arith.constant 0 : i32
    %c0_i32_1 = arith.constant 0 : i32
    return %c0_i32, %c0_i32_0 : i32, i32
  }
  func.func @transform_14(%arg0: i32) -> (i32, i32) {
    %c0_i32 = arith.constant 0 : i32
    %c0_i32_0 = arith.constant 0 : i32
    %c0_i32_1 = arith.constant 0 : i32
    return %c0_i32, %c0_i32_0 : i32, i32
  }
  func.func @transform_15(%arg0: i32) -> (i32, i32) {
    %c0_i32 = arith.constant 0 : i32
    %c0_i32_0 = arith.constant 0 : i32
    %c0_i32_1 = arith.constant 0 : i32
    return %c0_i32, %c0_i32_0 : i32, i32
  }
  func.func @transform_16(%arg0: i32) -> (i32, i32) {
    %c0_i32 = arith.constant 0 : i32
    %c0_i32_0 = arith.constant 0 : i32
    %c0_i32_1 = arith.constant 0 : i32
    return %c0_i32, %c0_i32_0 : i32, i32
  }
  func.func @transform_17(%arg0: i32) -> (i32, i32) {
    %c0_i32 = arith.constant 0 : i32
    %c0_i32_0 = arith.constant 0 : i32
    %c0_i32_1 = arith.constant 0 : i32
    return %c0_i32, %c0_i32_0 : i32, i32
  }
  func.func @transform_18(%arg0: i32) -> (i32, i32) {
    %c0_i32 = arith.constant 0 : i32
    %c0_i32_0 = arith.constant 0 : i32
    %c0_i32_1 = arith.constant 0 : i32
    return %c0_i32, %c0_i32_0 : i32, i32
  }
  func.func @transform_19(%arg0: i32) -> (i32, i32) {
    %c0_i32 = arith.constant 0 : i32
    %c0_i32_0 = arith.constant 0 : i32
    %c0_i32_1 = arith.constant 0 : i32
    return %c0_i32, %c0_i32_0 : i32, i32
  }
  func.func @transform_20(%arg0: i32) -> (i32, i32) {
    %c0_i32 = arith.constant 0 : i32
    %c0_i32_0 = arith.constant 0 : i32
    %c0_i32_1 = arith.constant 0 : i32
    return %c0_i32, %c0_i32_0 : i32, i32
  }
  func.func @transform_21(%arg0: i32) -> (i32, i32) {
    %c0_i32 = arith.constant 0 : i32
    %c0_i32_0 = arith.constant 0 : i32
    %c0_i32_1 = arith.constant 0 : i32
    return %c0_i32, %c0_i32_0 : i32, i32
  }
  func.func @transform_22(%arg0: i32) -> (i32, i32) {
    %c0_i32 = arith.constant 0 : i32
    %c0_i32_0 = arith.constant 0 : i32
    %c0_i32_1 = arith.constant 0 : i32
    return %c0_i32, %c0_i32_0 : i32, i32
  }
  func.func @transform_23(%arg0: i32) -> (i32, i32, i32) {
    %c0_i32 = arith.constant 0 : i32
    %c0_i32_0 = arith.constant 0 : i32
    %c0_i32_1 = arith.constant 0 : i32
    return %arg0, %c0_i32, %c0_i32_0 : i32, i32, i32
  }
}

module attributes {stable_mosaic.version = 11 : i64} {
  func.func @_decoder_layer_kernel(%arg0: i32, %arg1: memref<1x8x32xf32, #tpu.memory_space<vmem>>, %arg2: memref<1x8x32xf32, #tpu.memory_space<vmem>>, %arg3: memref<8x8xf32, #tpu.memory_space<vmem>>, %arg4: memref<32x96xf32, #tpu.memory_space<vmem>>, %arg5: memref<1x96xf32, #tpu.memory_space<vmem>>, %arg6: memref<32x32xf32, #tpu.memory_space<vmem>>, %arg7: memref<1x32xf32, #tpu.memory_space<vmem>>, %arg8: memref<1x32xf32, #tpu.memory_space<vmem>>, %arg9: memref<1x32xf32, #tpu.memory_space<vmem>>, %arg10: memref<32x32xf32, #tpu.memory_space<vmem>>, %arg11: memref<1x32xf32, #tpu.memory_space<vmem>>, %arg12: memref<32x64xf32, #tpu.memory_space<vmem>>, %arg13: memref<1x64xf32, #tpu.memory_space<vmem>>, %arg14: memref<32x32xf32, #tpu.memory_space<vmem>>, %arg15: memref<1x32xf32, #tpu.memory_space<vmem>>, %arg16: memref<1x32xf32, #tpu.memory_space<vmem>>, %arg17: memref<1x32xf32, #tpu.memory_space<vmem>>, %arg18: memref<32x64xf32, #tpu.memory_space<vmem>>, %arg19: memref<1x64xf32, #tpu.memory_space<vmem>>, %arg20: memref<64x32xf32, #tpu.memory_space<vmem>>, %arg21: memref<1x32xf32, #tpu.memory_space<vmem>>, %arg22: memref<1x32xf32, #tpu.memory_space<vmem>>, %arg23: memref<1x32xf32, #tpu.memory_space<vmem>>, %arg24: memref<1x32xf32, #tpu.memory_space<vmem>>, %arg25: memref<1x32xf32, #tpu.memory_space<vmem>>, %arg26: memref<32x4xf32, #tpu.memory_space<vmem>>, %arg27: memref<1x4xf32, #tpu.memory_space<vmem>>, %arg28: memref<1x8x4xf32, #tpu.memory_space<vmem>>) attributes {dimension_semantics = [#tpu.dimension_semantics<parallel>], iteration_bounds = array<i64: 2>, scalar_prefetch = 0 : i64, scratch_operands = 0 : i64, tpu.core_type = #tpu.core_type<tc>, window_params = [{transform_indices = @transform_0, window_bounds = array<i64: 1, 8, 32>}, {transform_indices = @transform_1, window_bounds = array<i64: 1, 8, 32>}, {pipeline_mode = #tpu.pipeline_mode<synchronous>, transform_indices = @transform_2, window_bounds = array<i64: 8, 8>}, {pipeline_mode = #tpu.pipeline_mode<synchronous>, transform_indices = @transform_3, window_bounds = array<i64: 32, 96>}, {pipeline_mode = #tpu.pipeline_mode<synchronous>, transform_indices = @transform_4, window_bounds = array<i64: 1, 96>}, {pipeline_mode = #tpu.pipeline_mode<synchronous>, transform_indices = @transform_5, window_bounds = array<i64: 32, 32>}, {pipeline_mode = #tpu.pipeline_mode<synchronous>, transform_indices = @transform_6, window_bounds = array<i64: 1, 32>}, {pipeline_mode = #tpu.pipeline_mode<synchronous>, transform_indices = @transform_7, window_bounds = array<i64: 1, 32>}, {pipeline_mode = #tpu.pipeline_mode<synchronous>, transform_indices = @transform_8, window_bounds = array<i64: 1, 32>}, {pipeline_mode = #tpu.pipeline_mode<synchronous>, transform_indices = @transform_9, window_bounds = array<i64: 32, 32>}, {pipeline_mode = #tpu.pipeline_mode<synchronous>, transform_indices = @transform_10, window_bounds = array<i64: 1, 32>}, {pipeline_mode = #tpu.pipeline_mode<synchronous>, transform_indices = @transform_11, window_bounds = array<i64: 32, 64>}, {pipeline_mode = #tpu.pipeline_mode<synchronous>, transform_indices = @transform_12, window_bounds = array<i64: 1, 64>}, {pipeline_mode = #tpu.pipeline_mode<synchronous>, transform_indices = @transform_13, window_bounds = array<i64: 32, 32>}, {pipeline_mode = #tpu.pipeline_mode<synchronous>, transform_indices = @transform_14, window_bounds = array<i64: 1, 32>}, {pipeline_mode = #tpu.pipeline_mode<synchronous>, transform_indices = @transform_15, window_bounds = array<i64: 1, 32>}, {pipeline_mode = #tpu.pipeline_mode<synchronous>, transform_indices = @transform_16, window_bounds = array<i64: 1, 32>}, {pipeline_mode = #tpu.pipeline_mode<synchronous>, transform_indices = @transform_17, window_bounds = array<i64: 32, 64>}, {pipeline_mode = #tpu.pipeline_mode<synchronous>, transform_indices = @transform_18, window_bounds = array<i64: 1, 64>}, {pipeline_mode = #tpu.pipeline_mode<synchronous>, transform_indices = @transform_19, window_bounds = array<i64: 64, 32>}, {pipeline_mode = #tpu.pipeline_mode<synchronous>, transform_indices = @transform_20, window_bounds = array<i64: 1, 32>}, {pipeline_mode = #tpu.pipeline_mode<synchronous>, transform_indices = @transform_21, window_bounds = array<i64: 1, 32>}, {pipeline_mode = #tpu.pipeline_mode<synchronous>, transform_indices = @transform_22, window_bounds = array<i64: 1, 32>}, {pipeline_mode = #tpu.pipeline_mode<synchronous>, transform_indices = @transform_23, window_bounds = array<i64: 1, 32>}, {pipeline_mode = #tpu.pipeline_mode<synchronous>, transform_indices = @transform_24, window_bounds = array<i64: 1, 32>}, {pipeline_mode = #tpu.pipeline_mode<synchronous>, transform_indices = @transform_25, window_bounds = array<i64: 32, 4>}, {pipeline_mode = #tpu.pipeline_mode<synchronous>, transform_indices = @transform_26, window_bounds = array<i64: 1, 4>}, {transform_indices = @transform_27, window_bounds = array<i64: 1, 8, 4>}]} {
    %c0 = arith.constant 0 : index
    %c0_0 = arith.constant 0 : index
    %c0_1 = arith.constant 0 : index
    %0 = vector.load %arg1[%c0, %c0_0, %c0_1] : memref<1x8x32xf32, #tpu.memory_space<vmem>>, vector<1x8x32xf32>
    %1 = vector.shape_cast %0 : vector<1x8x32xf32> to vector<8x32xf32>
    %c0_2 = arith.constant 0 : index
    %c0_3 = arith.constant 0 : index
    %c0_4 = arith.constant 0 : index
    %2 = vector.load %arg2[%c0_2, %c0_3, %c0_4] : memref<1x8x32xf32, #tpu.memory_space<vmem>>, vector<1x8x32xf32>
    %3 = vector.shape_cast %2 : vector<1x8x32xf32> to vector<8x32xf32>
    %c0_5 = arith.constant 0 : index
    %c0_6 = arith.constant 0 : index
    %4 = vector.load %arg4[%c0_5, %c0_6] : memref<32x96xf32, #tpu.memory_space<vmem>>, vector<32x96xf32>
    %c0_7 = arith.constant 0 : index
    %c0_8 = arith.constant 0 : index
    %5 = vector.load %arg5[%c0_7, %c0_8] : memref<1x96xf32, #tpu.memory_space<vmem>>, vector<1x96xf32>
    %c0_9 = arith.constant 0 : index
    %c0_10 = arith.constant 0 : index
    %6 = vector.load %arg6[%c0_9, %c0_10] : memref<32x32xf32, #tpu.memory_space<vmem>>, vector<32x32xf32>
    %c0_11 = arith.constant 0 : index
    %c0_12 = arith.constant 0 : index
    %7 = vector.load %arg7[%c0_11, %c0_12] : memref<1x32xf32, #tpu.memory_space<vmem>>, vector<1x32xf32>
    %c0_13 = arith.constant 0 : index
    %c0_14 = arith.constant 0 : index
    %8 = vector.load %arg3[%c0_13, %c0_14] : memref<8x8xf32, #tpu.memory_space<vmem>>, vector<8x8xf32>
    %cst = arith.constant dense<0.000000e+00> : vector<8x96xf32>
    %9 = tpu.matmul %1, %4, %cst {dimension_numbers = #tpu.dot_dimension_numbers<[1], [0], [0], [1], [0, 0, 1, 1], [], []>} : vector<8x32xf32>, vector<32x96xf32>, vector<8x96xf32> -> vector<8x96xf32>
    %10 = vector.broadcast %5 : vector<1x96xf32> to vector<8x96xf32>
    %11 = arith.addf %9, %10 : vector<8x96xf32>
    %cst_15 = arith.constant 0.000000e+00 : f32
    %12 = vector.broadcast %cst_15 : f32 to vector<8x32xf32>
    %13 = vector.extract_strided_slice %11 {offsets = [0, 0], sizes = [8, 8], strides = [1, 1]} : vector<8x96xf32> to vector<8x8xf32>
    %14 = vector.extract_strided_slice %11 {offsets = [0, 32], sizes = [8, 8], strides = [1, 1]} : vector<8x96xf32> to vector<8x8xf32>
    %15 = vector.extract_strided_slice %11 {offsets = [0, 64], sizes = [8, 8], strides = [1, 1]} : vector<8x96xf32> to vector<8x8xf32>
    %cst_16 = arith.constant dense<0.000000e+00> : vector<8x8xf32>
    %16 = tpu.matmul %13, %14, %cst_16 {dimension_numbers = #tpu.dot_dimension_numbers<[1], [1], [0], [0], [0, 0, 1, 0], [], []>} : vector<8x8xf32>, vector<8x8xf32>, vector<8x8xf32> -> vector<8x8xf32>
    %cst_17 = arith.constant 0.353553385 : f32
    %17 = vector.broadcast %cst_17 : f32 to vector<8x8xf32>
    %18 = arith.mulf %16, %17 : vector<8x8xf32>
    %19 = arith.addf %18, %8 : vector<8x8xf32>
    %cst_18 = arith.constant dense<0xFF800000> : vector<8xf32>
    %20 = vector.multi_reduction <maximumf>, %19, %cst_18 [1] : vector<8x8xf32> to vector<8xf32>
    %21 = vector.shape_cast %20 : vector<8xf32> to vector<8x1xf32>
    %22 = vector.broadcast %21 : vector<8x1xf32> to vector<8x8xf32>
    %23 = arith.subf %19, %22 : vector<8x8xf32>
    %24 = math.exp %23 : vector<8x8xf32>
    %cst_19 = arith.constant dense<0.000000e+00> : vector<8xf32>
    %25 = vector.multi_reduction <add>, %24, %cst_19 [1] : vector<8x8xf32> to vector<8xf32>
    %26 = vector.shape_cast %25 : vector<8xf32> to vector<8x1xf32>
    %27 = tpu.reciprocal %26 {approx = true} : vector<8x1xf32> -> vector<8x1xf32>
    %28 = vector.broadcast %27 : vector<8x1xf32> to vector<8x8xf32>
    %29 = arith.mulf %24, %28 : vector<8x8xf32>
    %cst_20 = arith.constant dense<0.000000e+00> : vector<8x8xf32>
    %30 = tpu.matmul %29, %15, %cst_20 {dimension_numbers = #tpu.dot_dimension_numbers<[1], [0], [0], [1], [0, 0, 1, 1], [], []>} : vector<8x8xf32>, vector<8x8xf32>, vector<8x8xf32> -> vector<8x8xf32>
    %31 = vector.extract_strided_slice %6 {offsets = [0, 0], sizes = [8, 32], strides = [1, 1]} : vector<32x32xf32> to vector<8x32xf32>
    %cst_21 = arith.constant dense<0.000000e+00> : vector<8x32xf32>
    %32 = tpu.matmul %30, %31, %cst_21 {dimension_numbers = #tpu.dot_dimension_numbers<[1], [0], [0], [1], [0, 0, 1, 1], [], []>} : vector<8x8xf32>, vector<8x32xf32>, vector<8x32xf32> -> vector<8x32xf32>
    %33 = arith.addf %12, %32 : vector<8x32xf32>
    %34 = vector.extract_strided_slice %11 {offsets = [0, 8], sizes = [8, 8], strides = [1, 1]} : vector<8x96xf32> to vector<8x8xf32>
    %35 = vector.extract_strided_slice %11 {offsets = [0, 40], sizes = [8, 8], strides = [1, 1]} : vector<8x96xf32> to vector<8x8xf32>
    %36 = vector.extract_strided_slice %11 {offsets = [0, 72], sizes = [8, 8], strides = [1, 1]} : vector<8x96xf32> to vector<8x8xf32>
    %cst_22 = arith.constant dense<0.000000e+00> : vector<8x8xf32>
    %37 = tpu.matmul %34, %35, %cst_22 {dimension_numbers = #tpu.dot_dimension_numbers<[1], [1], [0], [0], [0, 0, 1, 0], [], []>} : vector<8x8xf32>, vector<8x8xf32>, vector<8x8xf32> -> vector<8x8xf32>
    %cst_23 = arith.constant 0.353553385 : f32
    %38 = vector.broadcast %cst_23 : f32 to vector<8x8xf32>
    %39 = arith.mulf %37, %38 : vector<8x8xf32>
    %40 = arith.addf %39, %8 : vector<8x8xf32>
    %cst_24 = arith.constant dense<0xFF800000> : vector<8xf32>
    %41 = vector.multi_reduction <maximumf>, %40, %cst_24 [1] : vector<8x8xf32> to vector<8xf32>
    %42 = vector.shape_cast %41 : vector<8xf32> to vector<8x1xf32>
    %43 = vector.broadcast %42 : vector<8x1xf32> to vector<8x8xf32>
    %44 = arith.subf %40, %43 : vector<8x8xf32>
    %45 = math.exp %44 : vector<8x8xf32>
    %cst_25 = arith.constant dense<0.000000e+00> : vector<8xf32>
    %46 = vector.multi_reduction <add>, %45, %cst_25 [1] : vector<8x8xf32> to vector<8xf32>
    %47 = vector.shape_cast %46 : vector<8xf32> to vector<8x1xf32>
    %48 = tpu.reciprocal %47 {approx = true} : vector<8x1xf32> -> vector<8x1xf32>
    %49 = vector.broadcast %48 : vector<8x1xf32> to vector<8x8xf32>
    %50 = arith.mulf %45, %49 : vector<8x8xf32>
    %cst_26 = arith.constant dense<0.000000e+00> : vector<8x8xf32>
    %51 = tpu.matmul %50, %36, %cst_26 {dimension_numbers = #tpu.dot_dimension_numbers<[1], [0], [0], [1], [0, 0, 1, 1], [], []>} : vector<8x8xf32>, vector<8x8xf32>, vector<8x8xf32> -> vector<8x8xf32>
    %52 = vector.extract_strided_slice %6 {offsets = [8, 0], sizes = [8, 32], strides = [1, 1]} : vector<32x32xf32> to vector<8x32xf32>
    %cst_27 = arith.constant dense<0.000000e+00> : vector<8x32xf32>
    %53 = tpu.matmul %51, %52, %cst_27 {dimension_numbers = #tpu.dot_dimension_numbers<[1], [0], [0], [1], [0, 0, 1, 1], [], []>} : vector<8x8xf32>, vector<8x32xf32>, vector<8x32xf32> -> vector<8x32xf32>
    %54 = arith.addf %33, %53 : vector<8x32xf32>
    %55 = vector.extract_strided_slice %11 {offsets = [0, 16], sizes = [8, 8], strides = [1, 1]} : vector<8x96xf32> to vector<8x8xf32>
    %56 = vector.extract_strided_slice %11 {offsets = [0, 48], sizes = [8, 8], strides = [1, 1]} : vector<8x96xf32> to vector<8x8xf32>
    %57 = vector.extract_strided_slice %11 {offsets = [0, 80], sizes = [8, 8], strides = [1, 1]} : vector<8x96xf32> to vector<8x8xf32>
    %cst_28 = arith.constant dense<0.000000e+00> : vector<8x8xf32>
    %58 = tpu.matmul %55, %56, %cst_28 {dimension_numbers = #tpu.dot_dimension_numbers<[1], [1], [0], [0], [0, 0, 1, 0], [], []>} : vector<8x8xf32>, vector<8x8xf32>, vector<8x8xf32> -> vector<8x8xf32>
    %cst_29 = arith.constant 0.353553385 : f32
    %59 = vector.broadcast %cst_29 : f32 to vector<8x8xf32>
    %60 = arith.mulf %58, %59 : vector<8x8xf32>
    %61 = arith.addf %60, %8 : vector<8x8xf32>
    %cst_30 = arith.constant dense<0xFF800000> : vector<8xf32>
    %62 = vector.multi_reduction <maximumf>, %61, %cst_30 [1] : vector<8x8xf32> to vector<8xf32>
    %63 = vector.shape_cast %62 : vector<8xf32> to vector<8x1xf32>
    %64 = vector.broadcast %63 : vector<8x1xf32> to vector<8x8xf32>
    %65 = arith.subf %61, %64 : vector<8x8xf32>
    %66 = math.exp %65 : vector<8x8xf32>
    %cst_31 = arith.constant dense<0.000000e+00> : vector<8xf32>
    %67 = vector.multi_reduction <add>, %66, %cst_31 [1] : vector<8x8xf32> to vector<8xf32>
    %68 = vector.shape_cast %67 : vector<8xf32> to vector<8x1xf32>
    %69 = tpu.reciprocal %68 {approx = true} : vector<8x1xf32> -> vector<8x1xf32>
    %70 = vector.broadcast %69 : vector<8x1xf32> to vector<8x8xf32>
    %71 = arith.mulf %66, %70 : vector<8x8xf32>
    %cst_32 = arith.constant dense<0.000000e+00> : vector<8x8xf32>
    %72 = tpu.matmul %71, %57, %cst_32 {dimension_numbers = #tpu.dot_dimension_numbers<[1], [0], [0], [1], [0, 0, 1, 1], [], []>} : vector<8x8xf32>, vector<8x8xf32>, vector<8x8xf32> -> vector<8x8xf32>
    %73 = vector.extract_strided_slice %6 {offsets = [16, 0], sizes = [8, 32], strides = [1, 1]} : vector<32x32xf32> to vector<8x32xf32>
    %cst_33 = arith.constant dense<0.000000e+00> : vector<8x32xf32>
    %74 = tpu.matmul %72, %73, %cst_33 {dimension_numbers = #tpu.dot_dimension_numbers<[1], [0], [0], [1], [0, 0, 1, 1], [], []>} : vector<8x8xf32>, vector<8x32xf32>, vector<8x32xf32> -> vector<8x32xf32>
    %75 = arith.addf %54, %74 : vector<8x32xf32>
    %76 = vector.extract_strided_slice %11 {offsets = [0, 24], sizes = [8, 8], strides = [1, 1]} : vector<8x96xf32> to vector<8x8xf32>
    %77 = vector.extract_strided_slice %11 {offsets = [0, 56], sizes = [8, 8], strides = [1, 1]} : vector<8x96xf32> to vector<8x8xf32>
    %78 = vector.extract_strided_slice %11 {offsets = [0, 88], sizes = [8, 8], strides = [1, 1]} : vector<8x96xf32> to vector<8x8xf32>
    %cst_34 = arith.constant dense<0.000000e+00> : vector<8x8xf32>
    %79 = tpu.matmul %76, %77, %cst_34 {dimension_numbers = #tpu.dot_dimension_numbers<[1], [1], [0], [0], [0, 0, 1, 0], [], []>} : vector<8x8xf32>, vector<8x8xf32>, vector<8x8xf32> -> vector<8x8xf32>
    %cst_35 = arith.constant 0.353553385 : f32
    %80 = vector.broadcast %cst_35 : f32 to vector<8x8xf32>
    %81 = arith.mulf %79, %80 : vector<8x8xf32>
    %82 = arith.addf %81, %8 : vector<8x8xf32>
    %cst_36 = arith.constant dense<0xFF800000> : vector<8xf32>
    %83 = vector.multi_reduction <maximumf>, %82, %cst_36 [1] : vector<8x8xf32> to vector<8xf32>
    %84 = vector.shape_cast %83 : vector<8xf32> to vector<8x1xf32>
    %85 = vector.broadcast %84 : vector<8x1xf32> to vector<8x8xf32>
    %86 = arith.subf %82, %85 : vector<8x8xf32>
    %87 = math.exp %86 : vector<8x8xf32>
    %cst_37 = arith.constant dense<0.000000e+00> : vector<8xf32>
    %88 = vector.multi_reduction <add>, %87, %cst_37 [1] : vector<8x8xf32> to vector<8xf32>
    %89 = vector.shape_cast %88 : vector<8xf32> to vector<8x1xf32>
    %90 = tpu.reciprocal %89 {approx = true} : vector<8x1xf32> -> vector<8x1xf32>
    %91 = vector.broadcast %90 : vector<8x1xf32> to vector<8x8xf32>
    %92 = arith.mulf %87, %91 : vector<8x8xf32>
    %cst_38 = arith.constant dense<0.000000e+00> : vector<8x8xf32>
    %93 = tpu.matmul %92, %78, %cst_38 {dimension_numbers = #tpu.dot_dimension_numbers<[1], [0], [0], [1], [0, 0, 1, 1], [], []>} : vector<8x8xf32>, vector<8x8xf32>, vector<8x8xf32> -> vector<8x8xf32>
    %94 = vector.extract_strided_slice %6 {offsets = [24, 0], sizes = [8, 32], strides = [1, 1]} : vector<32x32xf32> to vector<8x32xf32>
    %cst_39 = arith.constant dense<0.000000e+00> : vector<8x32xf32>
    %95 = tpu.matmul %93, %94, %cst_39 {dimension_numbers = #tpu.dot_dimension_numbers<[1], [0], [0], [1], [0, 0, 1, 1], [], []>} : vector<8x8xf32>, vector<8x32xf32>, vector<8x32xf32> -> vector<8x32xf32>
    %96 = arith.addf %75, %95 : vector<8x32xf32>
    %97 = vector.broadcast %7 : vector<1x32xf32> to vector<8x32xf32>
    %98 = arith.addf %96, %97 : vector<8x32xf32>
    %99 = arith.addf %1, %98 : vector<8x32xf32>
    %c0_40 = arith.constant 0 : index
    %c0_41 = arith.constant 0 : index
    %100 = vector.load %arg8[%c0_40, %c0_41] : memref<1x32xf32, #tpu.memory_space<vmem>>, vector<1x32xf32>
    %c0_42 = arith.constant 0 : index
    %c0_43 = arith.constant 0 : index
    %101 = vector.load %arg9[%c0_42, %c0_43] : memref<1x32xf32, #tpu.memory_space<vmem>>, vector<1x32xf32>
    %cst_44 = arith.constant dense<0.000000e+00> : vector<8xf32>
    %102 = vector.multi_reduction <add>, %99, %cst_44 [1] : vector<8x32xf32> to vector<8xf32>
    %103 = vector.shape_cast %102 : vector<8xf32> to vector<8x1xf32>
    %cst_45 = arith.constant 3.200000e+01 : f32
    %104 = vector.broadcast %cst_45 : f32 to vector<8x1xf32>
    %105 = arith.divf %103, %104 : vector<8x1xf32>
    %106 = vector.broadcast %105 : vector<8x1xf32> to vector<8x32xf32>
    %107 = arith.subf %99, %106 : vector<8x32xf32>
    %108 = arith.mulf %107, %107 : vector<8x32xf32>
    %cst_46 = arith.constant dense<0.000000e+00> : vector<8xf32>
    %109 = vector.multi_reduction <add>, %108, %cst_46 [1] : vector<8x32xf32> to vector<8xf32>
    %110 = vector.shape_cast %109 : vector<8xf32> to vector<8x1xf32>
    %cst_47 = arith.constant 3.200000e+01 : f32
    %111 = vector.broadcast %cst_47 : f32 to vector<8x1xf32>
    %112 = arith.divf %110, %111 : vector<8x1xf32>
    %113 = vector.broadcast %105 : vector<8x1xf32> to vector<8x32xf32>
    %114 = arith.subf %99, %113 : vector<8x32xf32>
    %cst_48 = arith.constant 9.99999974E-6 : f32
    %115 = vector.broadcast %cst_48 : f32 to vector<8x1xf32>
    %116 = arith.addf %112, %115 : vector<8x1xf32>
    %117 = math.rsqrt %116 : vector<8x1xf32>
    %118 = vector.broadcast %117 : vector<8x1xf32> to vector<8x32xf32>
    %119 = arith.mulf %114, %118 : vector<8x32xf32>
    %120 = vector.broadcast %100 : vector<1x32xf32> to vector<8x32xf32>
    %121 = arith.mulf %119, %120 : vector<8x32xf32>
    %122 = vector.broadcast %101 : vector<1x32xf32> to vector<8x32xf32>
    %123 = arith.addf %121, %122 : vector<8x32xf32>
    %c0_49 = arith.constant 0 : index
    %c0_50 = arith.constant 0 : index
    %124 = vector.load %arg10[%c0_49, %c0_50] : memref<32x32xf32, #tpu.memory_space<vmem>>, vector<32x32xf32>
    %c0_51 = arith.constant 0 : index
    %c0_52 = arith.constant 0 : index
    %125 = vector.load %arg11[%c0_51, %c0_52] : memref<1x32xf32, #tpu.memory_space<vmem>>, vector<1x32xf32>
    %c0_53 = arith.constant 0 : index
    %c0_54 = arith.constant 0 : index
    %126 = vector.load %arg12[%c0_53, %c0_54] : memref<32x64xf32, #tpu.memory_space<vmem>>, vector<32x64xf32>
    %c0_55 = arith.constant 0 : index
    %c0_56 = arith.constant 0 : index
    %127 = vector.load %arg13[%c0_55, %c0_56] : memref<1x64xf32, #tpu.memory_space<vmem>>, vector<1x64xf32>
    %c0_57 = arith.constant 0 : index
    %c0_58 = arith.constant 0 : index
    %128 = vector.load %arg14[%c0_57, %c0_58] : memref<32x32xf32, #tpu.memory_space<vmem>>, vector<32x32xf32>
    %c0_59 = arith.constant 0 : index
    %c0_60 = arith.constant 0 : index
    %129 = vector.load %arg15[%c0_59, %c0_60] : memref<1x32xf32, #tpu.memory_space<vmem>>, vector<1x32xf32>
    %cst_61 = arith.constant dense<0.000000e+00> : vector<8x32xf32>
    %130 = tpu.matmul %123, %124, %cst_61 {dimension_numbers = #tpu.dot_dimension_numbers<[1], [0], [0], [1], [0, 0, 1, 1], [], []>} : vector<8x32xf32>, vector<32x32xf32>, vector<8x32xf32> -> vector<8x32xf32>
    %131 = vector.broadcast %125 : vector<1x32xf32> to vector<8x32xf32>
    %132 = arith.addf %130, %131 : vector<8x32xf32>
    %cst_62 = arith.constant dense<0.000000e+00> : vector<8x64xf32>
    %133 = tpu.matmul %3, %126, %cst_62 {dimension_numbers = #tpu.dot_dimension_numbers<[1], [0], [0], [1], [0, 0, 1, 1], [], []>} : vector<8x32xf32>, vector<32x64xf32>, vector<8x64xf32> -> vector<8x64xf32>
    %134 = vector.broadcast %127 : vector<1x64xf32> to vector<8x64xf32>
    %135 = arith.addf %133, %134 : vector<8x64xf32>
    %cst_63 = arith.constant 0.000000e+00 : f32
    %136 = vector.broadcast %cst_63 : f32 to vector<8x32xf32>
    %137 = vector.extract_strided_slice %132 {offsets = [0, 0], sizes = [8, 8], strides = [1, 1]} : vector<8x32xf32> to vector<8x8xf32>
    %138 = vector.extract_strided_slice %135 {offsets = [0, 0], sizes = [8, 8], strides = [1, 1]} : vector<8x64xf32> to vector<8x8xf32>
    %139 = vector.extract_strided_slice %135 {offsets = [0, 32], sizes = [8, 8], strides = [1, 1]} : vector<8x64xf32> to vector<8x8xf32>
    %cst_64 = arith.constant dense<0.000000e+00> : vector<8x8xf32>
    %140 = tpu.matmul %137, %138, %cst_64 {dimension_numbers = #tpu.dot_dimension_numbers<[1], [1], [0], [0], [0, 0, 1, 0], [], []>} : vector<8x8xf32>, vector<8x8xf32>, vector<8x8xf32> -> vector<8x8xf32>
    %cst_65 = arith.constant 0.353553385 : f32
    %141 = vector.broadcast %cst_65 : f32 to vector<8x8xf32>
    %142 = arith.mulf %140, %141 : vector<8x8xf32>
    %cst_66 = arith.constant dense<0xFF800000> : vector<8xf32>
    %143 = vector.multi_reduction <maximumf>, %142, %cst_66 [1] : vector<8x8xf32> to vector<8xf32>
    %144 = vector.shape_cast %143 : vector<8xf32> to vector<8x1xf32>
    %145 = vector.broadcast %144 : vector<8x1xf32> to vector<8x8xf32>
    %146 = arith.subf %142, %145 : vector<8x8xf32>
    %147 = math.exp %146 : vector<8x8xf32>
    %cst_67 = arith.constant dense<0.000000e+00> : vector<8xf32>
    %148 = vector.multi_reduction <add>, %147, %cst_67 [1] : vector<8x8xf32> to vector<8xf32>
    %149 = vector.shape_cast %148 : vector<8xf32> to vector<8x1xf32>
    %150 = tpu.reciprocal %149 {approx = true} : vector<8x1xf32> -> vector<8x1xf32>
    %151 = vector.broadcast %150 : vector<8x1xf32> to vector<8x8xf32>
    %152 = arith.mulf %147, %151 : vector<8x8xf32>
    %cst_68 = arith.constant dense<0.000000e+00> : vector<8x8xf32>
    %153 = tpu.matmul %152, %139, %cst_68 {dimension_numbers = #tpu.dot_dimension_numbers<[1], [0], [0], [1], [0, 0, 1, 1], [], []>} : vector<8x8xf32>, vector<8x8xf32>, vector<8x8xf32> -> vector<8x8xf32>
    %154 = vector.extract_strided_slice %128 {offsets = [0, 0], sizes = [8, 32], strides = [1, 1]} : vector<32x32xf32> to vector<8x32xf32>
    %cst_69 = arith.constant dense<0.000000e+00> : vector<8x32xf32>
    %155 = tpu.matmul %153, %154, %cst_69 {dimension_numbers = #tpu.dot_dimension_numbers<[1], [0], [0], [1], [0, 0, 1, 1], [], []>} : vector<8x8xf32>, vector<8x32xf32>, vector<8x32xf32> -> vector<8x32xf32>
    %156 = arith.addf %136, %155 : vector<8x32xf32>
    %157 = vector.extract_strided_slice %132 {offsets = [0, 8], sizes = [8, 8], strides = [1, 1]} : vector<8x32xf32> to vector<8x8xf32>
    %158 = vector.extract_strided_slice %135 {offsets = [0, 8], sizes = [8, 8], strides = [1, 1]} : vector<8x64xf32> to vector<8x8xf32>
    %159 = vector.extract_strided_slice %135 {offsets = [0, 40], sizes = [8, 8], strides = [1, 1]} : vector<8x64xf32> to vector<8x8xf32>
    %cst_70 = arith.constant dense<0.000000e+00> : vector<8x8xf32>
    %160 = tpu.matmul %157, %158, %cst_70 {dimension_numbers = #tpu.dot_dimension_numbers<[1], [1], [0], [0], [0, 0, 1, 0], [], []>} : vector<8x8xf32>, vector<8x8xf32>, vector<8x8xf32> -> vector<8x8xf32>
    %cst_71 = arith.constant 0.353553385 : f32
    %161 = vector.broadcast %cst_71 : f32 to vector<8x8xf32>
    %162 = arith.mulf %160, %161 : vector<8x8xf32>
    %cst_72 = arith.constant dense<0xFF800000> : vector<8xf32>
    %163 = vector.multi_reduction <maximumf>, %162, %cst_72 [1] : vector<8x8xf32> to vector<8xf32>
    %164 = vector.shape_cast %163 : vector<8xf32> to vector<8x1xf32>
    %165 = vector.broadcast %164 : vector<8x1xf32> to vector<8x8xf32>
    %166 = arith.subf %162, %165 : vector<8x8xf32>
    %167 = math.exp %166 : vector<8x8xf32>
    %cst_73 = arith.constant dense<0.000000e+00> : vector<8xf32>
    %168 = vector.multi_reduction <add>, %167, %cst_73 [1] : vector<8x8xf32> to vector<8xf32>
    %169 = vector.shape_cast %168 : vector<8xf32> to vector<8x1xf32>
    %170 = tpu.reciprocal %169 {approx = true} : vector<8x1xf32> -> vector<8x1xf32>
    %171 = vector.broadcast %170 : vector<8x1xf32> to vector<8x8xf32>
    %172 = arith.mulf %167, %171 : vector<8x8xf32>
    %cst_74 = arith.constant dense<0.000000e+00> : vector<8x8xf32>
    %173 = tpu.matmul %172, %159, %cst_74 {dimension_numbers = #tpu.dot_dimension_numbers<[1], [0], [0], [1], [0, 0, 1, 1], [], []>} : vector<8x8xf32>, vector<8x8xf32>, vector<8x8xf32> -> vector<8x8xf32>
    %174 = vector.extract_strided_slice %128 {offsets = [8, 0], sizes = [8, 32], strides = [1, 1]} : vector<32x32xf32> to vector<8x32xf32>
    %cst_75 = arith.constant dense<0.000000e+00> : vector<8x32xf32>
    %175 = tpu.matmul %173, %174, %cst_75 {dimension_numbers = #tpu.dot_dimension_numbers<[1], [0], [0], [1], [0, 0, 1, 1], [], []>} : vector<8x8xf32>, vector<8x32xf32>, vector<8x32xf32> -> vector<8x32xf32>
    %176 = arith.addf %156, %175 : vector<8x32xf32>
    %177 = vector.extract_strided_slice %132 {offsets = [0, 16], sizes = [8, 8], strides = [1, 1]} : vector<8x32xf32> to vector<8x8xf32>
    %178 = vector.extract_strided_slice %135 {offsets = [0, 16], sizes = [8, 8], strides = [1, 1]} : vector<8x64xf32> to vector<8x8xf32>
    %179 = vector.extract_strided_slice %135 {offsets = [0, 48], sizes = [8, 8], strides = [1, 1]} : vector<8x64xf32> to vector<8x8xf32>
    %cst_76 = arith.constant dense<0.000000e+00> : vector<8x8xf32>
    %180 = tpu.matmul %177, %178, %cst_76 {dimension_numbers = #tpu.dot_dimension_numbers<[1], [1], [0], [0], [0, 0, 1, 0], [], []>} : vector<8x8xf32>, vector<8x8xf32>, vector<8x8xf32> -> vector<8x8xf32>
    %cst_77 = arith.constant 0.353553385 : f32
    %181 = vector.broadcast %cst_77 : f32 to vector<8x8xf32>
    %182 = arith.mulf %180, %181 : vector<8x8xf32>
    %cst_78 = arith.constant dense<0xFF800000> : vector<8xf32>
    %183 = vector.multi_reduction <maximumf>, %182, %cst_78 [1] : vector<8x8xf32> to vector<8xf32>
    %184 = vector.shape_cast %183 : vector<8xf32> to vector<8x1xf32>
    %185 = vector.broadcast %184 : vector<8x1xf32> to vector<8x8xf32>
    %186 = arith.subf %182, %185 : vector<8x8xf32>
    %187 = math.exp %186 : vector<8x8xf32>
    %cst_79 = arith.constant dense<0.000000e+00> : vector<8xf32>
    %188 = vector.multi_reduction <add>, %187, %cst_79 [1] : vector<8x8xf32> to vector<8xf32>
    %189 = vector.shape_cast %188 : vector<8xf32> to vector<8x1xf32>
    %190 = tpu.reciprocal %189 {approx = true} : vector<8x1xf32> -> vector<8x1xf32>
    %191 = vector.broadcast %190 : vector<8x1xf32> to vector<8x8xf32>
    %192 = arith.mulf %187, %191 : vector<8x8xf32>
    %cst_80 = arith.constant dense<0.000000e+00> : vector<8x8xf32>
    %193 = tpu.matmul %192, %179, %cst_80 {dimension_numbers = #tpu.dot_dimension_numbers<[1], [0], [0], [1], [0, 0, 1, 1], [], []>} : vector<8x8xf32>, vector<8x8xf32>, vector<8x8xf32> -> vector<8x8xf32>
    %194 = vector.extract_strided_slice %128 {offsets = [16, 0], sizes = [8, 32], strides = [1, 1]} : vector<32x32xf32> to vector<8x32xf32>
    %cst_81 = arith.constant dense<0.000000e+00> : vector<8x32xf32>
    %195 = tpu.matmul %193, %194, %cst_81 {dimension_numbers = #tpu.dot_dimension_numbers<[1], [0], [0], [1], [0, 0, 1, 1], [], []>} : vector<8x8xf32>, vector<8x32xf32>, vector<8x32xf32> -> vector<8x32xf32>
    %196 = arith.addf %176, %195 : vector<8x32xf32>
    %197 = vector.extract_strided_slice %132 {offsets = [0, 24], sizes = [8, 8], strides = [1, 1]} : vector<8x32xf32> to vector<8x8xf32>
    %198 = vector.extract_strided_slice %135 {offsets = [0, 24], sizes = [8, 8], strides = [1, 1]} : vector<8x64xf32> to vector<8x8xf32>
    %199 = vector.extract_strided_slice %135 {offsets = [0, 56], sizes = [8, 8], strides = [1, 1]} : vector<8x64xf32> to vector<8x8xf32>
    %cst_82 = arith.constant dense<0.000000e+00> : vector<8x8xf32>
    %200 = tpu.matmul %197, %198, %cst_82 {dimension_numbers = #tpu.dot_dimension_numbers<[1], [1], [0], [0], [0, 0, 1, 0], [], []>} : vector<8x8xf32>, vector<8x8xf32>, vector<8x8xf32> -> vector<8x8xf32>
    %cst_83 = arith.constant 0.353553385 : f32
    %201 = vector.broadcast %cst_83 : f32 to vector<8x8xf32>
    %202 = arith.mulf %200, %201 : vector<8x8xf32>
    %cst_84 = arith.constant dense<0xFF800000> : vector<8xf32>
    %203 = vector.multi_reduction <maximumf>, %202, %cst_84 [1] : vector<8x8xf32> to vector<8xf32>
    %204 = vector.shape_cast %203 : vector<8xf32> to vector<8x1xf32>
    %205 = vector.broadcast %204 : vector<8x1xf32> to vector<8x8xf32>
    %206 = arith.subf %202, %205 : vector<8x8xf32>
    %207 = math.exp %206 : vector<8x8xf32>
    %cst_85 = arith.constant dense<0.000000e+00> : vector<8xf32>
    %208 = vector.multi_reduction <add>, %207, %cst_85 [1] : vector<8x8xf32> to vector<8xf32>
    %209 = vector.shape_cast %208 : vector<8xf32> to vector<8x1xf32>
    %210 = tpu.reciprocal %209 {approx = true} : vector<8x1xf32> -> vector<8x1xf32>
    %211 = vector.broadcast %210 : vector<8x1xf32> to vector<8x8xf32>
    %212 = arith.mulf %207, %211 : vector<8x8xf32>
    %cst_86 = arith.constant dense<0.000000e+00> : vector<8x8xf32>
    %213 = tpu.matmul %212, %199, %cst_86 {dimension_numbers = #tpu.dot_dimension_numbers<[1], [0], [0], [1], [0, 0, 1, 1], [], []>} : vector<8x8xf32>, vector<8x8xf32>, vector<8x8xf32> -> vector<8x8xf32>
    %214 = vector.extract_strided_slice %128 {offsets = [24, 0], sizes = [8, 32], strides = [1, 1]} : vector<32x32xf32> to vector<8x32xf32>
    %cst_87 = arith.constant dense<0.000000e+00> : vector<8x32xf32>
    %215 = tpu.matmul %213, %214, %cst_87 {dimension_numbers = #tpu.dot_dimension_numbers<[1], [0], [0], [1], [0, 0, 1, 1], [], []>} : vector<8x8xf32>, vector<8x32xf32>, vector<8x32xf32> -> vector<8x32xf32>
    %216 = arith.addf %196, %215 : vector<8x32xf32>
    %217 = vector.broadcast %129 : vector<1x32xf32> to vector<8x32xf32>
    %218 = arith.addf %216, %217 : vector<8x32xf32>
    %219 = arith.addf %123, %218 : vector<8x32xf32>
    %c0_88 = arith.constant 0 : index
    %c0_89 = arith.constant 0 : index
    %220 = vector.load %arg16[%c0_88, %c0_89] : memref<1x32xf32, #tpu.memory_space<vmem>>, vector<1x32xf32>
    %c0_90 = arith.constant 0 : index
    %c0_91 = arith.constant 0 : index
    %221 = vector.load %arg17[%c0_90, %c0_91] : memref<1x32xf32, #tpu.memory_space<vmem>>, vector<1x32xf32>
    %cst_92 = arith.constant dense<0.000000e+00> : vector<8xf32>
    %222 = vector.multi_reduction <add>, %219, %cst_92 [1] : vector<8x32xf32> to vector<8xf32>
    %223 = vector.shape_cast %222 : vector<8xf32> to vector<8x1xf32>
    %cst_93 = arith.constant 3.200000e+01 : f32
    %224 = vector.broadcast %cst_93 : f32 to vector<8x1xf32>
    %225 = arith.divf %223, %224 : vector<8x1xf32>
    %226 = vector.broadcast %225 : vector<8x1xf32> to vector<8x32xf32>
    %227 = arith.subf %219, %226 : vector<8x32xf32>
    %228 = arith.mulf %227, %227 : vector<8x32xf32>
    %cst_94 = arith.constant dense<0.000000e+00> : vector<8xf32>
    %229 = vector.multi_reduction <add>, %228, %cst_94 [1] : vector<8x32xf32> to vector<8xf32>
    %230 = vector.shape_cast %229 : vector<8xf32> to vector<8x1xf32>
    %cst_95 = arith.constant 3.200000e+01 : f32
    %231 = vector.broadcast %cst_95 : f32 to vector<8x1xf32>
    %232 = arith.divf %230, %231 : vector<8x1xf32>
    %233 = vector.broadcast %225 : vector<8x1xf32> to vector<8x32xf32>
    %234 = arith.subf %219, %233 : vector<8x32xf32>
    %cst_96 = arith.constant 9.99999974E-6 : f32
    %235 = vector.broadcast %cst_96 : f32 to vector<8x1xf32>
    %236 = arith.addf %232, %235 : vector<8x1xf32>
    %237 = math.rsqrt %236 : vector<8x1xf32>
    %238 = vector.broadcast %237 : vector<8x1xf32> to vector<8x32xf32>
    %239 = arith.mulf %234, %238 : vector<8x32xf32>
    %240 = vector.broadcast %220 : vector<1x32xf32> to vector<8x32xf32>
    %241 = arith.mulf %239, %240 : vector<8x32xf32>
    %242 = vector.broadcast %221 : vector<1x32xf32> to vector<8x32xf32>
    %243 = arith.addf %241, %242 : vector<8x32xf32>
    %c0_97 = arith.constant 0 : index
    %c0_98 = arith.constant 0 : index
    %244 = vector.load %arg18[%c0_97, %c0_98] : memref<32x64xf32, #tpu.memory_space<vmem>>, vector<32x64xf32>
    %cst_99 = arith.constant dense<0.000000e+00> : vector<8x64xf32>
    %245 = tpu.matmul %243, %244, %cst_99 {dimension_numbers = #tpu.dot_dimension_numbers<[1], [0], [0], [1], [0, 0, 1, 1], [], []>} : vector<8x32xf32>, vector<32x64xf32>, vector<8x64xf32> -> vector<8x64xf32>
    %c0_100 = arith.constant 0 : index
    %c0_101 = arith.constant 0 : index
    %246 = vector.load %arg19[%c0_100, %c0_101] : memref<1x64xf32, #tpu.memory_space<vmem>>, vector<1x64xf32>
    %247 = vector.broadcast %246 : vector<1x64xf32> to vector<8x64xf32>
    %248 = arith.addf %245, %247 : vector<8x64xf32>
    %cst_102 = arith.constant 0.000000e+00 : f32
    %249 = vector.broadcast %cst_102 : f32 to vector<8x64xf32>
    %250 = arith.maximumf %248, %249 : vector<8x64xf32>
    %c0_103 = arith.constant 0 : index
    %c0_104 = arith.constant 0 : index
    %251 = vector.load %arg20[%c0_103, %c0_104] : memref<64x32xf32, #tpu.memory_space<vmem>>, vector<64x32xf32>
    %cst_105 = arith.constant dense<0.000000e+00> : vector<8x32xf32>
    %252 = tpu.matmul %250, %251, %cst_105 {dimension_numbers = #tpu.dot_dimension_numbers<[1], [0], [0], [1], [0, 0, 1, 1], [], []>} : vector<8x64xf32>, vector<64x32xf32>, vector<8x32xf32> -> vector<8x32xf32>
    %c0_106 = arith.constant 0 : index
    %c0_107 = arith.constant 0 : index
    %253 = vector.load %arg21[%c0_106, %c0_107] : memref<1x32xf32, #tpu.memory_space<vmem>>, vector<1x32xf32>
    %254 = vector.broadcast %253 : vector<1x32xf32> to vector<8x32xf32>
    %255 = arith.addf %252, %254 : vector<8x32xf32>
    %256 = arith.addf %243, %255 : vector<8x32xf32>
    %c0_108 = arith.constant 0 : index
    %c0_109 = arith.constant 0 : index
    %257 = vector.load %arg22[%c0_108, %c0_109] : memref<1x32xf32, #tpu.memory_space<vmem>>, vector<1x32xf32>
    %c0_110 = arith.constant 0 : index
    %c0_111 = arith.constant 0 : index
    %258 = vector.load %arg23[%c0_110, %c0_111] : memref<1x32xf32, #tpu.memory_space<vmem>>, vector<1x32xf32>
    %cst_112 = arith.constant dense<0.000000e+00> : vector<8xf32>
    %259 = vector.multi_reduction <add>, %256, %cst_112 [1] : vector<8x32xf32> to vector<8xf32>
    %260 = vector.shape_cast %259 : vector<8xf32> to vector<8x1xf32>
    %cst_113 = arith.constant 3.200000e+01 : f32
    %261 = vector.broadcast %cst_113 : f32 to vector<8x1xf32>
    %262 = arith.divf %260, %261 : vector<8x1xf32>
    %263 = vector.broadcast %262 : vector<8x1xf32> to vector<8x32xf32>
    %264 = arith.subf %256, %263 : vector<8x32xf32>
    %265 = arith.mulf %264, %264 : vector<8x32xf32>
    %cst_114 = arith.constant dense<0.000000e+00> : vector<8xf32>
    %266 = vector.multi_reduction <add>, %265, %cst_114 [1] : vector<8x32xf32> to vector<8xf32>
    %267 = vector.shape_cast %266 : vector<8xf32> to vector<8x1xf32>
    %cst_115 = arith.constant 3.200000e+01 : f32
    %268 = vector.broadcast %cst_115 : f32 to vector<8x1xf32>
    %269 = arith.divf %267, %268 : vector<8x1xf32>
    %270 = vector.broadcast %262 : vector<8x1xf32> to vector<8x32xf32>
    %271 = arith.subf %256, %270 : vector<8x32xf32>
    %cst_116 = arith.constant 9.99999974E-6 : f32
    %272 = vector.broadcast %cst_116 : f32 to vector<8x1xf32>
    %273 = arith.addf %269, %272 : vector<8x1xf32>
    %274 = math.rsqrt %273 : vector<8x1xf32>
    %275 = vector.broadcast %274 : vector<8x1xf32> to vector<8x32xf32>
    %276 = arith.mulf %271, %275 : vector<8x32xf32>
    %277 = vector.broadcast %257 : vector<1x32xf32> to vector<8x32xf32>
    %278 = arith.mulf %276, %277 : vector<8x32xf32>
    %279 = vector.broadcast %258 : vector<1x32xf32> to vector<8x32xf32>
    %280 = arith.addf %278, %279 : vector<8x32xf32>
    %c0_117 = arith.constant 0 : index
    %c0_118 = arith.constant 0 : index
    %281 = vector.load %arg24[%c0_117, %c0_118] : memref<1x32xf32, #tpu.memory_space<vmem>>, vector<1x32xf32>
    %c0_119 = arith.constant 0 : index
    %c0_120 = arith.constant 0 : index
    %282 = vector.load %arg25[%c0_119, %c0_120] : memref<1x32xf32, #tpu.memory_space<vmem>>, vector<1x32xf32>
    %cst_121 = arith.constant dense<0.000000e+00> : vector<8xf32>
    %283 = vector.multi_reduction <add>, %280, %cst_121 [1] : vector<8x32xf32> to vector<8xf32>
    %284 = vector.shape_cast %283 : vector<8xf32> to vector<8x1xf32>
    %cst_122 = arith.constant 3.200000e+01 : f32
    %285 = vector.broadcast %cst_122 : f32 to vector<8x1xf32>
    %286 = arith.divf %284, %285 : vector<8x1xf32>
    %287 = vector.broadcast %286 : vector<8x1xf32> to vector<8x32xf32>
    %288 = arith.subf %280, %287 : vector<8x32xf32>
    %289 = arith.mulf %288, %288 : vector<8x32xf32>
    %cst_123 = arith.constant dense<0.000000e+00> : vector<8xf32>
    %290 = vector.multi_reduction <add>, %289, %cst_123 [1] : vector<8x32xf32> to vector<8xf32>
    %291 = vector.shape_cast %290 : vector<8xf32> to vector<8x1xf32>
    %cst_124 = arith.constant 3.200000e+01 : f32
    %292 = vector.broadcast %cst_124 : f32 to vector<8x1xf32>
    %293 = arith.divf %291, %292 : vector<8x1xf32>
    %294 = vector.broadcast %286 : vector<8x1xf32> to vector<8x32xf32>
    %295 = arith.subf %280, %294 : vector<8x32xf32>
    %cst_125 = arith.constant 9.99999974E-6 : f32
    %296 = vector.broadcast %cst_125 : f32 to vector<8x1xf32>
    %297 = arith.addf %293, %296 : vector<8x1xf32>
    %298 = math.rsqrt %297 : vector<8x1xf32>
    %299 = vector.broadcast %298 : vector<8x1xf32> to vector<8x32xf32>
    %300 = arith.mulf %295, %299 : vector<8x32xf32>
    %301 = vector.broadcast %281 : vector<1x32xf32> to vector<8x32xf32>
    %302 = arith.mulf %300, %301 : vector<8x32xf32>
    %303 = vector.broadcast %282 : vector<1x32xf32> to vector<8x32xf32>
    %304 = arith.addf %302, %303 : vector<8x32xf32>
    %c0_126 = arith.constant 0 : index
    %c0_127 = arith.constant 0 : index
    %305 = vector.load %arg26[%c0_126, %c0_127] : memref<32x4xf32, #tpu.memory_space<vmem>>, vector<32x4xf32>
    %cst_128 = arith.constant dense<0.000000e+00> : vector<8x4xf32>
    %306 = tpu.matmul %304, %305, %cst_128 {dimension_numbers = #tpu.dot_dimension_numbers<[1], [0], [0], [1], [0, 0, 1, 1], [], []>} : vector<8x32xf32>, vector<32x4xf32>, vector<8x4xf32> -> vector<8x4xf32>
    %c0_129 = arith.constant 0 : index
    %c0_130 = arith.constant 0 : index
    %307 = vector.load %arg27[%c0_129, %c0_130] : memref<1x4xf32, #tpu.memory_space<vmem>>, vector<1x4xf32>
    %308 = vector.broadcast %307 : vector<1x4xf32> to vector<8x4xf32>
    %309 = arith.addf %306, %308 : vector<8x4xf32>
    %c0_131 = arith.constant 0 : index
    %c0_132 = arith.constant 0 : index
    %c0_133 = arith.constant 0 : index
    %310 = vector.load %arg28[%c0_131, %c0_132, %c0_133] : memref<1x8x4xf32, #tpu.memory_space<vmem>>, vector<1x8x4xf32>
    %311 = vector.shape_cast %310 : vector<1x8x4xf32> to vector<8x4xf32>
    %312 = vector.shape_cast %309 : vector<8x4xf32> to vector<1x8x4xf32>
    tpu.vector_store %arg28[%c0_131, %c0_132, %c0_133], %312 {strides = array<i32>} : memref<1x8x4xf32, #tpu.memory_space<vmem>>, vector<1x8x4xf32>,
    return
  }
  func.func @transform_0(%arg0: i32) -> (i32, i32, i32) {
    %c0_i32 = arith.constant 0 : i32
    %c0_i32_0 = arith.constant 0 : i32
    %c0_i32_1 = arith.constant 0 : i32
    return %arg0, %c0_i32, %c0_i32_0 : i32, i32, i32
  }
  func.func @transform_1(%arg0: i32) -> (i32, i32, i32) {
    %c0_i32 = arith.constant 0 : i32
    %c0_i32_0 = arith.constant 0 : i32
    %c0_i32_1 = arith.constant 0 : i32
    return %arg0, %c0_i32, %c0_i32_0 : i32, i32, i32
  }
  func.func @transform_2(%arg0: i32) -> (i32, i32) {
    %c0_i32 = arith.constant 0 : i32
    %c0_i32_0 = arith.constant 0 : i32
    %c0_i32_1 = arith.constant 0 : i32
    return %c0_i32, %c0_i32_0 : i32, i32
  }
  func.func @transform_3(%arg0: i32) -> (i32, i32) {
    %c0_i32 = arith.constant 0 : i32
    %c0_i32_0 = arith.constant 0 : i32
    %c0_i32_1 = arith.constant 0 : i32
    return %c0_i32, %c0_i32_0 : i32, i32
  }
  func.func @transform_4(%arg0: i32) -> (i32, i32) {
    %c0_i32 = arith.constant 0 : i32
    %c0_i32_0 = arith.constant 0 : i32
    %c0_i32_1 = arith.constant 0 : i32
    return %c0_i32, %c0_i32_0 : i32, i32
  }
  func.func @transform_5(%arg0: i32) -> (i32, i32) {
    %c0_i32 = arith.constant 0 : i32
    %c0_i32_0 = arith.constant 0 : i32
    %c0_i32_1 = arith.constant 0 : i32
    return %c0_i32, %c0_i32_0 : i32, i32
  }
  func.func @transform_6(%arg0: i32) -> (i32, i32) {
    %c0_i32 = arith.constant 0 : i32
    %c0_i32_0 = arith.constant 0 : i32
    %c0_i32_1 = arith.constant 0 : i32
    return %c0_i32, %c0_i32_0 : i32, i32
  }
  func.func @transform_7(%arg0: i32) -> (i32, i32) {
    %c0_i32 = arith.constant 0 : i32
    %c0_i32_0 = arith.constant 0 : i32
    %c0_i32_1 = arith.constant 0 : i32
    return %c0_i32, %c0_i32_0 : i32, i32
  }
  func.func @transform_8(%arg0: i32) -> (i32, i32) {
    %c0_i32 = arith.constant 0 : i32
    %c0_i32_0 = arith.constant 0 : i32
    %c0_i32_1 = arith.constant 0 : i32
    return %c0_i32, %c0_i32_0 : i32, i32
  }
  func.func @transform_9(%arg0: i32) -> (i32, i32) {
    %c0_i32 = arith.constant 0 : i32
    %c0_i32_0 = arith.constant 0 : i32
    %c0_i32_1 = arith.constant 0 : i32
    return %c0_i32, %c0_i32_0 : i32, i32
  }
  func.func @transform_10(%arg0: i32) -> (i32, i32) {
    %c0_i32 = arith.constant 0 : i32
    %c0_i32_0 = arith.constant 0 : i32
    %c0_i32_1 = arith.constant 0 : i32
    return %c0_i32, %c0_i32_0 : i32, i32
  }
  func.func @transform_11(%arg0: i32) -> (i32, i32) {
    %c0_i32 = arith.constant 0 : i32
    %c0_i32_0 = arith.constant 0 : i32
    %c0_i32_1 = arith.constant 0 : i32
    return %c0_i32, %c0_i32_0 : i32, i32
  }
  func.func @transform_12(%arg0: i32) -> (i32, i32) {
    %c0_i32 = arith.constant 0 : i32
    %c0_i32_0 = arith.constant 0 : i32
    %c0_i32_1 = arith.constant 0 : i32
    return %c0_i32, %c0_i32_0 : i32, i32
  }
  func.func @transform_13(%arg0: i32) -> (i32, i32) {
    %c0_i32 = arith.constant 0 : i32
    %c0_i32_0 = arith.constant 0 : i32
    %c0_i32_1 = arith.constant 0 : i32
    return %c0_i32, %c0_i32_0 : i32, i32
  }
  func.func @transform_14(%arg0: i32) -> (i32, i32) {
    %c0_i32 = arith.constant 0 : i32
    %c0_i32_0 = arith.constant 0 : i32
    %c0_i32_1 = arith.constant 0 : i32
    return %c0_i32, %c0_i32_0 : i32, i32
  }
  func.func @transform_15(%arg0: i32) -> (i32, i32) {
    %c0_i32 = arith.constant 0 : i32
    %c0_i32_0 = arith.constant 0 : i32
    %c0_i32_1 = arith.constant 0 : i32
    return %c0_i32, %c0_i32_0 : i32, i32
  }
  func.func @transform_16(%arg0: i32) -> (i32, i32) {
    %c0_i32 = arith.constant 0 : i32
    %c0_i32_0 = arith.constant 0 : i32
    %c0_i32_1 = arith.constant 0 : i32
    return %c0_i32, %c0_i32_0 : i32, i32
  }
  func.func @transform_17(%arg0: i32) -> (i32, i32) {
    %c0_i32 = arith.constant 0 : i32
    %c0_i32_0 = arith.constant 0 : i32
    %c0_i32_1 = arith.constant 0 : i32
    return %c0_i32, %c0_i32_0 : i32, i32
  }
  func.func @transform_18(%arg0: i32) -> (i32, i32) {
    %c0_i32 = arith.constant 0 : i32
    %c0_i32_0 = arith.constant 0 : i32
    %c0_i32_1 = arith.constant 0 : i32
    return %c0_i32, %c0_i32_0 : i32, i32
  }
  func.func @transform_19(%arg0: i32) -> (i32, i32) {
    %c0_i32 = arith.constant 0 : i32
    %c0_i32_0 = arith.constant 0 : i32
    %c0_i32_1 = arith.constant 0 : i32
    return %c0_i32, %c0_i32_0 : i32, i32
  }
  func.func @transform_20(%arg0: i32) -> (i32, i32) {
    %c0_i32 = arith.constant 0 : i32
    %c0_i32_0 = arith.constant 0 : i32
    %c0_i32_1 = arith.constant 0 : i32
    return %c0_i32, %c0_i32_0 : i32, i32
  }
  func.func @transform_21(%arg0: i32) -> (i32, i32) {
    %c0_i32 = arith.constant 0 : i32
    %c0_i32_0 = arith.constant 0 : i32
    %c0_i32_1 = arith.constant 0 : i32
    return %c0_i32, %c0_i32_0 : i32, i32
  }
  func.func @transform_22(%arg0: i32) -> (i32, i32) {
    %c0_i32 = arith.constant 0 : i32
    %c0_i32_0 = arith.constant 0 : i32
    %c0_i32_1 = arith.constant 0 : i32
    return %c0_i32, %c0_i32_0 : i32, i32
  }
  func.func @transform_23(%arg0: i32) -> (i32, i32) {
    %c0_i32 = arith.constant 0 : i32
    %c0_i32_0 = arith.constant 0 : i32
    %c0_i32_1 = arith.constant 0 : i32
    return %c0_i32, %c0_i32_0 : i32, i32
  }
  func.func @transform_24(%arg0: i32) -> (i32, i32) {
    %c0_i32 = arith.constant 0 : i32
    %c0_i32_0 = arith.constant 0 : i32
    %c0_i32_1 = arith.constant 0 : i32
    return %c0_i32, %c0_i32_0 : i32, i32
  }
  func.func @transform_25(%arg0: i32) -> (i32, i32) {
    %c0_i32 = arith.constant 0 : i32
    %c0_i32_0 = arith.constant 0 : i32
    %c0_i32_1 = arith.constant 0 : i32
    return %c0_i32, %c0_i32_0 : i32, i32
  }
  func.func @transform_26(%arg0: i32) -> (i32, i32) {
    %c0_i32 = arith.constant 0 : i32
    %c0_i32_0 = arith.constant 0 : i32
    %c0_i32_1 = arith.constant 0 : i32
    return %c0_i32, %c0_i32_0 : i32, i32
  }
  func.func @transform_27(%arg0: i32) -> (i32, i32, i32) {
    %c0_i32 = arith.constant 0 : i32
    %c0_i32_0 = arith.constant 0 : i32
    %c0_i32_1 = arith.constant 0 : i32
    return %arg0, %c0_i32, %c0_i32_0 : i32, i32, i32
  }
}

</mosaic_0001>

<bundles_post_ra>
// kernel: transformer_model_forward.6
= control target key start
LH: loop header
LB: loop body
LE: loop exit
PB: predicated region body
PF: predicated region fallthrough
CT: control target
= control target key end

     0   :  { %s449_s21 = smov 0   ;;  %s491_s0 = inlined_call_operand.vmem [shape: f32[2,8,4], index: 0, kind: input, shape index: {}]   ;;  %s492_s1 = inlined_call_operand.vmem [shape: f32[8,32], index: 1, kind: input, shape index: {}]   ;;  %s493_s2 = inlined_call_operand.vmem [shape: f32[4,32], index: 2, kind: input, shape index: {}]   ;;  %s494_s3 = inlined_call_operand.vmem [shape: f32[1,32], index: 3, kind: input, shape index: {}]   ;;  %s495_s4 = inlined_call_operand.vmem [shape: f32[1,32], index: 4, kind: input, shape index: {}]   ;;  %s496_s5 = inlined_call_operand.vmem [shape: f32[1,32], index: 5, kind: input, shape index: {}]   ;;  %s497_s6 = inlined_call_operand.vmem [shape: f32[2,8,32], index: 6, kind: output, shape index: {}]  }
   0x1 LB: > { %s378_s22 = sadd.s32 4294967295, %s411_s21   ;;  %p382_p0 = scmp.ge.s32.totalorder %s411_s21, 1  ;;  %s411_s21 = sphi %s449_s21, %s16_s21  }
   0x2   : > { %p211_p1 = scmp.lt.s32.totalorder %s411_s21, 3 }
   0x4   : > { %p212_p2 = pnand %p382_p0, %p211_p1 }
   0x5   : > { %p239_p3 = scmp.lt.s32.totalorder (!%p212_p2), %s378_s22, 1 }
   0x6   : > { %215 = sbr.rel (%p212_p2) target bundleno = 416 (0x1a0), region = 44 }
   0xb   : > { %v248_v0 = vld [vmem:[%s493_s2] sm:$0xf]  ;;  %vm257_vm0 = vcmask 1043456   ;;  %s499_s22 = smov (!%p239_p3, %s378_s22), 1  ;;  %vm253_vm1 = vcmask 31744   ;;  %vm286_vm2 = vcmask 261120  }
   0xc   : > { %385 = vmatpush.msk.msra.mxu0 %vm257_vm0, %v248_v0  ;;  %s383_s25 = sshll.u32 %s499_s22, 3  ;;  %v398_v2 = vld [vmem:[%s494_s3] ss:$0 sm:$0xff]  ;;  %v413_v9 = vmov 32.0  }
   0xd   : > { %s242_s28 = scalar_lea.vmem %s491_s0, %s383_s25  ;;  %v282_v5 = vld [vmem:[%s492_s1] sm:$0xff]  ;;  %401 = vrcp.f32 %v413_v9  ;;  %s246_s15 = scalar_lea.vmem %s497_s6, %s383_s25 }
   0xe   : > { %v247_v1 = vld [vmem:[%s242_s28] sm:$0xff] }
   0xf   : > { %386 = vmatmul.msk.f32.vlgmr.msra.gmra.mxu0 %vm253_vm1, %v247_v1  ;;  %v399_v30 = vld [vmem:[%s495_s4] ss:$0 sm:$0xff] }
  0x10   : > { %v400_v32 = vld [vmem:[%s496_s5] ss:$0 sm:$0xff] }
  0x13   : > { %v402_v10 = vpop.eup %401 }
  0x14   : > { %v291_v11 = vmul.f32 32.0, %v402_v10  ;;  %vm295_vm3 = vweird.f32 %v402_v10 }
  0x16   : > { %v292_v12 = vsub.f32 1.0, %v291_v11 }
  0x18   : > { %v293_v13 = vmul.f32 %v402_v10, %v292_v12 }
  0x1a   : > { %v294_v14 = vadd.f32 %v402_v10, %v293_v13 }
  0x1c   : > { %v296_v15 = vsel %vm295_vm3, %v402_v10, %v294_v14 }
  0x8c   : > { %v278_v3 = vpop.f32.mrf.mxu0 }
  0x8d   : > { %v279_v4 = vadd.f32 %v398_v2, %v278_v3 }
  0x8f   : > { %v281_v6 = vmul.f32 5.656854, %v279_v4 }
  0x91   : > { %v283_v7 = vadd.f32 %v282_v5, %v281_v6 }
  0x93   : > { %v287_v8 = vsel %vm286_vm2, %v283_v7, 0.0 }
  0x94   : > { %288 = vadd.xlane.f32.xlu0 %v287_v8 }
 0x107   : > { %v289_v16 = vpop.xlane.xlu0 %288 }
 0x108   : > { %v297_v17 = vmul.f32 %v296_v15, %v289_v16 }
 0x10a   : > { %v298_v18 = vsub.f32 %v283_v7, %v297_v17 }
 0x10c   : > { %v299_v19 = vmul.f32 %v298_v18, %v298_v18 }
 0x10e   : > { %v300_v20 = vsel %vm286_vm2, %v299_v19, 0.0 }
 0x10f   : > { %301 = vadd.xlane.f32.xlu0 %v300_v20 }
 0x182   : > { %v302_v21 = vpop.xlane.xlu0 %301 }
 0x183   : > { %v303_v22 = vmul.f32 %v302_v21, %v296_v15 }
 0x185   : > { %v304_v23 = vadd.f32 1e-05, %v303_v22 }
 0x187   : > { %403 = vrsqrt.f32 %v304_v23  ;;  %vm311_vm5 = vweird.f32 %v304_v23 }
 0x18d   : > { %v404_v24 = vpop.eup %403 }
 0x18e   : > { %v306_v25 = vmul.f32 %v404_v24, %v304_v23  ;;  %vm312_vm4 = vweird.f32 %v404_v24 }
 0x18f   : > { %vm313_vm6 = vmor %vm311_vm5, %vm312_vm4 }
 0x190   : > { %v307_v26 = vmul.f32 %v404_v24, %v306_v25 }
 0x192   : > { %v308_v27 = vmul.f32 0.5, %v307_v26 }
 0x194   : > { %v309_v28 = vsub.f32 1.5, %v308_v27 }
 0x196   : > { %v310_v29 = vmul.f32 %v404_v24, %v309_v28 }
 0x198   : > { %v314_v31 = vsel %vm313_vm6, %v404_v24, %v310_v29 }
 0x199   : > { %v315_v33 = vmul.f32 %v314_v31, %v298_v18 }
 0x19b   : > { %v319_v34 = vmul.f32 %v399_v30, %v315_v33 }
 0x19d   : > { %v323_v35 = vadd.f32 %v400_v32, %v319_v34 }
 0x19f   : > { %324 = vst.msk [vmem:[%s246_s15] sm:$0xff] %vm286_vm2, %v323_v35 }
 0x1a0 PF: > { %s16_s21 = sadd.s32 1, %s411_s21  }
 0x1a1   : > { %p13_p4 = scmp.ge.s32.totalorder %s16_s21, 4  }
 0x1a3   :  { %15 = sbr.rel (!%p13_p4) target bundleno = 1 (0x1), region = 74 }

// kernel: transformer_model_forward.8
= control target key start
LH: loop header
LB: loop body
LE: loop exit
PB: predicated region body
PF: predicated region fallthrough
CT: control target
= control target key end

     0   :  { %s1199_s25 = smov 0   ;;  %s1365_s0 = inlined_call_operand.vmem [shape: f32[2,8,32], index: 0, kind: input, shape index: {}]   ;;  %s1366_s1 = inlined_call_operand.vmem [shape: f32[32,96], index: 1, kind: input, shape index: {}]   ;;  %s1367_s2 = inlined_call_operand.vmem [shape: f32[1,96], index: 2, kind: input, shape index: {}]   ;;  %s1368_s3 = inlined_call_operand.vmem [shape: f32[32,32], index: 3, kind: input, shape index: {}]   ;;  %s1369_s4 = inlined_call_operand.vmem [shape: f32[1,32], index: 4, kind: input, shape index: {}]   ;;  %s1370_s5 = inlined_call_operand.vmem [shape: f32[1,32], index: 5, kind: input, shape index: {}]   ;;  %s1371_s6 = inlined_call_operand.vmem [shape: f32[1,32], index: 6, kind: input, shape index: {}]   ;;  %s1372_s7 = inlined_call_operand.vmem [shape: f32[32,64], index: 7, kind: input, shape index: {}]   ;;  %s1373_s8 = inlined_call_operand.vmem [shape: f32[1,64], index: 8, kind: input, shape index: {}]   ;;  %s1374_s9 = inlined_call_operand.vmem [shape: f32[64,32], index: 9, kind: input, shape index: {}]   ;;  %s1375_s10 = inlined_call_operand.vmem [shape: f32[1,32], index: 10, kind: input, shape index: {}]   ;;  %s1376_s11 = inlined_call_operand.vmem [shape: f32[1,32], index: 11, kind: input, shape index: {}]   ;;  %s1377_s12 = inlined_call_operand.vmem [shape: f32[1,32], index: 12, kind: input, shape index: {}]   ;;  %s1378_s13 = inlined_call_operand.vmem [shape: f32[2,8,32], index: 13, kind: output, shape index: {}]  }
   0x1 LB: > { %s1031_s26 = sadd.s32 4294967295, %s1115_s25   ;;  %p1035_p0 = scmp.ge.s32.totalorder %s1115_s25, 1  ;;  %s1115_s25 = sphi %s1199_s25, %s23_s25  }
   0x2   : > { %p386_p1 = scmp.lt.s32.totalorder %s1115_s25, 3 }
   0x4   : > { %p387_p2 = pnand %p1035_p0, %p386_p1 }
   0x5   : > { %p428_p3 = scmp.lt.s32.totalorder (!%p387_p2), %s1031_s26, 1  ;;  %s1117_s24 = smov (!%p387_p2), 88  }
   0x6   : > { %390 = sbr.rel (%p387_p2) target bundleno = 2258 (0x8d2), region = 72  ;;  %s1118_s27 = smov (!%p387_p2), 96  }
   0x7   : > { %s1119_s28 = smov (!%p387_p2), 120   ;;  %s1120_s29 = smov (!%p387_p2), 72  }
   0x8   : > { %s1121_s30 = smov (!%p387_p2), 104   ;;  %s1122_s14 = smov (!%p387_p2), 80  }
   0x9   : > { %s1123_s17 = smov (!%p387_p2), 64   ;;  %s1124_s19 = smov (!%p387_p2), 112  }
   0xa   : > { %s1125_s20 = smov (!%p387_p2), 48   ;;  %s1127_s22 = smov (!%p387_p2), 40  }
   0xb   : > { %v440_v0 = vld [vmem:[%s1366_s1 + $0x18] sm:$0xff]  ;;  %v439_v1 = vld [vmem:[%s1366_s1 + $0x10] sm:$0xff]  ;;  %v438_v2 = vld [vmem:[%s1366_s1 + $0x8] sm:$0xff]  ;;  %s1380_s26 = smov (!%p428_p3, %s1031_s26), 1  ;;  %vm450_vm0 = vcmask 261120   ;;  %vm477_vm1 = vcmask 64512  }
   0xc   : > { %466 = vmatpush.msra.mxu0 %v440_v0  ;;  %v437_v3 = vld [vmem:[%s1366_s1] sm:$0xff]  ;;  %s1036_s18 = sshll.u32 %s1380_s26, 3  ;;  %vm920_vm6 = vcmask 523264  }
   0xd   : > { %s431_s21 = scalar_lea.vmem %s1365_s0, %s1036_s18  ;;  %v1079_v5 = vld [vmem:[%s1367_s2] ss:$0 sm:$0xff] }
   0xe   : > { %467 = vmatpush.msra.mxu0 %v439_v1  ;;  %v1227_v4 = vld [vmem:[%s431_s21] sm:$0xff]  ;;  %s1126_s21 = smov 56  }
   0xf   : > { %v442_v8 = vld [vmem:[%s1368_s3] sm:$0xff] }
  0x10   : > { %468 = vmatpush.msra.mxu0 %v438_v2  ;;  %647 = vmatpush.msra.mxu3 %v442_v8  ;;  %v443_v2 = vld [vmem:[%s1368_s3 + $0x8] sm:$0xff] }
  0x12   : > { %469 = vmatpush.msra.mxu0 %v437_v3  ;;  %v444_v3 = vld [vmem:[%s1368_s3 + $0x10] sm:$0xff] }
  0x13   : > { %1038 = vmatmul.msk.f32.vlgmr.msra.gmra.mxu0 %vm450_vm0, %v1227_v4 }
  0x90   : > { %v471_v6 = vpop.f32.mrf.mxu0 }
  0x91   : > { %v1234_v7 = vadd.f32 %v1079_v5, %v471_v6 }
  0x93   : > { %542 = vrot.lane.b32.xlu2 %v1234_v7, %s1117_s24  ;;  %475 = vrot.lane.b32.xlu0 %v1234_v7, %s1118_s27 }
  0x9b   : > { %540 = vrot.lane.b32.xlu2 %v1234_v7, %s1119_s28 }
  0xa3   : > { %744 = vrot.lane.b32.xlu2 %v1234_v7, %s1120_s29  ;;  %s435_s29 = scalar_lea.vmem %s1378_s13, %s1036_s18 }
  0xab   : > { %742 = vrot.lane.b32.xlu2 %v1234_v7, %s1121_s30 }
  0xb3   : > { %654 = vrot.lane.b32.xlu2 %v1234_v7, %s1122_s14 }
  0xed   : > { %v543_v9 = vpop.permute.xlu2 %542 }
  0xee   : > { %1042 = vmatpush.xpose.msk.msrb.mxu0 %vm477_vm1, %v543_v9 }
  0xf5   : > { %v541_v10 = vpop.permute.xlu2 %540 }
  0xf6   : > { %1043 = vmatmul.msk.f32.vlgmr.msrb.gmra.mxu0 %vm477_vm1, %v541_v10 }
  0xfd   : > { %v745_v11 = vpop.permute.xlu2 %744 }
  0xfe   : > { %1051 = vmatpush.xpose.msk.msrb.mxu3 %vm477_vm1, %v745_v11 }
 0x105   : > { %v743_v12 = vpop.permute.xlu2 %742  ;;  %v476_v13 = vpop.permute.xlu0 %475 }
 0x106   : > { %1039 = vmatpush.xpose.msk.msra.mxu1 %vm477_vm1, %v476_v13  ;;  %v1080_v13 = vld [vmem:[%s1369_s4] ss:$0 sm:$0xff] }
 0x109   : > { %1040 = vmatmul.msk.f32.vlgmr.msra.gmra.mxu1 %vm477_vm1, %v1234_v7 }
 0x10a   : > { %624 = vmatpush.msrb.mxu1 %v443_v2 }
 0x10c   : > { %736 = vmatpush.msra.mxu1 %v444_v3 }
 0x10d   : > { %v655_v14 = vpop.permute.xlu2 %654 }
 0x10e   : > { %1047 = vmatpush.xpose.msk.msra.mxu0 %vm477_vm1, %v655_v14 }
 0x173   : > { %v565_v15 = vpop.f32.mrf.mxu0 }
 0x174   : > { %v568_v16 = vmul.f32 0.35355338, %v565_v15 }
 0x176   : > { %v569_v17 = vsel %vm477_vm1, %v568_v16, -inf }
 0x177   : > { %570 = vmax.xlane.f32.xlu2 %v569_v17 }
 0x186   : > { %v499_v18 = vpop.f32.mrf.mxu1 }
 0x187   : > { %v502_v19 = vmul.f32 0.35355338, %v499_v18 }
 0x189   : > { %v503_v20 = vsel %vm477_vm1, %v502_v19, -inf }
 0x18a   : > { %504 = vmax.xlane.f32.xlu0 %v503_v20 }
 0x1ea   : > { %v571_v35 = vpop.xlane.xlu2 %570 }
 0x1eb   : > { %v572_v37 = vsub.f32 %v568_v16, %v571_v35  ;;  %v914_v35 = vld [vmem:[%s1374_s9 + $0x30] sm:$0xff] }
 0x1ed   : > { %v573_v38 = vmul.f32 1.442695, %v572_v37 }
 0x1fd   : > { %v505_v21 = vpop.xlane.xlu0 %504 }
 0x1fe   : > { %v506_v22 = vsub.f32 %v502_v19, %v505_v21  ;;  %v1128_v19 = vmov 32.0  }
 0x200   : > { %v507_v23 = vmul.f32 1.442695, %v506_v22 }
 0x202   : > { %1087 = vpow2.f32 %v507_v23 }
 0x208   : > { %v1088_v24 = vpop.eup %1087 }
 0x209   : > { %v509_v25 = vsel %vm477_vm1, %v1088_v24, 0.0 }
 0x20a   : > { %510 = vadd.xlane.f32.xlu1 %v509_v25 }
 0x223   : > { %514 = vrot.lane.b32.xlu1 %v1234_v7, %s1123_s17 }
 0x22b   : > { %652 = vrot.lane.b32.xlu1 %v1234_v7, %s1124_s19 }
 0x27d   : > { %v511_v26 = vpop.xlane.xlu1 %510 }
 0x27e   : > { %1089 = vrcp.f32 %v511_v26 }
 0x27f   : > { %1091 = vpow2.f32 %v573_v38 }
 0x284   : > { %v1090_v27 = vpop.eup %1089 }
 0x285   : > { %v513_v29 = vmul.f32 %v1090_v27, %v1088_v24  ;;  %v1092_v45 = vpop.eup %1091 }
 0x286   : > { %v575_v46 = vsel %vm477_vm1, %v1092_v45, 0.0 }
 0x295   : > { %v515_v28 = vpop.permute.xlu1 %514 }
 0x296   : > { %535 = vmatpush.msra.mxu2 %v515_v28 }
 0x297   : > { %1041 = vmatmul.msk.f32.vlgmr.msra.gmra.mxu2 %vm477_vm1, %v513_v29 }
 0x29d   : > { %v653_v30 = vpop.permute.xlu1 %652 }
 0x29e   : > { %1048 = vmatmul.msk.f32.vlgmr.msra.gmra.mxu0 %vm477_vm1, %v653_v30  ;;  %v879_v30 = vld [vmem:[%s1372_s7 + $0x18] sm:$0xff] }
 0x31a   : > { %v537_v31 = vpop.f32.mrf.mxu2 }
 0x31b   : > { %1046 = vmatmul.msk.f32.vlgmr.msra.gmra.mxu3 %vm477_vm1, %v537_v31  ;;  %v677_v32 = vpop.f32.mrf.mxu0  ;;  %v878_v31 = vld [vmem:[%s1372_s7 + $0x10] sm:$0xff] }
 0x31c   : > { %v680_v33 = vmul.f32 0.35355338, %v677_v32  ;;  %v877_v32 = vld [vmem:[%s1372_s7 + $0x8] sm:$0xff] }
 0x31e   : > { %v681_v34 = vsel %vm477_vm1, %v680_v33, -inf }
 0x31f   : > { %682 = vmax.xlane.f32.xlu1 %v681_v34  ;;  %v915_v34 = vld [vmem:[%s1374_s9 + $0x38] sm:$0xff] }
 0x320   : > { %932 = vmatpush.msra.mxu3 %v915_v34 }
 0x322   : > { %933 = vmatpush.msra.mxu3 %v914_v35 }
 0x323   : > { %1052 = vmatmul.msk.f32.vlgmr.msrb.gmra.mxu3 %vm477_vm1, %v743_v12 }
 0x338   : > { %692 = vrot.lane.b32.xlu1 %v1234_v7, %s1125_s20 }
 0x392   : > { %v683_v39 = vpop.xlane.xlu1 %682 }
 0x393   : > { %v684_v42 = vsub.f32 %v680_v33, %v683_v39  ;;  %v876_v33 = vld [vmem:[%s1372_s7] sm:$0xff] }
 0x394   : > { %v912_v39 = vld [vmem:[%s1374_s9 + $0x20] sm:$0xff] }
 0x395   : > { %v685_v44 = vmul.f32 1.442695, %v684_v42 }
 0x397   : > { %1093 = vpow2.f32 %v685_v44 }
 0x39d   : > { %v1094_v47 = vpop.eup %1093 }
 0x39e   : > { %v1263_v36 = vpop.f32.mrf.mxu3  ;;  %v687_v48 = vsel %vm477_vm1, %v1094_v47, 0.0 }
 0x3a6   : > { %v767_v40 = vpop.f32.mrf.mxu3 }
 0x3a7   : > { %v770_v41 = vmul.f32 0.35355338, %v767_v40 }
 0x3a9   : > { %v771_v43 = vsel %vm477_vm1, %v770_v41, -inf }
 0x3aa   : > { %772 = vmax.xlane.f32.xlu0 %v771_v43  ;;  %v693_v59 = vpop.permute.xlu1 %692 }
 0x3b2   : > { %576 = vadd.xlane.f32.xlu0 %v575_v46 }
 0x3ba   : > { %688 = vadd.xlane.f32.xlu0 %v687_v48  ;;  %v1081_v48 = vld [vmem:[%s1370_s5] ss:$0 sm:$0xff] }
 0x3ce   : > { %580 = vrot.lane.b32.xlu0 %v1234_v7, %s1126_s21 }
 0x41d   : > { %v773_v49 = vpop.xlane.xlu0 %772 }
 0x41e   : > { %v774_v50 = vsub.f32 %v770_v41, %v773_v49  ;;  %v911_v41 = vld [vmem:[%s1374_s9 + $0x18] sm:$0xff] }
 0x420   : > { %v775_v51 = vmul.f32 1.442695, %v774_v50 }
 0x422   : > { %1095 = vpow2.f32 %v775_v51  ;;  %v1082_v51 = vld [vmem:[%s1371_s6] ss:$0 sm:$0xff] }
 0x425   : > { %v577_v54 = vpop.xlane.xlu0 %576 }
 0x426   : > { %1097 = vrcp.f32 %v577_v54  ;;  %v910_v54 = vld [vmem:[%s1374_s9 + $0x10] sm:$0xff] }
 0x428   : > { %v1096_v52 = vpop.eup %1095 }
 0x429   : > { %v777_v53 = vsel %vm477_vm1, %v1096_v52, 0.0 }
 0x42a   : > { %778 = vadd.xlane.f32.xlu2 %v777_v53 }
 0x42c   : > { %v1098_v56 = vpop.eup %1097 }
 0x42d   : > { %v689_v55 = vpop.xlane.xlu0 %688  ;;  %v579_v58 = vmul.f32 %v1098_v56, %v1092_v45  ;;  %v908_v56 = vld [vmem:[%s1374_s9] sm:$0xff] }
 0x42e   : > { %1099 = vrcp.f32 %v689_v55  ;;  %v909_v55 = vld [vmem:[%s1374_s9 + $0x8] sm:$0xff] }
 0x434   : > { %v1100_v60 = vpop.eup %1099 }
 0x435   : > { %v691_v61 = vmul.f32 %v1100_v60, %v1094_v47 }
 0x440   : > { %v581_v57 = vpop.permute.xlu0 %580 }
 0x441   : > { %601 = vmatpush.msrb.mxu2 %v581_v57  ;;  %v1083_v57 = vld [vmem:[%s1373_s8] ss:$0 sm:$0xff] }
 0x442   : > { %782 = vrot.lane.b32.xlu2 %v1234_v7, %s1127_s22  ;;  %1044 = vmatmul.msk.f32.vlgmr.msrb.gmra.mxu2 %vm477_vm1, %v579_v58  ;;  %v445_v7 = vld [vmem:[%s1368_s3 + $0x18] sm:$0xff] }
 0x443   : > { %713 = vmatpush.msra.mxu2 %v693_v59 }
 0x445   : > { %826 = vmatpush.msrb.mxu2 %v445_v7 }
 0x44a   : > { %1049 = vmatmul.msk.f32.vlgmr.msra.gmra.mxu2 %vm477_vm1, %v691_v61  ;;  %v1084_v61 = vld [vmem:[%s1375_s10] ss:$0 sm:$0xff] }
 0x49d   : > { %v779_v62 = vpop.xlane.xlu2 %778 }
 0x49e   : > { %1101 = vrcp.f32 %v779_v62 }
 0x49f   : > { %1103 = vrcp.f32 %v1128_v19  ;;  %v1086_v19 = vld [vmem:[%s1377_s12] ss:$0 sm:$0xff] }
 0x4a4   : > { %v1102_v63 = vpop.eup %1101 }
 0x4a5   : > { %v781_v0 = vmul.f32 %v1102_v63, %v1096_v52  ;;  %v783_v1 = vpop.permute.xlu2 %782  ;;  %v1104_v20 = vpop.eup %1103 }
 0x4a6   : > { %803 = vmatpush.msrb.mxu0 %v783_v1  ;;  %v843_v21 = vmul.f32 32.0, %v1104_v20  ;;  %vm847_vm2 = vweird.f32 %v1104_v20 }
 0x4a7   : > { %1053 = vmatmul.msk.f32.vlgmr.msrb.gmra.mxu0 %vm477_vm1, %v781_v0 }
 0x4a8   : > { %v844_v22 = vsub.f32 1.0, %v843_v21 }
 0x4aa   : > { %v845_v23 = vmul.f32 %v1104_v20, %v844_v22 }
 0x4ac   : > { %v846_v24 = vadd.f32 %v1104_v20, %v845_v23 }
 0x4ae   : > { %v1292_v25 = vsel %vm847_vm2, %v1104_v20, %v846_v24 }
 0x4c5   : > { %v603_v5 = vpop.f32.mrf.mxu2 }
 0x4c6   : > { %1045 = vmatmul.msk.f32.vlgmr.msrb.gmra.mxu1 %vm477_vm1, %v603_v5 }
 0x4c7   : > { %899 = vmatpush.msrb.mxu1 %v879_v30 }
 0x4c9   : > { %900 = vmatpush.msrb.mxu1 %v878_v31 }
 0x4cb   : > { %901 = vmatpush.msrb.mxu1 %v877_v32 }
 0x4cd   : > { %v715_v6 = vpop.f32.mrf.mxu2  ;;  %902 = vmatpush.msrb.mxu1 %v876_v33 }
 0x4ce   : > { %1050 = vmatmul.msk.f32.vlgmr.msra.gmra.mxu1 %vm477_vm1, %v715_v6 }
 0x524   : > { %v805_v8 = vpop.f32.mrf.mxu0 }
 0x525   : > { %1054 = vmatmul.msk.f32.vlgmr.msrb.gmra.mxu2 %vm477_vm1, %v805_v8 }
 0x543   : > { %v626_v9 = vpop.f32.mrf.mxu1 }
 0x544   : > { %v650_v11 = vadd.f32 %v1263_v36, %v626_v9  ;;  %v913_v36 = vld [vmem:[%s1374_s9 + $0x28] sm:$0xff] }
 0x545   : > { %934 = vmatpush.msra.mxu3 %v913_v36 }
 0x547   : > { %935 = vmatpush.msra.mxu3 %v912_v39 }
 0x549   : > { %936 = vmatpush.msra.mxu3 %v911_v41 }
 0x54b   : > { %v738_v10 = vpop.f32.mrf.mxu1  ;;  %937 = vmatpush.msra.mxu3 %v910_v54 }
 0x54c   : > { %v741_v12 = vadd.f32 %v738_v10, %v650_v11 }
 0x54d   : > { %938 = vmatpush.msra.mxu3 %v909_v55 }
 0x54f   : > { %939 = vmatpush.msra.mxu3 %v908_v56 }
 0x5a8   : > { %v828_v14 = vpop.f32.mrf.mxu2 }
 0x5a9   : > { %v831_v15 = vadd.f32 %v828_v14, %v741_v12 }
 0x5ab   : > { %v835_v16 = vadd.f32 %v1080_v13, %v831_v15 }
 0x5ad   : > { %v836_v17 = vadd.f32 %v835_v16, %v1227_v4 }
 0x5af   : > { %v839_v18 = vsel %vm450_vm0, %v836_v17, 0.0 }
 0x5b0   : > { %840 = vadd.xlane.f32.xlu0 %v839_v18 }
 0x623   : > { %v841_v26 = vpop.xlane.xlu0 %840 }
 0x624   : > { %v849_v27 = vmul.f32 %v1292_v25, %v841_v26 }
 0x626   : > { %v850_v28 = vsub.f32 %v836_v17, %v849_v27  ;;  %v1085_v17 = vld [vmem:[%s1376_s11] ss:$0 sm:$0xff] }
 0x628   : > { %v851_v29 = vmul.f32 %v850_v28, %v850_v28 }
 0x62a   : > { %v852_v4 = vsel %vm450_vm0, %v851_v29, 0.0 }
 0x62b   : > { %853 = vadd.xlane.f32.xlu1 %v852_v4 }
 0x69e   : > { %v854_v37 = vpop.xlane.xlu1 %853 }
 0x69f   : > { %v855_v38 = vmul.f32 %v854_v37, %v1292_v25 }
 0x6a1   : > { %v856_v40 = vadd.f32 1e-05, %v855_v38 }
 0x6a3   : > { %1105 = vrsqrt.f32 %v856_v40  ;;  %vm863_vm4 = vweird.f32 %v856_v40 }
 0x6a9   : > { %v1106_v42 = vpop.eup %1105 }
 0x6aa   : > { %v858_v43 = vmul.f32 %v1106_v42, %v856_v40  ;;  %vm864_vm3 = vweird.f32 %v1106_v42 }
 0x6ab   : > { %vm865_vm5 = vmor %vm863_vm4, %vm864_vm3 }
 0x6ac   : > { %v859_v44 = vmul.f32 %v1106_v42, %v858_v43 }
 0x6ae   : > { %v860_v45 = vmul.f32 0.5, %v859_v44 }
 0x6b0   : > { %v861_v46 = vsub.f32 1.5, %v860_v45 }
 0x6b2   : > { %v862_v47 = vmul.f32 %v1106_v42, %v861_v46 }
 0x6b4   : > { %v866_v49 = vsel %vm865_vm5, %v1106_v42, %v862_v47 }
 0x6b5   : > { %v867_v50 = vmul.f32 %v866_v49, %v850_v28 }
 0x6b7   : > { %v871_v52 = vmul.f32 %v1081_v48, %v867_v50 }
 0x6b9   : > { %v875_v53 = vadd.f32 %v1082_v51, %v871_v52 }
 0x6bb   : > { %1055 = vmatmul.msk.f32.vlgmr.msrb.gmra.mxu1 %vm450_vm0, %v875_v53 }
 0x738   : > { %v904_v58 = vpop.f32.mrf.mxu1 }
 0x739   : > { %v905_v59 = vadd.f32 %v1083_v57, %v904_v58 }
 0x73b   : > { %v907_v60 = vmax.f32 %v905_v59, 0.0 }
 0x73d   : > { %1056 = vmatmul.msk.f32.vlgmr.msra.gmra.mxu3 %vm920_vm6, %v907_v60 }
 0x7c0   : > { %v941_v62 = vpop.f32.mrf.mxu3 }
 0x7c1   : > { %v942_v63 = vadd.f32 %v1084_v61, %v941_v62 }
 0x7c3   : > { %v944_v0 = vadd.f32 %v942_v63, %v875_v53 }
 0x7c5   : > { %v947_v1 = vsel %vm450_vm0, %v944_v0, 0.0 }
 0x7c6   : > { %948 = vadd.xlane.f32.xlu2 %v947_v1 }
 0x839   : > { %v949_v2 = vpop.xlane.xlu2 %948 }
 0x83a   : > { %v950_v3 = vmul.f32 %v949_v2, %v1292_v25 }
 0x83c   : > { %v951_v5 = vsub.f32 %v944_v0, %v950_v3 }
 0x83e   : > { %v952_v6 = vmul.f32 %v951_v5, %v951_v5 }
 0x840   : > { %v953_v7 = vsel %vm450_vm0, %v952_v6, 0.0 }
 0x841   : > { %954 = vadd.xlane.f32.xlu0 %v953_v7 }
 0x8b4   : > { %v955_v8 = vpop.xlane.xlu0 %954 }
 0x8b5   : > { %v956_v9 = vmul.f32 %v955_v8, %v1292_v25 }
 0x8b7   : > { %v957_v10 = vadd.f32 1e-05, %v956_v9 }
 0x8b9   : > { %1107 = vrsqrt.f32 %v957_v10  ;;  %vm964_vm8 = vweird.f32 %v957_v10 }
 0x8bf   : > { %v1108_v11 = vpop.eup %1107 }
 0x8c0   : > { %v959_v12 = vmul.f32 %v1108_v11, %v957_v10  ;;  %vm965_vm7 = vweird.f32 %v1108_v11 }
 0x8c1   : > { %vm966_vm9 = vmor %vm964_vm8, %vm965_vm7 }
 0x8c2   : > { %v960_v13 = vmul.f32 %v1108_v11, %v959_v12 }
 0x8c4   : > { %v961_v14 = vmul.f32 0.5, %v960_v13 }
 0x8c6   : > { %v962_v15 = vsub.f32 1.5, %v961_v14 }
 0x8c8   : > { %v963_v16 = vmul.f32 %v1108_v11, %v962_v15 }
 0x8ca   : > { %v967_v18 = vsel %vm966_vm9, %v1108_v11, %v963_v16 }
 0x8cb   : > { %v968_v20 = vmul.f32 %v967_v18, %v951_v5 }
 0x8cd   : > { %v972_v21 = vmul.f32 %v1085_v17, %v968_v20 }
 0x8cf   : > { %v976_v22 = vadd.f32 %v1086_v19, %v972_v21 }
 0x8d1   : > { %977 = vst.msk [vmem:[%s435_s29] sm:$0xff] %vm450_vm0, %v976_v22 }
 0x8d2 PF: > { %s23_s25 = sadd.s32 1, %s1115_s25  }
 0x8d3   : > { %p20_p4 = scmp.ge.s32.totalorder %s23_s25, 4  }
 0x8d5   :  { %22 = sbr.rel (!%p20_p4) target bundleno = 1 (0x1), region = 102 }

// kernel: transformer_model_forward.9
= control target key start
LH: loop header
LB: loop body
LE: loop exit
PB: predicated region body
PF: predicated region fallthrough
CT: control target
= control target key end

     0   :  { %s1299_s18 = smov 0   ;;  %s1475_s0 = inlined_call_operand.vmem [shape: f32[2,8,32], index: 0, kind: input, shape index: {}]   ;;  %s1476_s1 = inlined_call_operand.vmem [shape: f32[32,96], index: 1, kind: input, shape index: {}]   ;;  %s1477_s2 = inlined_call_operand.vmem [shape: f32[1,96], index: 2, kind: input, shape index: {}]   ;;  %s1478_s3 = inlined_call_operand.vmem [shape: f32[32,32], index: 3, kind: input, shape index: {}]   ;;  %s1479_s4 = inlined_call_operand.vmem [shape: f32[1,32], index: 4, kind: input, shape index: {}]   ;;  %s1480_s5 = inlined_call_operand.vmem [shape: f32[1,32], index: 5, kind: input, shape index: {}]   ;;  %s1481_s6 = inlined_call_operand.vmem [shape: f32[1,32], index: 6, kind: input, shape index: {}]   ;;  %s1482_s7 = inlined_call_operand.vmem [shape: f32[32,64], index: 7, kind: input, shape index: {}]   ;;  %s1483_s8 = inlined_call_operand.vmem [shape: f32[1,64], index: 8, kind: input, shape index: {}]   ;;  %s1484_s9 = inlined_call_operand.vmem [shape: f32[64,32], index: 9, kind: input, shape index: {}]   ;;  %s1485_s10 = inlined_call_operand.vmem [shape: f32[1,32], index: 10, kind: input, shape index: {}]   ;;  %s1486_s11 = inlined_call_operand.vmem [shape: f32[1,32], index: 11, kind: input, shape index: {}]   ;;  %s1487_s12 = inlined_call_operand.vmem [shape: f32[1,32], index: 12, kind: input, shape index: {}]   ;;  %s1488_s13 = inlined_call_operand.vmem [shape: f32[1,32], index: 13, kind: input, shape index: {}]   ;;  %s1489_s14 = inlined_call_operand.vmem [shape: f32[1,32], index: 14, kind: input, shape index: {}]   ;;  %s1490_s15 = inlined_call_operand.vmem [shape: f32[2,8,32], index: 15, kind: output, shape index: {}]  }
   0x1 LB: > { %s1117_s19 = sadd.s32 4294967295, %s1205_s18   ;;  %p1121_p0 = scmp.ge.s32.totalorder %s1205_s18, 1  ;;  %s1205_s18 = sphi %s1299_s18, %s25_s18  }
   0x2   : > { %p436_p1 = scmp.lt.s32.totalorder %s1205_s18, 3 }
   0x4   : > { %p437_p2 = pnand %p1121_p0, %p436_p1 }
   0x5   : > { %p482_p3 = scmp.lt.s32.totalorder (!%p437_p2), %s1117_s19, 1  ;;  %s1207_s21 = smov (!%p437_p2), 88  }
   0x6   : > { %440 = sbr.rel (%p437_p2) target bundleno = 2526 (0x9de), region = 80  ;;  %s1208_s22 = smov (!%p437_p2), 96  }
   0x7   : > { %s1209_s23 = smov (!%p437_p2), 120   ;;  %s1210_s24 = smov (!%p437_p2), 72  }
   0x8   : > { %s1211_s25 = smov (!%p437_p2), 104   ;;  %s1212_s26 = smov (!%p437_p2), 80  }
   0x9   : > { %s1213_s30 = smov (!%p437_p2), 64   ;;  %s1215_s17 = smov (!%p437_p2), 48  }
   0xa   : > { %s1216_s20 = smov (!%p437_p2), 56  }
   0xb   : > { %v494_v0 = vld [vmem:[%s1476_s1 + $0x18] sm:$0xff]  ;;  %v493_v1 = vld [vmem:[%s1476_s1 + $0x10] sm:$0xff]  ;;  %v492_v2 = vld [vmem:[%s1476_s1 + $0x8] sm:$0xff]  ;;  %s1492_s19 = smov (!%p482_p3, %s1117_s19), 1  ;;  %vm504_vm0 = vcmask 261120   ;;  %vm531_vm1 = vcmask 64512  }
   0xc   : > { %520 = vmatpush.msra.mxu0 %v494_v0  ;;  %v491_v3 = vld [vmem:[%s1476_s1] sm:$0xff]  ;;  %s1122_s28 = sshll.u32 %s1492_s19, 3  ;;  %vm974_vm6 = vcmask 523264  }
   0xd   : > { %s485_s16 = scalar_lea.vmem %s1475_s0, %s1122_s28  ;;  %v1165_v5 = vld [vmem:[%s1477_s2] ss:$0 sm:$0xff] }
   0xe   : > { %521 = vmatpush.msra.mxu0 %v493_v1  ;;  %v1327_v4 = vld [vmem:[%s485_s16] sm:$0xff]  ;;  %s1214_s16 = smov 112  }
   0xf   : > { %v496_v8 = vld [vmem:[%s1478_s3] sm:$0xff] }
  0x10   : > { %522 = vmatpush.msra.mxu0 %v492_v2  ;;  %701 = vmatpush.msra.mxu3 %v496_v8  ;;  %v497_v2 = vld [vmem:[%s1478_s3 + $0x8] sm:$0xff] }
  0x12   : > { %523 = vmatpush.msra.mxu0 %v491_v3  ;;  %v498_v3 = vld [vmem:[%s1478_s3 + $0x10] sm:$0xff] }
  0x13   : > { %1124 = vmatmul.msk.f32.vlgmr.msra.gmra.mxu0 %vm504_vm0, %v1327_v4 }
  0x90   : > { %v525_v6 = vpop.f32.mrf.mxu0 }
  0x91   : > { %v1334_v7 = vadd.f32 %v1165_v5, %v525_v6 }
  0x93   : > { %596 = vrot.lane.b32.xlu2 %v1334_v7, %s1207_s21  ;;  %529 = vrot.lane.b32.xlu0 %v1334_v7, %s1208_s22  ;;  %s1217_s21 = smov 40  }
  0x9b   : > { %594 = vrot.lane.b32.xlu2 %v1334_v7, %s1209_s23 }
  0xa3   : > { %798 = vrot.lane.b32.xlu2 %v1334_v7, %s1210_s24  ;;  %s489_s24 = scalar_lea.vmem %s1490_s15, %s1122_s28 }
  0xab   : > { %796 = vrot.lane.b32.xlu2 %v1334_v7, %s1211_s25 }
  0xb3   : > { %708 = vrot.lane.b32.xlu2 %v1334_v7, %s1212_s26 }
  0xed   : > { %v597_v9 = vpop.permute.xlu2 %596 }
  0xee   : > { %1128 = vmatpush.xpose.msk.msrb.mxu0 %vm531_vm1, %v597_v9 }
  0xf5   : > { %v595_v10 = vpop.permute.xlu2 %594 }
  0xf6   : > { %1129 = vmatmul.msk.f32.vlgmr.msrb.gmra.mxu0 %vm531_vm1, %v595_v10 }
  0xfd   : > { %v799_v11 = vpop.permute.xlu2 %798 }
  0xfe   : > { %1137 = vmatpush.xpose.msk.msrb.mxu3 %vm531_vm1, %v799_v11 }
 0x105   : > { %v797_v12 = vpop.permute.xlu2 %796  ;;  %v530_v13 = vpop.permute.xlu0 %529 }
 0x106   : > { %1125 = vmatpush.xpose.msk.msra.mxu1 %vm531_vm1, %v530_v13  ;;  %v1166_v13 = vld [vmem:[%s1479_s4] ss:$0 sm:$0xff] }
 0x109   : > { %1126 = vmatmul.msk.f32.vlgmr.msra.gmra.mxu1 %vm531_vm1, %v1334_v7 }
 0x10a   : > { %678 = vmatpush.msrb.mxu1 %v497_v2 }
 0x10c   : > { %790 = vmatpush.msra.mxu1 %v498_v3 }
 0x10d   : > { %v709_v14 = vpop.permute.xlu2 %708 }
 0x10e   : > { %1133 = vmatpush.xpose.msk.msra.mxu0 %vm531_vm1, %v709_v14 }
 0x173   : > { %v619_v15 = vpop.f32.mrf.mxu0 }
 0x174   : > { %v622_v16 = vmul.f32 0.35355338, %v619_v15 }
 0x176   : > { %v623_v17 = vsel %vm531_vm1, %v622_v16, -inf }
 0x177   : > { %624 = vmax.xlane.f32.xlu2 %v623_v17 }
 0x186   : > { %v553_v18 = vpop.f32.mrf.mxu1 }
 0x187   : > { %v556_v19 = vmul.f32 0.35355338, %v553_v18 }
 0x189   : > { %v557_v20 = vsel %vm531_vm1, %v556_v19, -inf }
 0x18a   : > { %558 = vmax.xlane.f32.xlu0 %v557_v20 }
 0x1ea   : > { %v625_v35 = vpop.xlane.xlu2 %624 }
 0x1eb   : > { %v626_v37 = vsub.f32 %v622_v16, %v625_v35  ;;  %v968_v35 = vld [vmem:[%s1484_s9 + $0x30] sm:$0xff] }
 0x1ed   : > { %v627_v38 = vmul.f32 1.442695, %v626_v37 }
 0x1fd   : > { %v559_v21 = vpop.xlane.xlu0 %558 }
 0x1fe   : > { %v560_v22 = vsub.f32 %v556_v19, %v559_v21  ;;  %v1218_v19 = vmov 32.0  }
 0x200   : > { %v561_v23 = vmul.f32 1.442695, %v560_v22 }
 0x202   : > { %1175 = vpow2.f32 %v561_v23 }
 0x208   : > { %v1176_v24 = vpop.eup %1175 }
 0x209   : > { %v563_v25 = vsel %vm531_vm1, %v1176_v24, 0.0 }
 0x20a   : > { %564 = vadd.xlane.f32.xlu1 %v563_v25 }
 0x223   : > { %568 = vrot.lane.b32.xlu1 %v1334_v7, %s1213_s30 }
 0x22b   : > { %706 = vrot.lane.b32.xlu1 %v1334_v7, %s1214_s16 }
 0x27d   : > { %v565_v26 = vpop.xlane.xlu1 %564 }
 0x27e   : > { %1177 = vrcp.f32 %v565_v26 }
 0x27f   : > { %1179 = vpow2.f32 %v627_v38 }
 0x284   : > { %v1178_v27 = vpop.eup %1177 }
 0x285   : > { %v567_v29 = vmul.f32 %v1178_v27, %v1176_v24  ;;  %v1180_v45 = vpop.eup %1179 }
 0x286   : > { %v629_v46 = vsel %vm531_vm1, %v1180_v45, 0.0 }
 0x295   : > { %v569_v28 = vpop.permute.xlu1 %568 }
 0x296   : > { %589 = vmatpush.msra.mxu2 %v569_v28 }
 0x297   : > { %1127 = vmatmul.msk.f32.vlgmr.msra.gmra.mxu2 %vm531_vm1, %v567_v29 }
 0x29d   : > { %v707_v30 = vpop.permute.xlu1 %706 }
 0x29e   : > { %1134 = vmatmul.msk.f32.vlgmr.msra.gmra.mxu0 %vm531_vm1, %v707_v30  ;;  %v933_v30 = vld [vmem:[%s1482_s7 + $0x18] sm:$0xff] }
 0x31a   : > { %v591_v31 = vpop.f32.mrf.mxu2 }
 0x31b   : > { %1132 = vmatmul.msk.f32.vlgmr.msra.gmra.mxu3 %vm531_vm1, %v591_v31  ;;  %v731_v32 = vpop.f32.mrf.mxu0  ;;  %v932_v31 = vld [vmem:[%s1482_s7 + $0x10] sm:$0xff] }
 0x31c   : > { %v734_v33 = vmul.f32 0.35355338, %v731_v32  ;;  %v931_v32 = vld [vmem:[%s1482_s7 + $0x8] sm:$0xff] }
 0x31e   : > { %v735_v34 = vsel %vm531_vm1, %v734_v33, -inf }
 0x31f   : > { %736 = vmax.xlane.f32.xlu1 %v735_v34  ;;  %v969_v34 = vld [vmem:[%s1484_s9 + $0x38] sm:$0xff] }
 0x320   : > { %986 = vmatpush.msra.mxu3 %v969_v34 }
 0x322   : > { %987 = vmatpush.msra.mxu3 %v968_v35 }
 0x323   : > { %1138 = vmatmul.msk.f32.vlgmr.msrb.gmra.mxu3 %vm531_vm1, %v797_v12 }
 0x338   : > { %746 = vrot.lane.b32.xlu1 %v1334_v7, %s1215_s17 }
 0x392   : > { %v737_v39 = vpop.xlane.xlu1 %736 }
 0x393   : > { %v738_v42 = vsub.f32 %v734_v33, %v737_v39  ;;  %v930_v33 = vld [vmem:[%s1482_s7] sm:$0xff] }
 0x394   : > { %v966_v39 = vld [vmem:[%s1484_s9 + $0x20] sm:$0xff] }
 0x395   : > { %v739_v44 = vmul.f32 1.442695, %v738_v42 }
 0x397   : > { %1181 = vpow2.f32 %v739_v44 }
 0x39d   : > { %v1182_v47 = vpop.eup %1181 }
 0x39e   : > { %v1363_v36 = vpop.f32.mrf.mxu3  ;;  %v741_v48 = vsel %vm531_vm1, %v1182_v47, 0.0 }
 0x3a6   : > { %v821_v40 = vpop.f32.mrf.mxu3 }
 0x3a7   : > { %v824_v41 = vmul.f32 0.35355338, %v821_v40 }
 0x3a9   : > { %v825_v43 = vsel %vm531_vm1, %v824_v41, -inf }
 0x3aa   : > { %826 = vmax.xlane.f32.xlu0 %v825_v43  ;;  %v747_v59 = vpop.permute.xlu1 %746 }
 0x3b2   : > { %630 = vadd.xlane.f32.xlu0 %v629_v46 }
 0x3ba   : > { %742 = vadd.xlane.f32.xlu0 %v741_v48  ;;  %v1167_v48 = vld [vmem:[%s1480_s5] ss:$0 sm:$0xff] }
 0x3ce   : > { %634 = vrot.lane.b32.xlu0 %v1334_v7, %s1216_s20 }
 0x41d   : > { %v827_v49 = vpop.xlane.xlu0 %826 }
 0x41e   : > { %v828_v50 = vsub.f32 %v824_v41, %v827_v49  ;;  %v965_v41 = vld [vmem:[%s1484_s9 + $0x18] sm:$0xff] }
 0x420   : > { %v829_v51 = vmul.f32 1.442695, %v828_v50 }
 0x422   : > { %1183 = vpow2.f32 %v829_v51  ;;  %v1168_v51 = vld [vmem:[%s1481_s6] ss:$0 sm:$0xff] }
 0x425   : > { %v631_v54 = vpop.xlane.xlu0 %630 }
 0x426   : > { %1185 = vrcp.f32 %v631_v54  ;;  %v964_v54 = vld [vmem:[%s1484_s9 + $0x10] sm:$0xff] }
 0x428   : > { %v1184_v52 = vpop.eup %1183 }
 0x429   : > { %v831_v53 = vsel %vm531_vm1, %v1184_v52, 0.0 }
 0x42a   : > { %832 = vadd.xlane.f32.xlu2 %v831_v53 }
 0x42c   : > { %v1186_v56 = vpop.eup %1185 }
 0x42d   : > { %v743_v55 = vpop.xlane.xlu0 %742  ;;  %v633_v58 = vmul.f32 %v1186_v56, %v1180_v45  ;;  %v962_v56 = vld [vmem:[%s1484_s9] sm:$0xff] }
 0x42e   : > { %1187 = vrcp.f32 %v743_v55  ;;  %v963_v55 = vld [vmem:[%s1484_s9 + $0x8] sm:$0xff] }
 0x434   : > { %v1188_v60 = vpop.eup %1187 }
 0x435   : > { %v745_v61 = vmul.f32 %v1188_v60, %v1182_v47 }
 0x440   : > { %v635_v57 = vpop.permute.xlu0 %634 }
 0x441   : > { %655 = vmatpush.msrb.mxu2 %v635_v57  ;;  %v1169_v57 = vld [vmem:[%s1483_s8] ss:$0 sm:$0xff] }
 0x442   : > { %836 = vrot.lane.b32.xlu2 %v1334_v7, %s1217_s21  ;;  %1130 = vmatmul.msk.f32.vlgmr.msrb.gmra.mxu2 %vm531_vm1, %v633_v58  ;;  %v499_v7 = vld [vmem:[%s1478_s3 + $0x18] sm:$0xff] }
 0x443   : > { %767 = vmatpush.msra.mxu2 %v747_v59 }
 0x445   : > { %880 = vmatpush.msrb.mxu2 %v499_v7 }
 0x44a   : > { %1135 = vmatmul.msk.f32.vlgmr.msra.gmra.mxu2 %vm531_vm1, %v745_v61  ;;  %v1170_v61 = vld [vmem:[%s1485_s10] ss:$0 sm:$0xff] }
 0x49d   : > { %v833_v62 = vpop.xlane.xlu2 %832 }
 0x49e   : > { %1189 = vrcp.f32 %v833_v62 }
 0x49f   : > { %1191 = vrcp.f32 %v1218_v19 }
 0x4a4   : > { %v1190_v63 = vpop.eup %1189 }
 0x4a5   : > { %v835_v0 = vmul.f32 %v1190_v63, %v1184_v52  ;;  %v837_v1 = vpop.permute.xlu2 %836  ;;  %v1192_v20 = vpop.eup %1191 }
 0x4a6   : > { %857 = vmatpush.msrb.mxu0 %v837_v1  ;;  %v897_v21 = vmul.f32 32.0, %v1192_v20  ;;  %vm901_vm2 = vweird.f32 %v1192_v20 }
 0x4a7   : > { %1139 = vmatmul.msk.f32.vlgmr.msrb.gmra.mxu0 %vm531_vm1, %v835_v0 }
 0x4a8   : > { %v898_v22 = vsub.f32 1.0, %v897_v21 }
 0x4aa   : > { %v899_v23 = vmul.f32 %v1192_v20, %v898_v22 }
 0x4ac   : > { %v900_v24 = vadd.f32 %v1192_v20, %v899_v23 }
 0x4ae   : > { %v1392_v25 = vsel %vm901_vm2, %v1192_v20, %v900_v24  ;;  %v1172_v20 = vld [vmem:[%s1487_s12] ss:$0 sm:$0xff] }
 0x4c5   : > { %v657_v5 = vpop.f32.mrf.mxu2 }
 0x4c6   : > { %1131 = vmatmul.msk.f32.vlgmr.msrb.gmra.mxu1 %vm531_vm1, %v657_v5 }
 0x4c7   : > { %953 = vmatpush.msrb.mxu1 %v933_v30 }
 0x4c9   : > { %954 = vmatpush.msrb.mxu1 %v932_v31 }
 0x4cb   : > { %955 = vmatpush.msrb.mxu1 %v931_v32 }
 0x4cd   : > { %v769_v6 = vpop.f32.mrf.mxu2  ;;  %956 = vmatpush.msrb.mxu1 %v930_v33 }
 0x4ce   : > { %1136 = vmatmul.msk.f32.vlgmr.msra.gmra.mxu1 %vm531_vm1, %v769_v6 }
 0x524   : > { %v859_v8 = vpop.f32.mrf.mxu0 }
 0x525   : > { %1140 = vmatmul.msk.f32.vlgmr.msrb.gmra.mxu2 %vm531_vm1, %v859_v8 }
 0x543   : > { %v680_v9 = vpop.f32.mrf.mxu1 }
 0x544   : > { %v704_v11 = vadd.f32 %v1363_v36, %v680_v9  ;;  %v967_v36 = vld [vmem:[%s1484_s9 + $0x28] sm:$0xff] }
 0x545   : > { %988 = vmatpush.msra.mxu3 %v967_v36 }
 0x547   : > { %989 = vmatpush.msra.mxu3 %v966_v39 }
 0x549   : > { %990 = vmatpush.msra.mxu3 %v965_v41 }
 0x54b   : > { %v792_v10 = vpop.f32.mrf.mxu1  ;;  %991 = vmatpush.msra.mxu3 %v964_v54 }
 0x54c   : > { %v795_v12 = vadd.f32 %v792_v10, %v704_v11 }
 0x54d   : > { %992 = vmatpush.msra.mxu3 %v963_v55 }
 0x54f   : > { %993 = vmatpush.msra.mxu3 %v962_v56 }
 0x5a8   : > { %v882_v14 = vpop.f32.mrf.mxu2 }
 0x5a9   : > { %v885_v15 = vadd.f32 %v882_v14, %v795_v12 }
 0x5ab   : > { %v889_v16 = vadd.f32 %v1166_v13, %v885_v15 }
 0x5ad   : > { %v890_v17 = vadd.f32 %v889_v16, %v1327_v4 }
 0x5af   : > { %v893_v18 = vsel %vm504_vm0, %v890_v17, 0.0 }
 0x5b0   : > { %894 = vadd.xlane.f32.xlu0 %v893_v18 }
 0x623   : > { %v895_v26 = vpop.xlane.xlu0 %894 }
 0x624   : > { %v903_v27 = vmul.f32 %v1392_v25, %v895_v26 }
 0x626   : > { %v904_v28 = vsub.f32 %v890_v17, %v903_v27  ;;  %v1171_v17 = vld [vmem:[%s1486_s11] ss:$0 sm:$0xff] }
 0x628   : > { %v905_v29 = vmul.f32 %v904_v28, %v904_v28 }
 0x62a   : > { %v906_v4 = vsel %vm504_vm0, %v905_v29, 0.0 }
 0x62b   : > { %907 = vadd.xlane.f32.xlu1 %v906_v4 }
 0x69e   : > { %v908_v37 = vpop.xlane.xlu1 %907 }
 0x69f   : > { %v909_v38 = vmul.f32 %v908_v37, %v1392_v25 }
 0x6a1   : > { %v910_v40 = vadd.f32 1e-05, %v909_v38  ;;  %v1173_v38 = vld [vmem:[%s1488_s13] ss:$0 sm:$0xff] }
 0x6a3   : > { %1193 = vrsqrt.f32 %v910_v40  ;;  %vm917_vm4 = vweird.f32 %v910_v40 }
 0x6a9   : > { %v1194_v42 = vpop.eup %1193 }
 0x6aa   : > { %v912_v43 = vmul.f32 %v1194_v42, %v910_v40  ;;  %vm918_vm3 = vweird.f32 %v1194_v42 }
 0x6ab   : > { %vm919_vm5 = vmor %vm917_vm4, %vm918_vm3 }
 0x6ac   : > { %v913_v44 = vmul.f32 %v1194_v42, %v912_v43 }
 0x6ae   : > { %v914_v45 = vmul.f32 0.5, %v913_v44 }
 0x6b0   : > { %v915_v46 = vsub.f32 1.5, %v914_v45 }
 0x6b2   : > { %v916_v47 = vmul.f32 %v1194_v42, %v915_v46 }
 0x6b4   : > { %v920_v49 = vsel %vm919_vm5, %v1194_v42, %v916_v47 }
 0x6b5   : > { %v921_v50 = vmul.f32 %v920_v49, %v904_v28 }
 0x6b7   : > { %v925_v52 = vmul.f32 %v1167_v48, %v921_v50 }
 0x6b9   : > { %v929_v53 = vadd.f32 %v1168_v51, %v925_v52 }
 0x6bb   : > { %1141 = vmatmul.msk.f32.vlgmr.msrb.gmra.mxu1 %vm504_vm0, %v929_v53 }
 0x738   : > { %v958_v58 = vpop.f32.mrf.mxu1 }
 0x739   : > { %v959_v59 = vadd.f32 %v1169_v57, %v958_v58 }
 0x73b   : > { %v961_v60 = vmax.f32 %v959_v59, 0.0 }
 0x73d   : > { %1142 = vmatmul.msk.f32.vlgmr.msra.gmra.mxu3 %vm974_vm6, %v961_v60 }
 0x7c0   : > { %v995_v62 = vpop.f32.mrf.mxu3 }
 0x7c1   : > { %v996_v63 = vadd.f32 %v1170_v61, %v995_v62 }
 0x7c3   : > { %v998_v0 = vadd.f32 %v996_v63, %v929_v53 }
 0x7c5   : > { %v1001_v1 = vsel %vm504_vm0, %v998_v0, 0.0 }
 0x7c6   : > { %1002 = vadd.xlane.f32.xlu2 %v1001_v1 }
 0x839   : > { %v1003_v2 = vpop.xlane.xlu2 %1002 }
 0x83a   : > { %v1004_v3 = vmul.f32 %v1003_v2, %v1392_v25 }
 0x83c   : > { %v1005_v5 = vsub.f32 %v998_v0, %v1004_v3 }
 0x83e   : > { %v1006_v6 = vmul.f32 %v1005_v5, %v1005_v5 }
 0x840   : > { %v1007_v7 = vsel %vm504_vm0, %v1006_v6, 0.0 }
 0x841   : > { %1008 = vadd.xlane.f32.xlu0 %v1007_v7 }
 0x8b4   : > { %v1009_v8 = vpop.xlane.xlu0 %1008 }
 0x8b5   : > { %v1010_v9 = vmul.f32 %v1009_v8, %v1392_v25 }
 0x8b7   : > { %v1011_v10 = vadd.f32 1e-05, %v1010_v9 }
 0x8b9   : > { %1195 = vrsqrt.f32 %v1011_v10  ;;  %vm1018_vm8 = vweird.f32 %v1011_v10 }
 0x8bf   : > { %v1196_v11 = vpop.eup %1195 }
 0x8c0   : > { %v1013_v12 = vmul.f32 %v1196_v11, %v1011_v10  ;;  %vm1019_vm7 = vweird.f32 %v1196_v11 }
 0x8c1   : > { %vm1020_vm9 = vmor %vm1018_vm8, %vm1019_vm7 }
 0x8c2   : > { %v1014_v13 = vmul.f32 %v1196_v11, %v1013_v12 }
 0x8c4   : > { %v1015_v14 = vmul.f32 0.5, %v1014_v13 }
 0x8c6   : > { %v1016_v15 = vsub.f32 1.5, %v1015_v14 }
 0x8c8   : > { %v1017_v16 = vmul.f32 %v1196_v11, %v1016_v15 }
 0x8ca   : > { %v1021_v18 = vsel %vm1020_vm9, %v1196_v11, %v1017_v16 }
 0x8cb   : > { %v1022_v19 = vmul.f32 %v1021_v18, %v1005_v5 }
 0x8cd   : > { %v1026_v21 = vmul.f32 %v1171_v17, %v1022_v19 }
 0x8cf   : > { %v1030_v22 = vadd.f32 %v1172_v20, %v1026_v21 }
 0x8d1   : > { %v1033_v23 = vsel %vm504_vm0, %v1030_v22, 0.0 }
 0x8d2   : > { %1034 = vadd.xlane.f32.xlu0 %v1033_v23 }
 0x945   : > { %v1035_v24 = vpop.xlane.xlu0 %1034 }
 0x946   : > { %v1036_v26 = vmul.f32 %v1035_v24, %v1392_v25 }
 0x948   : > { %v1037_v27 = vsub.f32 %v1030_v22, %v1036_v26 }
 0x94a   : > { %v1038_v28 = vmul.f32 %v1037_v27, %v1037_v27 }
 0x94c   : > { %v1039_v29 = vsel %vm504_vm0, %v1038_v28, 0.0 }
 0x94d   : > { %1040 = vadd.xlane.f32.xlu1 %v1039_v29 }
 0x9c0   : > { %v1041_v4 = vpop.xlane.xlu1 %1040 }
 0x9c1   : > { %v1042_v30 = vmul.f32 %v1041_v4, %v1392_v25  ;;  %v1174_v25 = vld [vmem:[%s1489_s14] ss:$0 sm:$0xff] }
 0x9c3   : > { %v1043_v31 = vadd.f32 1e-05, %v1042_v30 }
 0x9c5   : > { %1197 = vrsqrt.f32 %v1043_v31  ;;  %vm1050_vm11 = vweird.f32 %v1043_v31 }
 0x9cb   : > { %v1198_v32 = vpop.eup %1197 }
 0x9cc   : > { %v1045_v33 = vmul.f32 %v1198_v32, %v1043_v31  ;;  %vm1051_vm10 = vweird.f32 %v1198_v32 }
 0x9cd   : > { %vm1052_vm12 = vmor %vm1050_vm11, %vm1051_vm10 }
 0x9ce   : > { %v1046_v34 = vmul.f32 %v1198_v32, %v1045_v33 }
 0x9d0   : > { %v1047_v35 = vmul.f32 0.5, %v1046_v34 }
 0x9d2   : > { %v1048_v36 = vsub.f32 1.5, %v1047_v35 }
 0x9d4   : > { %v1049_v37 = vmul.f32 %v1198_v32, %v1048_v36 }
 0x9d6   : > { %v1053_v39 = vsel %vm1052_vm12, %v1198_v32, %v1049_v37 }
 0x9d7   : > { %v1054_v40 = vmul.f32 %v1053_v39, %v1037_v27 }
 0x9d9   : > { %v1058_v41 = vmul.f32 %v1173_v38, %v1054_v40 }
 0x9db   : > { %v1062_v42 = vadd.f32 %v1174_v25, %v1058_v41 }
 0x9dd   : > { %1063 = vst.msk [vmem:[%s489_s24] sm:$0xff] %vm504_vm0, %v1062_v42 }
 0x9de PF: > { %s25_s18 = sadd.s32 1, %s1205_s18  }
 0x9df   : > { %p22_p4 = scmp.ge.s32.totalorder %s25_s18, 4  }
 0x9e1   :  { %24 = sbr.rel (!%p22_p4) target bundleno = 1 (0x1), region = 110 }

// kernel: transformer_model_forward.10
= control target key start
LH: loop header
LB: loop body
LE: loop exit
PB: predicated region body
PF: predicated region fallthrough
CT: control target
= control target key end

     0   :  { %s2852_s0 = inlined_call_operand.vmem [shape: f32[2,8,32], index: 0, kind: input, shape index: {}]   ;;  %s2853_s1 = inlined_call_operand.vmem [shape: f32[2,8,32], index: 1, kind: input, shape index: {}]   ;;  %s2854_s2 = inlined_call_operand.vmem [shape: f32[8,8], index: 2, kind: input, shape index: {}]   ;;  %s2855_s3 = inlined_call_operand.vmem [shape: f32[32,96], index: 3, kind: input, shape index: {}]   ;;  %s2856_s4 = inlined_call_operand.vmem [shape: f32[1,96], index: 4, kind: input, shape index: {}]   ;;  %s2857_s5 = inlined_call_operand.vmem [shape: f32[32,32], index: 5, kind: input, shape index: {}]   ;;  %s2858_s6 = inlined_call_operand.vmem [shape: f32[1,32], index: 6, kind: input, shape index: {}]   ;;  %s2859_s7 = inlined_call_operand.vmem [shape: f32[1,32], index: 7, kind: input, shape index: {}]   ;;  %s2860_s8 = inlined_call_operand.vmem [shape: f32[1,32], index: 8, kind: input, shape index: {}]   ;;  %s2861_s9 = inlined_call_operand.hbm [shape: f32[32,32], index: 9, kind: input, shape index: {}]   ;;  %s2862_s10 = inlined_call_operand.vmem [shape: f32[1,32], index: 10, kind: input, shape index: {}]   ;;  %s2863_s11 = inlined_call_operand.hbm [shape: f32[32,64], index: 11, kind: input, shape index: {}]   ;;  %s2864_s12 = inlined_call_operand.vmem [shape: f32[1,64], index: 12, kind: input, shape index: {}]   ;;  %s2865_s13 = inlined_call_operand.hbm [shape: f32[32,32], index: 13, kind: input, shape index: {}]   ;;  %s2866_s14 = inlined_call_operand.vmem [shape: f32[1,32], index: 14, kind: input, shape index: {}]   ;;  %s2867_s15 = inlined_call_operand.vmem [shape: f32[1,32], index: 15, kind: input, shape index: {}]   ;;  %s2868_s16 = inlined_call_operand.vmem [shape: f32[1,32], index: 16, kind: input, shape index: {}]   ;;  %s2869_s17 = inlined_call_operand.hbm [shape: f32[32,64], index: 17, kind: input, shape index: {}]   ;;  %s2870_s18 = inlined_call_operand.vmem [shape: f32[1,64], index: 18, kind: input, shape index: {}]   ;;  %s2871_s19 = inlined_call_operand.vmem [shape: f32[64,32], index: 19, kind: input, shape index: {}]   ;;  %s2872_s20 = inlined_call_operand.hbm [shape: f32[1,32], index: 20, kind: input, shape index: {}]   ;;  %s2873_s21 = inlined_call_operand.hbm [shape: f32[1,32], index: 21, kind: input, shape index: {}]   ;;  %s2874_s22 = inlined_call_operand.hbm [shape: f32[1,32], index: 22, kind: input, shape index: {}]   ;;  %s2875_s23 = inlined_call_operand.vmem [shape: f32[2,8,32], index: 23, kind: output, shape index: {}]  }
   0x1   :  { %2879 = sst [smem:[#allocation18_spill]] %s2852_s0 }
   0x2   :  { %2880 = sst [smem:[#allocation19_spill]] %s2853_s1 }
   0x3   :  { %2881 = sst [smem:[#allocation20_spill]] %s2854_s2 }
   0x4   :  { %2882 = sst [smem:[#allocation21_spill]] %s2855_s3 }
   0x5   :  { %2883 = sst [smem:[#allocation22_spill]] %s2856_s4 }
   0x6   :  { %2884 = sst [smem:[#allocation23_spill]] %s2857_s5 }
   0x7   :  { %2885 = sst [smem:[#allocation24_spill]] %s2858_s6 }
   0x8   :  { %2886 = sst [smem:[#allocation25_spill]] %s2859_s7 }
   0x9   :  { %2887 = sst [smem:[#allocation26_spill]] %s2863_s11 }
   0xa   :  { %2888 = sst [smem:[#allocation27_spill]] %s2869_s17 }
   0xb   :  { %2889 = sst [smem:[#allocation28_spill]] %s2873_s21 }
   0xc   :  { %2890 = sst [smem:[#allocation29_spill]] %s2875_s23 }
   0xd   :  { %28 = vsyncpa [#allocation3], 0 }
   0xe   :  { %29 = vsyncpa [#allocation5], 0 }
   0xf   :  { %30 = vsyncpa [#allocation8], 0 }
  0x10   :  { %31 = vsyncpa [#allocation11], 0  ;;  %s2557_s4 = smov 0  }
  0x11 LB: > { %2891 = sst [smem:[#allocation17_spill]] %s2414_s4  ;;  %s2563_s30 = sadd.s32 4294967295, %s2414_s4   ;;  %s2414_s4 = sphi %s2557_s4, %s37_s4  }
  0x12   : > { %p1977_p0 = scmp.ge.s32.totalorder %s2414_s4, 1  ;;  %p561_p1 = scmp.lt.s32.totalorder %s2414_s4, 3 }
  0x13   : > { %p2086_p2 = scmp.eq.s32.totalorder %s2563_s30, 0  ;;  %s2892_s11 = sld [smem:[#allocation26_spill]] }
  0x14   : > { %p2571_p3 = pnand %p1977_p0, %p561_p1  ;;  %s2894_s17 = sld [smem:[#allocation27_spill]] }
  0x15   : > { %s2416_s27 = smov [#allocation4]   ;;  %s2417_s29 = smov [#allocation7]  }
  0x16   : > { %p2064_p4 = pneg %p2571_p3  ;;  %s612_s7 = sshll.u32 %s2416_s27, 4  ;;  %s613_s7 = int_to_ptr.vmem [resolvable:$true] %s612_s7 }
  0x17   : > { %s652_s3 = sshll.u32 %s2417_s29, 4  ;;  %s2896_s21 = sld [smem:[#allocation28_spill]]  ;;  %s653_s3 = int_to_ptr.vmem [resolvable:$true] %s652_s3 }
  0x18   : > { %p2582_p5 = pnand %p2086_p2, %p2064_p4  ;;  %s2418_s26 = smov 128  }
  0x19   : > { %s610_s5 = sshll.u32 %s2892_s11, 4  ;;  %s2419_s2 = smov 8   ;;  %s611_s5 = int_to_ptr.hbm [resolvable:$true] %s610_s5 }
  0x1a   : > { %s650_s6 = sshll.u32 %s2894_s17, 4  ;;  %s2420_s27 = smov [#allocation10]   ;;  %s651_s6 = int_to_ptr.hbm [resolvable:$true] %s650_s6 }
  0x1b   : > { %2070 = dma.hbm_to_vmem [thread:$0]  (!%p2582_p5), %s611_s5, 512, %s613_s7, [#allocation5], %s2418_s26, %s2418_s26, %s2419_s2  }
  0x1c   : > { %2076 = dma.hbm_to_vmem [thread:$0]  (!%p2582_p5), %s651_s6, 512, %s653_s3, [#allocation8], %s2418_s26, %s2418_s26, %s2419_s2  }
  0x1d   : > { %s683_s25 = sshll.u32 %s2896_s21, 4  ;;  %s685_s11 = sshll.u32 %s2420_s27, 4  ;;  %s684_s25 = int_to_ptr.hbm [resolvable:$true] %s683_s25  ;;  %s686_s11 = int_to_ptr.vmem [resolvable:$true] %s685_s11 }
  0x1e   : > { %s593_s29 = sshll.u32 %s2861_s9, 4  ;;  %s627_s21 = sshll.u32 %s2865_s13, 4  ;;  %s594_s29 = int_to_ptr.hbm [resolvable:$true] %s593_s29  ;;  %s628_s21 = int_to_ptr.hbm [resolvable:$true] %s627_s21 }
  0x1f   : > { %2082 = dma.hbm_to_vmem [thread:$0]  (!%p2582_p5), %s684_s25, 16, %s686_s11, [#allocation11]  }
  0x20   : > { %s2421_s23 = smov [#allocation2]   ;;  %s2422_s6 = smov [#allocation6]  }
  0x21   : > { %s595_s5 = sshll.u32 %s2421_s23, 4  ;;  %s629_s17 = sshll.u32 %s2422_s6, 4  ;;  %s596_s5 = int_to_ptr.vmem [resolvable:$true] %s595_s5  ;;  %s630_s17 = int_to_ptr.vmem [resolvable:$true] %s629_s17 }
  0x22   : > { %2067 = dma.hbm_to_vmem [thread:$0]  (!%p2582_p5), %s594_s29, 512, %s596_s5, [#allocation3], %s2418_s26, %s2418_s26, %s2419_s2  }
  0x23   : > { %s671_s3 = sshll.u32 %s2872_s20, 4  ;;  %s695_s27 = sshll.u32 %s2874_s22, 4  ;;  %s672_s3 = int_to_ptr.hbm [resolvable:$true] %s671_s3  ;;  %s696_s27 = int_to_ptr.hbm [resolvable:$true] %s695_s27 }
  0x24   : > { %2073 = dma.hbm_to_vmem [thread:$0]  (!%p2582_p5), %s628_s21, 512, %s630_s17, [#allocation5], %s2418_s26, %s2418_s26, %s2419_s2  }
  0x25   : > { %s2423_s23 = smov [#allocation9]   ;;  %s2424_s29 = smov [#allocation12]  }
  0x26   : > { %s673_s0 = sshll.u32 %s2423_s23, 4  ;;  %s697_s24 = sshll.u32 %s2424_s29, 4  ;;  %s674_s0 = int_to_ptr.vmem [resolvable:$true] %s673_s0  ;;  %s698_s24 = int_to_ptr.vmem [resolvable:$true] %s697_s24 }
  0x27   : > { %2079 = dma.hbm_to_vmem [thread:$0]  (!%p2582_p5), %s672_s3, 16, %s674_s0, [#allocation8]  }
  0x28   : > { %2085 = dma.hbm_to_vmem [thread:$0]  (!%p2582_p5), %s696_s27, 16, %s698_s24, [#allocation11]  }
  0x29   : > { %724 = sbr.rel (%p2571_p3) target bundleno = 3902 (0xf3e), region = 112 }
  0x2e   : > { %2397 = dma.done.wait (%p2086_p2), [#allocation3], 512  }
  0x2f   : > { %2399 = vsyncadd (%p2086_p2), [#allocation3], 4294966784 }
  0x30   : > { %2401 = dma.done.wait (%p2086_p2), [#allocation5], 1024  }
  0x31   : > { %2403 = vsyncadd (%p2086_p2), [#allocation5], 4294966272 }
  0x32   : > { %2405 = dma.done.wait (%p2086_p2), [#allocation8], 528  }
  0x33   : > { %2407 = vsyncadd (%p2086_p2), [#allocation8], 4294966768 }
  0x34   : > { %2409 = dma.done.wait (%p2086_p2), [#allocation11], 32  }
  0x35   : > { %2411 = vsyncadd (%p2086_p2), [#allocation11], 4294967264  ;;  %p821_p6 = scmp.lt.s32.totalorder %s2563_s30, 1  ;;  %s2897_s26 = sld [smem:[#allocation21_spill]]  ;;  %vm849_vm0 = vcmask 261120   ;;  %vm876_vm1 = vcmask 64512  }
  0x36   : > { %s2898_s4 = sld [smem:[#allocation18_spill]]  ;;  %s2425_s29 = smov 88   ;;  %vm1783_vm9 = vcmask 523264  }
  0x37   : > { %s2908_s30 = smov (!%p821_p6, %s2563_s30), 1  ;;  %s2899_s0 = sld [smem:[#allocation22_spill]] }
  0x38   : > { %s2635_s21 = sshll.u32 %s2908_s30, 3  ;;  %s2426_s24 = smov 96  }
  0x39   : > { %s2427_s1 = smov 120   ;;  %s2428_s28 = smov 72  }
  0x3a   : > { %s2429_s2 = smov 104   ;;  %s2430_s5 = smov 80  }
  0x3b   : > { %v838_v0 = vld [vmem:[%s2897_s26 + $0x18] sm:$0xff]  ;;  %v837_v1 = vld [vmem:[%s2897_s26 + $0x10] sm:$0xff]  ;;  %v836_v2 = vld [vmem:[%s2897_s26 + $0x8] sm:$0xff]  ;;  %s2432_s3 = smov 112   ;;  %s2901_s25 = sld [smem:[#allocation23_spill]] }
  0x3c   : > { %s824_s7 = scalar_lea.vmem %s2898_s4, %s2635_s21  ;;  %865 = vmatpush.msra.mxu0 %v838_v0  ;;  %v835_v3 = vld [vmem:[%s2897_s26] sm:$0xff]  ;;  %s2900_s4 = sld [smem:[#allocation20_spill]] }
  0x3d   : > { %v2653_v4 = vld [vmem:[%s824_s7] sm:$0xff]  ;;  %s2431_s7 = smov 64   ;;  %s2433_s27 = smov 48  }
  0x3e   : > { %866 = vmatpush.msra.mxu0 %v837_v1  ;;  %v2129_v5 = vld [vmem:[%s2899_s0] ss:$0 sm:$0xff]  ;;  %s2434_s23 = smov 56   ;;  %s2435_s0 = smov 40  }
  0x40   : > { %867 = vmatpush.msra.mxu0 %v836_v2 }
  0x41   : > { %v840_v28 = vld [vmem:[%s2901_s25] sm:$0xff] }
  0x42   : > { %868 = vmatpush.msra.mxu0 %v835_v3  ;;  %v845_v15 = vld [vmem:[%s2900_s4] sm:$0xff]  ;;  %s2903_s4 = sld [smem:[#allocation19_spill]] }
  0x43   : > { %1997 = vmatmul.msk.f32.vlgmr.msra.gmra.mxu0 %vm849_vm0, %v2653_v4 }
  0xc0   : > { %v870_v6 = vpop.f32.mrf.mxu0 }
  0xc1   : > { %v2660_v7 = vadd.f32 %v2129_v5, %v870_v6 }
  0xc3   : > { %942 = vrot.lane.b32.xlu2 %v2660_v7, %s2425_s29  ;;  %874 = vrot.lane.b32.xlu0 %v2660_v7, %s2426_s24 }
  0xcb   : > { %940 = vrot.lane.b32.xlu2 %v2660_v7, %s2427_s1 }
  0xd3   : > { %1146 = vrot.lane.b32.xlu2 %v2660_v7, %s2428_s28 }
  0xdb   : > { %1144 = vrot.lane.b32.xlu2 %v2660_v7, %s2429_s2 }
  0xe3   : > { %1055 = vrot.lane.b32.xlu2 %v2660_v7, %s2430_s5 }
 0x11d   : > { %v943_v8 = vpop.permute.xlu2 %942 }
 0x125   : > { %v941_v9 = vpop.permute.xlu2 %940 }
 0x12d   : > { %v1147_v10 = vpop.permute.xlu2 %1146 }
 0x135   : > { %v1145_v11 = vpop.permute.xlu2 %1144  ;;  %v875_v12 = vpop.permute.xlu0 %874 }
 0x136   : > { %1998 = vmatpush.xpose.msk.msra.mxu1 %vm876_vm1, %v875_v12  ;;  %v843_v12 = vld [vmem:[%s2901_s25 + $0x18] sm:$0xff] }
 0x139   : > { %1999 = vmatmul.msk.f32.vlgmr.msra.gmra.mxu1 %vm876_vm1, %v2660_v7 }
 0x13d   : > { %v1056_v13 = vpop.permute.xlu2 %1055 }
 0x13e   : > { %2006 = vmatpush.xpose.msk.msrb.mxu0 %vm876_vm1, %v1056_v13 }
 0x1b6   : > { %v898_v14 = vpop.f32.mrf.mxu1 }
 0x1b7   : > { %v901_v16 = vmul.f32 0.35355338, %v898_v14 }
 0x1b9   : > { %v902_v17 = vadd.f32 %v901_v16, %v845_v15 }
 0x1bb   : > { %v903_v18 = vsel %vm876_vm1, %v902_v17, -inf }
 0x1bc   : > { %904 = vmax.xlane.f32.xlu0 %v903_v18 }
 0x22f   : > { %v905_v19 = vpop.xlane.xlu0 %904 }
 0x230   : > { %v906_v20 = vsub.f32 %v902_v17, %v905_v19 }
 0x232   : > { %v907_v21 = vmul.f32 1.442695, %v906_v20 }
 0x234   : > { %2142 = vpow2.f32 %v907_v21 }
 0x23a   : > { %v2143_v22 = vpop.eup %2142 }
 0x23b   : > { %v909_v23 = vsel %vm876_vm1, %v2143_v22, 0.0 }
 0x23c   : > { %910 = vadd.xlane.f32.xlu1 %v909_v23 }
 0x255   : > { %914 = vrot.lane.b32.xlu1 %v2660_v7, %s2431_s7  ;;  %s828_s7 = scalar_lea.vmem %s2903_s4, %s2635_s21 }
 0x25d   : > { %1053 = vrot.lane.b32.xlu1 %v2660_v7, %s2432_s3 }
 0x2af   : > { %v911_v24 = vpop.xlane.xlu1 %910 }
 0x2b0   : > { %2144 = vrcp.f32 %v911_v24  ;;  %v2436_v24 = vmov 32.0  }
 0x2b6   : > { %v2145_v25 = vpop.eup %2144 }
 0x2b7   : > { %v913_v27 = vmul.f32 %v2145_v25, %v2143_v22 }
 0x2c7   : > { %v915_v26 = vpop.permute.xlu1 %914 }
 0x2c8   : > { %935 = vmatpush.msra.mxu3 %v915_v26 }
 0x2c9   : > { %2000 = vmatmul.msk.f32.vlgmr.msra.gmra.mxu3 %vm876_vm1, %v913_v27 }
 0x2ca   : > { %2001 = vmatpush.xpose.msk.msrb.mxu3 %vm876_vm1, %v943_v8 }
 0x2ce   : > { %1048 = vmatpush.msra.mxu3 %v840_v28 }
 0x2cf   : > { %v1054_v29 = vpop.permute.xlu1 %1053 }
 0x2d0   : > { %2007 = vmatmul.msk.f32.vlgmr.msrb.gmra.mxu0 %vm876_vm1, %v1054_v29 }
 0x2d1   : > { %2002 = vmatmul.msk.f32.vlgmr.msrb.gmra.mxu3 %vm876_vm1, %v941_v9  ;;  %v841_v9 = vld [vmem:[%s2901_s25 + $0x8] sm:$0xff] }
 0x2d2   : > { %2010 = vmatpush.xpose.msk.msrb.mxu3 %vm876_vm1, %v1147_v10  ;;  %1025 = vmatpush.msrb.mxu1 %v841_v9 }
 0x34c   : > { %v937_v30 = vpop.f32.mrf.mxu3 }
 0x34d   : > { %2005 = vmatmul.msk.f32.vlgmr.msra.gmra.mxu3 %vm876_vm1, %v937_v30  ;;  %v1078_v31 = vpop.f32.mrf.mxu0 }
 0x34e   : > { %v1081_v32 = vmul.f32 0.35355338, %v1078_v31 }
 0x350   : > { %v1082_v33 = vadd.f32 %v1081_v32, %v845_v15 }
 0x352   : > { %v1083_v34 = vsel %vm876_vm1, %v1082_v33, -inf }
 0x353   : > { %1084 = vmax.xlane.f32.xlu1 %v1083_v34 }
 0x354   : > { %v965_v35 = vpop.f32.mrf.mxu3 }
 0x355   : > { %v968_v36 = vmul.f32 0.35355338, %v965_v35  ;;  %2011 = vmatmul.msk.f32.vlgmr.msrb.gmra.mxu3 %vm876_vm1, %v1145_v11  ;;  %v1287_v35 = vld [vmem:[#allocation4 + $0x18] sm:$0xff] }
 0x356   : > { %1338 = vmatpush.msra.mxu3 %v1287_v35 }
 0x357   : > { %v969_v37 = vadd.f32 %v968_v36, %v845_v15  ;;  %v1286_v36 = vld [vmem:[#allocation4 + $0x10] sm:$0xff] }
 0x358   : > { %1339 = vmatpush.msra.mxu3 %v1286_v36 }
 0x359   : > { %v970_v38 = vsel %vm876_vm1, %v969_v37, -inf }
 0x35a   : > { %971 = vmax.xlane.f32.xlu2 %v970_v38  ;;  %v1284_v38 = vld [vmem:[#allocation4] sm:$0xff] }
 0x36c   : > { %1094 = vrot.lane.b32.xlu1 %v2660_v7, %s2433_s27  ;;  %s2904_s27 = sld [smem:[#allocation25_spill]] }
 0x3c6   : > { %v1085_v44 = vpop.xlane.xlu1 %1084 }
 0x3c7   : > { %v1086_v47 = vsub.f32 %v1082_v33, %v1085_v44 }
 0x3c9   : > { %v1087_v49 = vmul.f32 1.442695, %v1086_v47 }
 0x3cd   : > { %v972_v40 = vpop.xlane.xlu2 %971 }
 0x3ce   : > { %v973_v41 = vsub.f32 %v969_v37, %v972_v40  ;;  %v1285_v37 = vld [vmem:[#allocation4 + $0x8] sm:$0xff]  ;;  %v1282_v40 = vld [vmem:[#allocation2 + $0x18] sm:$0xff] }
 0x3cf   : > { %1340 = vmatpush.msra.mxu3 %v1285_v37 }
 0x3d0   : > { %v2699_v39 = vpop.f32.mrf.mxu3  ;;  %v974_v42 = vmul.f32 1.442695, %v973_v41  ;;  %v1281_v41 = vld [vmem:[#allocation2 + $0x10] sm:$0xff] }
 0x3d1   : > { %1341 = vmatpush.msra.mxu3 %v1284_v38 }
 0x3d2   : > { %2146 = vpow2.f32 %v974_v42  ;;  %v1280_v42 = vld [vmem:[#allocation2 + $0x8] sm:$0xff] }
 0x3d3   : > { %2148 = vpow2.f32 %v1087_v49 }
 0x3d8   : > { %v1169_v43 = vpop.f32.mrf.mxu3  ;;  %v2147_v50 = vpop.eup %2146 }
 0x3d9   : > { %v1172_v45 = vmul.f32 0.35355338, %v1169_v43  ;;  %v976_v51 = vsel %vm876_vm1, %v2147_v50, 0.0  ;;  %v2149_v52 = vpop.eup %2148  ;;  %v1279_v43 = vld [vmem:[#allocation2] sm:$0xff] }
 0x3da   : > { %v1089_v53 = vsel %vm876_vm1, %v2149_v52, 0.0 }
 0x3db   : > { %v1173_v46 = vadd.f32 %v1172_v45, %v845_v15 }
 0x3dd   : > { %v1174_v48 = vsel %vm876_vm1, %v1173_v46, -inf }
 0x3de   : > { %1175 = vmax.xlane.f32.xlu0 %v1174_v48  ;;  %v1095_v0 = vpop.permute.xlu1 %1094 }
 0x3e6   : > { %977 = vadd.xlane.f32.xlu0 %v976_v51 }
 0x3ee   : > { %1090 = vadd.xlane.f32.xlu0 %v1089_v53  ;;  %v2131_v53 = vld [vmem:[%s2904_s27] ss:$0 sm:$0xff] }
 0x402   : > { %981 = vrot.lane.b32.xlu0 %v2660_v7, %s2434_s23  ;;  %s2905_s23 = sld [smem:[#allocation29_spill]] }
 0x451   : > { %v1176_v54 = vpop.xlane.xlu0 %1175 }
 0x452   : > { %v1177_v55 = vsub.f32 %v1173_v46, %v1176_v54 }
 0x454   : > { %v1178_v56 = vmul.f32 1.442695, %v1177_v55 }
 0x456   : > { %2150 = vpow2.f32 %v1178_v56  ;;  %v2132_v56 = vld [vmem:[%s2860_s8] ss:$0 sm:$0xff] }
 0x459   : > { %v978_v59 = vpop.xlane.xlu0 %977 }
 0x45a   : > { %2152 = vrcp.f32 %v978_v59  ;;  %v2133_v59 = vld [vmem:[%s2864_s12] ss:$0 sm:$0xff] }
 0x45c   : > { %v2151_v57 = vpop.eup %2150 }
 0x45d   : > { %v1180_v58 = vsel %vm876_vm1, %v2151_v57, 0.0 }
 0x45e   : > { %1181 = vadd.xlane.f32.xlu2 %v1180_v58 }
 0x460   : > { %v2153_v61 = vpop.eup %2152 }
 0x461   : > { %v1091_v60 = vpop.xlane.xlu0 %1090  ;;  %v980_v63 = vmul.f32 %v2153_v61, %v2147_v50 }
 0x462   : > { %2154 = vrcp.f32 %v1091_v60 }
 0x468   : > { %v2155_v1 = vpop.eup %2154 }
 0x469   : > { %v1093_v2 = vmul.f32 %v2155_v1, %v2149_v52 }
 0x474   : > { %v982_v62 = vpop.permute.xlu0 %981 }
 0x475   : > { %1002 = vmatpush.msra.mxu2 %v982_v62  ;;  %v2134_v62 = vld [vmem:[%s2862_s10] ss:$0 sm:$0xff] }
 0x476   : > { %1185 = vrot.lane.b32.xlu2 %v2660_v7, %s2435_s0  ;;  %2003 = vmatmul.msk.f32.vlgmr.msra.gmra.mxu2 %vm876_vm1, %v980_v63  ;;  %v842_v7 = vld [vmem:[%s2901_s25 + $0x10] sm:$0xff]  ;;  %s2902_s0 = sld [smem:[#allocation24_spill]] }
 0x477   : > { %1115 = vmatpush.msrb.mxu2 %v1095_v0  ;;  %1138 = vmatpush.msra.mxu1 %v842_v7 }
 0x479   : > { %1229 = vmatpush.msra.mxu2 %v843_v12 }
 0x47c   : > { %v2130_v18 = vld [vmem:[%s2902_s0] ss:$0 sm:$0xff]  ;;  %s832_s0 = scalar_lea.vmem %s2905_s23, %s2635_s21 }
 0x47e   : > { %2008 = vmatmul.msk.f32.vlgmr.msrb.gmra.mxu2 %vm876_vm1, %v1093_v2 }
 0x4d1   : > { %v1182_v3 = vpop.xlane.xlu2 %1181 }
 0x4d2   : > { %2156 = vrcp.f32 %v1182_v3 }
 0x4d3   : > { %2158 = vrcp.f32 %v2436_v24  ;;  %v1289_v24 = vld [vmem:[#allocation6] sm:$0xff] }
 0x4d8   : > { %v2157_v5 = vpop.eup %2156 }
 0x4d9   : > { %v1184_v6 = vmul.f32 %v2157_v5, %v2151_v57  ;;  %v1186_v8 = vpop.permute.xlu2 %1185  ;;  %v2159_v25 = vpop.eup %2158 }
 0x4da   : > { %1206 = vmatpush.msra.mxu0 %v1186_v8  ;;  %v1246_v26 = vmul.f32 32.0, %v2159_v25  ;;  %vm1250_vm2 = vweird.f32 %v2159_v25 }
 0x4db   : > { %2012 = vmatmul.msk.f32.vlgmr.msra.gmra.mxu0 %vm876_vm1, %v1184_v6 }
 0x4dc   : > { %v1247_v27 = vsub.f32 1.0, %v1246_v26 }
 0x4de   : > { %v1248_v28 = vmul.f32 %v2159_v25, %v1247_v27 }
 0x4e0   : > { %v1249_v29 = vadd.f32 %v2159_v25, %v1248_v28 }
 0x4e2   : > { %v2728_v30 = vsel %vm1250_vm2, %v2159_v25, %v1249_v29 }
 0x4f9   : > { %v1004_v10 = vpop.f32.mrf.mxu2 }
 0x4fa   : > { %2004 = vmatmul.msk.f32.vlgmr.msrb.gmra.mxu1 %vm876_vm1, %v1004_v10 }
 0x4fb   : > { %1312 = vmatpush.msrb.mxu1 %v1282_v40 }
 0x4fd   : > { %1313 = vmatpush.msrb.mxu1 %v1281_v41 }
 0x4ff   : > { %1314 = vmatpush.msrb.mxu1 %v1280_v42 }
 0x501   : > { %v1117_v11 = vpop.f32.mrf.mxu2  ;;  %1315 = vmatpush.msrb.mxu1 %v1279_v43 }
 0x502   : > { %2009 = vmatmul.msk.f32.vlgmr.msra.gmra.mxu1 %vm876_vm1, %v1117_v11 }
 0x558   : > { %v1208_v13 = vpop.f32.mrf.mxu0 }
 0x559   : > { %2013 = vmatmul.msk.f32.vlgmr.msra.gmra.mxu2 %vm876_vm1, %v1208_v13 }
 0x577   : > { %v1027_v14 = vpop.f32.mrf.mxu1 }
 0x578   : > { %v1051_v16 = vadd.f32 %v2699_v39, %v1027_v14  ;;  %v834_v39 = vld [vmem:[%s828_s7] sm:$0xff] }
 0x579   : > { %2015 = vmatmul.msk.f32.vlgmr.msra.gmra.mxu3 %vm849_vm0, %v834_v39 }
 0x57f   : > { %v1140_v15 = vpop.f32.mrf.mxu1 }
 0x580   : > { %v1143_v17 = vadd.f32 %v1140_v15, %v1051_v16 }
 0x5dc   : > { %v1231_v19 = vpop.f32.mrf.mxu2 }
 0x5dd   : > { %v1234_v20 = vadd.f32 %v1231_v19, %v1143_v17 }
 0x5df   : > { %v1238_v21 = vadd.f32 %v2130_v18, %v1234_v20 }
 0x5e1   : > { %v1239_v22 = vadd.f32 %v1238_v21, %v2653_v4 }
 0x5e3   : > { %v1242_v23 = vsel %vm849_vm0, %v1239_v22, 0.0 }
 0x5e4   : > { %1243 = vadd.xlane.f32.xlu0 %v1242_v23 }
 0x5fc   : > { %v1343_v60 = vpop.f32.mrf.mxu3 }
 0x5fd   : > { %v2751_v61 = vadd.f32 %v2133_v59, %v1343_v60 }
 0x5ff   : > { %2016 = vmatpush.xpose.msk.msrb.mxu0 %vm876_vm1, %v2751_v61 }
 0x657   : > { %v1244_v31 = vpop.xlane.xlu0 %1243 }
 0x658   : > { %v1252_v32 = vmul.f32 %v2728_v30, %v1244_v31 }
 0x65a   : > { %v1253_v33 = vsub.f32 %v1239_v22, %v1252_v32 }
 0x65c   : > { %v1254_v34 = vmul.f32 %v1253_v33, %v1253_v33 }
 0x65e   : > { %v1255_v4 = vsel %vm849_vm0, %v1254_v34, 0.0 }
 0x65f   : > { %1256 = vadd.xlane.f32.xlu1 %v1255_v4 }
 0x678   : > { %1412 = vrot.lane.b32.xlu1 %v2751_v61, %s2427_s1 }
 0x680   : > { %1524 = vrot.lane.b32.xlu1 %v2751_v61, %s2432_s3 }
 0x6d2   : > { %v1257_v44 = vpop.xlane.xlu1 %1256 }
 0x6d3   : > { %v1258_v45 = vmul.f32 %v1257_v44, %v2728_v30 }
 0x6d5   : > { %v1259_v46 = vadd.f32 1e-05, %v1258_v45 }
 0x6d7   : > { %2160 = vrsqrt.f32 %v1259_v46  ;;  %vm1266_vm4 = vweird.f32 %v1259_v46 }
 0x6dd   : > { %v2161_v47 = vpop.eup %2160 }
 0x6de   : > { %v1261_v48 = vmul.f32 %v2161_v47, %v1259_v46  ;;  %vm1267_vm3 = vweird.f32 %v2161_v47 }
 0x6df   : > { %vm1268_vm5 = vmor %vm1266_vm4, %vm1267_vm3 }
 0x6e0   : > { %v1262_v49 = vmul.f32 %v2161_v47, %v1261_v48 }
 0x6e2   : > { %v1263_v50 = vmul.f32 0.5, %v1262_v49 }
 0x6e4   : > { %v1264_v51 = vsub.f32 1.5, %v1263_v50 }
 0x6e6   : > { %v1265_v52 = vmul.f32 %v2161_v47, %v1264_v51 }
 0x6e8   : > { %v1269_v54 = vsel %vm1268_vm5, %v2161_v47, %v1265_v52 }
 0x6e9   : > { %v1270_v55 = vmul.f32 %v1269_v54, %v1253_v33 }
 0x6ea   : > { %v1413_v1 = vpop.permute.xlu1 %1412 }
 0x6eb   : > { %v1274_v57 = vmul.f32 %v2131_v53, %v1270_v55  ;;  %2019 = vmatpush.xpose.msk.msra.mxu1 %vm876_vm1, %v1413_v1  ;;  %v1290_v55 = vld [vmem:[#allocation6 + $0x8] sm:$0xff]  ;;  %v1292_v1 = vld [vmem:[#allocation6 + $0x18] sm:$0xff] }
 0x6ec   : > { %1494 = vmatpush.msra.mxu0 %v1290_v55 }
 0x6ed   : > { %v2744_v58 = vadd.f32 %v2132_v56, %v1274_v57  ;;  %v1291_v56 = vld [vmem:[#allocation6 + $0x10] sm:$0xff] }
 0x6ef   : > { %2014 = vmatmul.msk.f32.vlgmr.msrb.gmra.mxu1 %vm849_vm0, %v2744_v58 }
 0x6f2   : > { %v1525_v2 = vpop.permute.xlu1 %1524 }
 0x6f3   : > { %2024 = vmatpush.xpose.msk.msrb.mxu1 %vm876_vm1, %v1525_v2 }
 0x76c   : > { %v1317_v63 = vpop.f32.mrf.mxu1 }
 0x76d   : > { %v1318_v0 = vadd.f32 %v2134_v62, %v1317_v63 }
 0x76f   : > { %2017 = vmatmul.msk.f32.vlgmr.msrb.gmra.mxu0 %vm876_vm1, %v1318_v0 }
 0x770   : > { %1606 = vmatpush.msrb.mxu0 %v1291_v56 }
 0x7ec   : > { %v1369_v3 = vpop.f32.mrf.mxu0 }
 0x7ed   : > { %v1372_v5 = vmul.f32 0.35355338, %v1369_v3 }
 0x7ef   : > { %v1373_v6 = vsel %vm876_vm1, %v1372_v5, -inf }
 0x7f0   : > { %1374 = vmax.xlane.f32.xlu2 %v1373_v6 }
 0x808   : > { %1410 = vrot.lane.b32.xlu2 %v1318_v0, %s2427_s1 }
 0x810   : > { %1522 = vrot.lane.b32.xlu2 %v1318_v0, %s2432_s3 }
 0x863   : > { %v1375_v8 = vpop.xlane.xlu2 %1374 }
 0x864   : > { %v1376_v9 = vsub.f32 %v1372_v5, %v1375_v8  ;;  %v2135_v8 = vld [vmem:[%s2866_s14] ss:$0 sm:$0xff] }
 0x866   : > { %v1377_v7 = vmul.f32 1.442695, %v1376_v9 }
 0x868   : > { %2162 = vpow2.f32 %v1377_v7 }
 0x86b   : > { %v1411_v10 = vpop.permute.xlu2 %1410 }
 0x86c   : > { %2020 = vmatmul.msk.f32.vlgmr.msra.gmra.mxu1 %vm876_vm1, %v1411_v10 }
 0x86e   : > { %v2163_v11 = vpop.eup %2162 }
 0x86f   : > { %v1379_v12 = vsel %vm876_vm1, %v2163_v11, 0.0 }
 0x870   : > { %1380 = vadd.xlane.f32.xlu0 %v1379_v12 }
 0x873   : > { %v1523_v13 = vpop.permute.xlu2 %1522 }
 0x874   : > { %2025 = vmatmul.msk.f32.vlgmr.msrb.gmra.mxu1 %vm876_vm1, %v1523_v13 }
 0x884   : > { %1384 = vrot.lane.b32.xlu0 %v2751_v61, %s2426_s24 }
 0x88c   : > { %1614 = vrot.lane.b32.xlu0 %v2751_v61, %s2429_s2 }
 0x894   : > { %1612 = vrot.lane.b32.xlu0 %v1318_v0, %s2429_s2 }
 0x8e3   : > { %v1381_v15 = vpop.xlane.xlu0 %1380 }
 0x8e4   : > { %2164 = vrcp.f32 %v1381_v15 }
 0x8e9   : > { %v1435_v14 = vpop.f32.mrf.mxu1 }
 0x8ea   : > { %v1438_v16 = vmul.f32 0.35355338, %v1435_v14  ;;  %v2165_v20 = vpop.eup %2164 }
 0x8eb   : > { %v1383_v22 = vmul.f32 %v2165_v20, %v2163_v11  ;;  %v1740_v20 = vld [vmem:[#allocation7 + $0x8] sm:$0xff] }
 0x8ec   : > { %v1439_v17 = vsel %vm876_vm1, %v1438_v16, -inf }
 0x8ed   : > { %1440 = vmax.xlane.f32.xlu0 %v1439_v17 }
 0x8f1   : > { %v1547_v18 = vpop.f32.mrf.mxu1 }
 0x8f2   : > { %v1550_v19 = vmul.f32 0.35355338, %v1547_v18  ;;  %v1742_v18 = vld [vmem:[#allocation7 + $0x18] sm:$0xff] }
 0x8f4   : > { %v1551_v21 = vsel %vm876_vm1, %v1550_v19, -inf }
 0x8f5   : > { %1552 = vmax.xlane.f32.xlu1 %v1551_v21  ;;  %v1739_v21 = vld [vmem:[#allocation7] sm:$0xff] }
 0x8f6   : > { %v1385_v23 = vpop.permute.xlu0 %1384 }
 0x8f7   : > { %1405 = vmatpush.msrb.mxu2 %v1385_v23  ;;  %v1776_v23 = vld [vmem:[%s2871_s19 + $0x28] sm:$0xff] }
 0x8f8   : > { %2018 = vmatmul.msk.f32.vlgmr.msrb.gmra.mxu2 %vm876_vm1, %v1383_v22  ;;  %v1777_v22 = vld [vmem:[%s2871_s19 + $0x30] sm:$0xff] }
 0x8f9   : > { %1517 = vmatpush.msra.mxu2 %v1289_v24 }
 0x8fe   : > { %v1615_v25 = vpop.permute.xlu0 %1614 }
 0x8ff   : > { %2028 = vmatpush.xpose.msk.msrb.mxu2 %vm876_vm1, %v1615_v25 }
 0x906   : > { %v1613_v26 = vpop.permute.xlu0 %1612 }
 0x960   : > { %v1441_v27 = vpop.xlane.xlu0 %1440 }
 0x961   : > { %v1442_v28 = vsub.f32 %v1438_v16, %v1441_v27 }
 0x963   : > { %v1443_v29 = vmul.f32 1.442695, %v1442_v28  ;;  %v1774_v28 = vld [vmem:[%s2871_s19 + $0x18] sm:$0xff] }
 0x965   : > { %2166 = vpow2.f32 %v1443_v29 }
 0x968   : > { %v1553_v31 = vpop.xlane.xlu1 %1552 }
 0x969   : > { %v1554_v32 = vsub.f32 %v1550_v19, %v1553_v31  ;;  %v1741_v19 = vld [vmem:[#allocation7 + $0x10] sm:$0xff] }
 0x96b   : > { %v2167_v33 = vpop.eup %2166  ;;  %v1555_v34 = vmul.f32 1.442695, %v1554_v32 }
 0x96c   : > { %v1445_v4 = vsel %vm876_vm1, %v2167_v33, 0.0 }
 0x96d   : > { %2168 = vpow2.f32 %v1555_v34  ;;  %1446 = vadd.xlane.f32.xlu0 %v1445_v4 }
 0x973   : > { %v2169_v35 = vpop.eup %2168 }
 0x974   : > { %v1557_v36 = vsel %vm876_vm1, %v2169_v35, 0.0 }
 0x975   : > { %1558 = vadd.xlane.f32.xlu1 %v1557_v36 }
 0x97b   : > { %v1407_v37 = vpop.f32.mrf.mxu2 }
 0x97c   : > { %2023 = vmatmul.msk.f32.vlgmr.msra.gmra.mxu2 %vm876_vm1, %v1407_v37 }
 0x984   : > { %2029 = vmatmul.msk.f32.vlgmr.msrb.gmra.mxu2 %vm876_vm1, %v1613_v26  ;;  %v1775_v26 = vld [vmem:[%s2871_s19 + $0x20] sm:$0xff] }
 0x98e   : > { %1562 = vrot.lane.b32.xlu1 %v2751_v61, %s2430_s5 }
 0x9e0   : > { %v1447_v42 = vpop.xlane.xlu0 %1446 }
 0x9e1   : > { %2170 = vrcp.f32 %v1447_v42  ;;  %v1772_v42 = vld [vmem:[%s2871_s19 + $0x8] sm:$0xff] }
 0x9e7   : > { %v2171_v47 = vpop.eup %2170 }
 0x9e8   : > { %v1559_v45 = vpop.xlane.xlu1 %1558  ;;  %v1449_v48 = vmul.f32 %v2171_v47, %v2167_v33 }
 0x9ff   : > { %v1519_v38 = vpop.f32.mrf.mxu2 }
 0xa00   : > { %v1563_v50 = vpop.permute.xlu1 %1562 }
 0xa07   : > { %v1637_v39 = vpop.f32.mrf.mxu2 }
 0xa08   : > { %v1640_v40 = vmul.f32 0.35355338, %v1637_v39 }
 0xa0a   : > { %v1641_v41 = vsel %vm876_vm1, %v1640_v40, -inf }
 0xa0b   : > { %1642 = vmax.xlane.f32.xlu2 %v1641_v41  ;;  %v1773_v41 = vld [vmem:[%s2871_s19 + $0x10] sm:$0xff] }
 0xa23   : > { %1450 = vrot.lane.b32.xlu2 %v2751_v61, %s2425_s29 }
 0xa7e   : > { %v1643_v43 = vpop.xlane.xlu2 %1642 }
 0xa7f   : > { %v1644_v44 = vsub.f32 %v1640_v40, %v1643_v43  ;;  %v1771_v43 = vld [vmem:[%s2871_s19] sm:$0xff] }
 0xa81   : > { %v1645_v46 = vmul.f32 1.442695, %v1644_v44  ;;  %v2138_v44 = vld [vmem:[%s2870_s18] ss:$0 sm:$0xff] }
 0xa83   : > { %2172 = vpow2.f32 %v1645_v46 }
 0xa84   : > { %2174 = vrcp.f32 %v1559_v45 }
 0xa86   : > { %v1451_v49 = vpop.permute.xlu2 %1450 }
 0xa87   : > { %1471 = vmatpush.msrb.mxu3 %v1451_v49 }
 0xa88   : > { %2021 = vmatmul.msk.f32.vlgmr.msrb.gmra.mxu3 %vm876_vm1, %v1449_v48  ;;  %v2139_v48 = vld [vmem:[#allocation9] ss:$0 sm:$0xff] }
 0xa89   : > { %v2173_v51 = vpop.eup %2172  ;;  %1583 = vmatpush.msra.mxu3 %v1563_v50 }
 0xa8a   : > { %v1647_v52 = vsel %vm876_vm1, %v2173_v51, 0.0  ;;  %v2175_v53 = vpop.eup %2174 }
 0xa8b   : > { %1648 = vadd.xlane.f32.xlu0 %v1647_v52  ;;  %v1561_v54 = vmul.f32 %v2175_v53, %v2169_v35  ;;  %1696 = vmatpush.msrb.mxu3 %v1292_v1  ;;  %v2136_v35 = vld [vmem:[%s2867_s15] ss:$0 sm:$0xff] }
 0xa90   : > { %2026 = vmatmul.msk.f32.vlgmr.msra.gmra.mxu3 %vm876_vm1, %v1561_v54 }
 0xa9f   : > { %1652 = vrot.lane.b32.xlu0 %v2751_v61, %s2428_s28 }
 0xafe   : > { %v1649_v57 = vpop.xlane.xlu0 %1648 }
 0xaff   : > { %2176 = vrcp.f32 %v1649_v57 }
 0xb05   : > { %v2177_v60 = vpop.eup %2176 }
 0xb06   : > { %v1651_v62 = vmul.f32 %v2177_v60, %v2173_v51 }
 0xb0b   : > { %v1473_v59 = vpop.f32.mrf.mxu3 }
 0xb0c   : > { %2022 = vmatmul.msk.f32.vlgmr.msra.gmra.mxu0 %vm876_vm1, %v1473_v59 }
 0xb0d   : > { %1762 = vmatpush.msra.mxu0 %v1742_v18 }
 0xb0f   : > { %1763 = vmatpush.msra.mxu0 %v1741_v19 }
 0xb11   : > { %v1653_v63 = vpop.permute.xlu0 %1652  ;;  %1764 = vmatpush.msra.mxu0 %v1740_v20 }
 0xb12   : > { %1673 = vmatpush.msra.mxu1 %v1653_v63 }
 0xb13   : > { %v1585_v0 = vpop.f32.mrf.mxu3  ;;  %2030 = vmatmul.msk.f32.vlgmr.msra.gmra.mxu1 %vm876_vm1, %v1651_v62  ;;  %1765 = vmatpush.msra.mxu0 %v1739_v21 }
 0xb14   : > { %2027 = vmatmul.msk.f32.vlgmr.msrb.gmra.mxu0 %vm876_vm1, %v1585_v0 }
 0xb89   : > { %v1496_v2 = vpop.f32.mrf.mxu0 }
 0xb8a   : > { %v1520_v5 = vadd.f32 %v1519_v38, %v1496_v2  ;;  %v2137_v38 = vld [vmem:[%s2868_s16] ss:$0 sm:$0xff] }
 0xb90   : > { %v1675_v61 = vpop.f32.mrf.mxu1 }
 0xb91   : > { %2031 = vmatmul.msk.f32.vlgmr.msrb.gmra.mxu3 %vm876_vm1, %v1675_v61  ;;  %v1608_v3 = vpop.f32.mrf.mxu0 }
 0xb92   : > { %v1611_v6 = vadd.f32 %v1608_v3, %v1520_v5  ;;  %v2140_v5 = vld [vmem:[#allocation10] ss:$0 sm:$0xff] }
 0xc14   : > { %v1698_v9 = vpop.f32.mrf.mxu3 }
 0xc15   : > { %v1701_v7 = vadd.f32 %v1698_v9, %v1611_v6 }
 0xc17   : > { %v1705_v10 = vadd.f32 %v2135_v8, %v1701_v7  ;;  %v2141_v8 = vld [vmem:[#allocation12] ss:$0 sm:$0xff] }
 0xc19   : > { %v1706_v11 = vadd.f32 %v1705_v10, %v2744_v58  ;;  %v1778_v58 = vld [vmem:[%s2871_s19 + $0x38] sm:$0xff] }
 0xc1a   : > { %1795 = vmatpush.msra.mxu2 %v1778_v58 }
 0xc1b   : > { %v1709_v12 = vsel %vm849_vm0, %v1706_v11, 0.0 }
 0xc1c   : > { %1710 = vadd.xlane.f32.xlu2 %v1709_v12  ;;  %1796 = vmatpush.msra.mxu2 %v1777_v22 }
 0xc1e   : > { %1797 = vmatpush.msra.mxu2 %v1776_v23 }
 0xc20   : > { %1798 = vmatpush.msra.mxu2 %v1775_v26 }
 0xc22   : > { %1799 = vmatpush.msra.mxu2 %v1774_v28 }
 0xc24   : > { %1800 = vmatpush.msra.mxu2 %v1773_v41 }
 0xc26   : > { %1801 = vmatpush.msra.mxu2 %v1772_v42 }
 0xc28   : > { %1802 = vmatpush.msra.mxu2 %v1771_v43 }
 0xc8f   : > { %v1711_v13 = vpop.xlane.xlu2 %1710 }
 0xc90   : > { %v1712_v14 = vmul.f32 %v1711_v13, %v2728_v30 }
 0xc92   : > { %v1713_v15 = vsub.f32 %v1706_v11, %v1712_v14 }
 0xc94   : > { %v1714_v16 = vmul.f32 %v1713_v15, %v1713_v15 }
 0xc96   : > { %v1715_v17 = vsel %vm849_vm0, %v1714_v16, 0.0 }
 0xc97   : > { %1716 = vadd.xlane.f32.xlu0 %v1715_v17 }
 0xd0a   : > { %v1717_v24 = vpop.xlane.xlu0 %1716 }
 0xd0b   : > { %v1718_v25 = vmul.f32 %v1717_v24, %v2728_v30 }
 0xd0d   : > { %v1719_v27 = vadd.f32 1e-05, %v1718_v25 }
 0xd0f   : > { %2178 = vrsqrt.f32 %v1719_v27  ;;  %vm1726_vm7 = vweird.f32 %v1719_v27 }
 0xd15   : > { %v2179_v29 = vpop.eup %2178 }
 0xd16   : > { %v1721_v31 = vmul.f32 %v2179_v29, %v1719_v27  ;;  %vm1727_vm6 = vweird.f32 %v2179_v29 }
 0xd17   : > { %vm1728_vm8 = vmor %vm1726_vm7, %vm1727_vm6 }
 0xd18   : > { %v1722_v32 = vmul.f32 %v2179_v29, %v1721_v31 }
 0xd1a   : > { %v1723_v33 = vmul.f32 0.5, %v1722_v32 }
 0xd1c   : > { %v1724_v34 = vsub.f32 1.5, %v1723_v33 }
 0xd1e   : > { %v1725_v4 = vmul.f32 %v2179_v29, %v1724_v34 }
 0xd20   : > { %v1729_v36 = vsel %vm1728_vm8, %v2179_v29, %v1725_v4 }
 0xd21   : > { %v1730_v37 = vmul.f32 %v1729_v36, %v1713_v15 }
 0xd23   : > { %v1734_v39 = vmul.f32 %v2136_v35, %v1730_v37 }
 0xd25   : > { %v1738_v40 = vadd.f32 %v2137_v38, %v1734_v39 }
 0xd27   : > { %2032 = vmatmul.msk.f32.vlgmr.msra.gmra.mxu0 %vm849_vm0, %v1738_v40 }
 0xda4   : > { %v1767_v45 = vpop.f32.mrf.mxu0 }
 0xda5   : > { %v1768_v46 = vadd.f32 %v2138_v44, %v1767_v45 }
 0xda7   : > { %v1770_v47 = vmax.f32 %v1768_v46, 0.0 }
 0xda9   : > { %2033 = vmatmul.msk.f32.vlgmr.msra.gmra.mxu2 %vm1783_vm9, %v1770_v47 }
 0xe2c   : > { %v1804_v49 = vpop.f32.mrf.mxu2 }
 0xe2d   : > { %v1805_v50 = vadd.f32 %v2139_v48, %v1804_v49 }
 0xe2f   : > { %v1807_v51 = vadd.f32 %v1805_v50, %v1738_v40 }
 0xe31   : > { %v1810_v52 = vsel %vm849_vm0, %v1807_v51, 0.0 }
 0xe32   : > { %1811 = vadd.xlane.f32.xlu1 %v1810_v52 }
 0xea5   : > { %v1812_v53 = vpop.xlane.xlu1 %1811 }
 0xea6   : > { %v1813_v54 = vmul.f32 %v1812_v53, %v2728_v30 }
 0xea8   : > { %v1814_v55 = vsub.f32 %v1807_v51, %v1813_v54 }
 0xeaa   : > { %v1815_v56 = vmul.f32 %v1814_v55, %v1814_v55 }
 0xeac   : > { %v1816_v57 = vsel %vm849_vm0, %v1815_v56, 0.0 }
 0xead   : > { %1817 = vadd.xlane.f32.xlu2 %v1816_v57 }
 0xf20   : > { %v1818_v59 = vpop.xlane.xlu2 %1817 }
 0xf21   : > { %v1819_v60 = vmul.f32 %v1818_v59, %v2728_v30 }
 0xf23   : > { %v1820_v62 = vadd.f32 1e-05, %v1819_v60 }
 0xf25   : > { %2180 = vrsqrt.f32 %v1820_v62  ;;  %vm1827_vm11 = vweird.f32 %v1820_v62 }
 0xf2b   : > { %v2181_v63 = vpop.eup %2180 }
 0xf2c   : > { %v1822_v0 = vmul.f32 %v2181_v63, %v1820_v62  ;;  %vm1828_vm10 = vweird.f32 %v2181_v63 }
 0xf2d   : > { %vm1829_vm12 = vmor %vm1827_vm11, %vm1828_vm10 }
 0xf2e   : > { %v1823_v1 = vmul.f32 %v2181_v63, %v1822_v0 }
 0xf30   : > { %v1824_v61 = vmul.f32 0.5, %v1823_v1 }
 0xf32   : > { %v1825_v2 = vsub.f32 1.5, %v1824_v61 }
 0xf34   : > { %v1826_v3 = vmul.f32 %v2181_v63, %v1825_v2 }
 0xf36   : > { %v1830_v6 = vsel %vm1829_vm12, %v2181_v63, %v1826_v3 }
 0xf37   : > { %v1831_v9 = vmul.f32 %v1830_v6, %v1814_v55 }
 0xf39   : > { %v1835_v7 = vmul.f32 %v2140_v5, %v1831_v9 }
 0xf3b   : > { %v1839_v30 = vadd.f32 %v2141_v8, %v1835_v7 }
 0xf3d   : > { %1840 = vst.msk [vmem:[%s832_s0] sm:$0xff] %vm849_vm0, %v1839_v30 }
 0xf3e PF: > { %s2906_s6 = sld [smem:[#allocation17_spill]] }
 0xf44   : > { %s37_s4 = sadd.s32 1, %s2906_s6  }
 0xf45   : > { %p34_p7 = scmp.ge.s32.totalorder %s37_s4, 4  }
 0xf47   :  { %36 = sbr.rel (!%p34_p7) target bundleno = 17 (0x11), region = 174 }
 0xf4c   :  { %1860 = vsyncpa [#allocation3], 1 }
 0xf4d   :  { %1862 = vsyncpa [#allocation3 + $0x1], 1 }
 0xf4e   :  { %1863 = vsyncpa [#allocation5], 1 }
 0xf4f   :  { %1864 = vsyncpa [#allocation8], 1 }
 0xf50   :  { %1865 = vsyncpa [#allocation11], 1 }

// kernel: transformer_model_forward.11
= control target key start
LH: loop header
LB: loop body
LE: loop exit
PB: predicated region body
PF: predicated region fallthrough
CT: control target
= control target key end

     0   :  { %s3897_s0 = inlined_call_operand.vmem [shape: f32[2,8,32], index: 0, kind: input, shape index: {}]   ;;  %s3898_s1 = inlined_call_operand.vmem [shape: f32[2,8,32], index: 1, kind: input, shape index: {}]   ;;  %s3899_s2 = inlined_call_operand.vmem [shape: f32[8,8], index: 2, kind: input, shape index: {}]   ;;  %s3900_s3 = inlined_call_operand.vmem [shape: f32[32,96], index: 3, kind: input, shape index: {}]   ;;  %s3901_s4 = inlined_call_operand.hbm [shape: f32[1,96], index: 4, kind: input, shape index: {}]   ;;  %s3902_s5 = inlined_call_operand.vmem [shape: f32[32,32], index: 5, kind: input, shape index: {}]   ;;  %s3903_s6 = inlined_call_operand.hbm [shape: f32[1,32], index: 6, kind: input, shape index: {}]   ;;  %s3904_s7 = inlined_call_operand.hbm [shape: f32[1,32], index: 7, kind: input, shape index: {}]   ;;  %s3905_s8 = inlined_call_operand.hbm [shape: f32[1,32], index: 8, kind: input, shape index: {}]   ;;  %s3906_s9 = inlined_call_operand.vmem [shape: f32[32,32], index: 9, kind: input, shape index: {}]   ;;  %s3907_s10 = inlined_call_operand.hbm [shape: f32[1,32], index: 10, kind: input, shape index: {}]   ;;  %s3908_s11 = inlined_call_operand.vmem [shape: f32[32,64], index: 11, kind: input, shape index: {}]   ;;  %s3909_s12 = inlined_call_operand.hbm [shape: f32[1,64], index: 12, kind: input, shape index: {}]   ;;  %s3910_s13 = inlined_call_operand.hbm [shape: f32[32,32], index: 13, kind: input, shape index: {}]   ;;  %s3911_s14 = inlined_call_operand.hbm [shape: f32[1,32], index: 14, kind: input, shape index: {}]   ;;  %s3912_s15 = inlined_call_operand.hbm [shape: f32[1,32], index: 15, kind: input, shape index: {}]   ;;  %s3913_s16 = inlined_call_operand.hbm [shape: f32[1,32], index: 16, kind: input, shape index: {}]   ;;  %s3914_s17 = inlined_call_operand.hbm [shape: f32[32,64], index: 17, kind: input, shape index: {}]   ;;  %s3915_s18 = inlined_call_operand.hbm [shape: f32[1,64], index: 18, kind: input, shape index: {}]   ;;  %s3916_s19 = inlined_call_operand.vmem [shape: f32[64,32], index: 19, kind: input, shape index: {}]   ;;  %s3917_s20 = inlined_call_operand.hbm [shape: f32[1,32], index: 20, kind: input, shape index: {}]   ;;  %s3918_s21 = inlined_call_operand.hbm [shape: f32[1,32], index: 21, kind: input, shape index: {}]   ;;  %s3919_s22 = inlined_call_operand.hbm [shape: f32[1,32], index: 22, kind: input, shape index: {}]   ;;  %s3920_s23 = inlined_call_operand.hbm [shape: f32[1,32], index: 23, kind: input, shape index: {}]   ;;  %s3921_s24 = inlined_call_operand.hbm [shape: f32[1,32], index: 24, kind: input, shape index: {}]   ;;  %s3922_s25 = inlined_call_operand.vmem [shape: f32[32,4], index: 25, kind: input, shape index: {}]   ;;  %s3923_s26 = inlined_call_operand.hbm [shape: f32[1,4], index: 26, kind: input, shape index: {}]   ;;  %s3924_s27 = inlined_call_operand.vmem [shape: f32[2,8,4], index: 27, kind: output, shape index: {}]  }
   0x1   :  { %3936 = sst [smem:[#allocation41_spill]] %s3897_s0 }
   0x2   :  { %3937 = sst [smem:[#allocation42_spill]] %s3898_s1 }
   0x3   :  { %3938 = sst [smem:[#allocation43_spill]] %s3899_s2 }
   0x4   :  { %3939 = sst [smem:[#allocation44_spill]] %s3900_s3 }
   0x5   :  { %3940 = sst [smem:[#allocation45_spill]] %s3901_s4 }
   0x6   :  { %3941 = sst [smem:[#allocation46_spill]] %s3902_s5 }
   0x7   :  { %3942 = sst [smem:[#allocation47_spill]] %s3903_s6 }
   0x8   :  { %3943 = sst [smem:[#allocation48_spill]] %s3904_s7 }
   0x9   :  { %3944 = sst [smem:[#allocation49_spill]] %s3905_s8 }
   0xa   :  { %3945 = sst [smem:[#allocation50_spill]] %s3906_s9 }
   0xb   :  { %3946 = sst [smem:[#allocation51_spill]] %s3907_s10 }
   0xc   :  { %3947 = sst [smem:[#allocation52_spill]] %s3908_s11 }
   0xd   :  { %3948 = sst [smem:[#allocation53_spill]] %s3909_s12 }
   0xe   :  { %3949 = sst [smem:[#allocation54_spill]] %s3911_s14 }
   0xf   :  { %3950 = sst [smem:[#allocation55_spill]] %s3924_s27 }
  0x10   :  { %32 = vsyncpa [#allocation3], 0 }
  0x11   :  { %33 = vsyncpa [#allocation5], 0 }
  0x12   :  { %34 = vsyncpa [#allocation8], 0 }
  0x13   :  { %35 = vsyncpa [#allocation11], 0 }
  0x14   :  { %36 = vsyncpa [#allocation14], 0 }
  0x15   :  { %37 = vsyncpa [#allocation17], 0 }
  0x16   :  { %38 = vsyncpa [#allocation20], 0 }
  0x17   :  { %39 = vsyncpa [#allocation23], 0 }
  0x18   :  { %40 = vsyncpa [#allocation26], 0 }
  0x19   :  { %41 = vsyncpa [#allocation29], 0  ;;  %s3513_s7 = smov 0  }
  0x1a LB: > { %3951 = sst [smem:[#allocation40_spill]] %s3339_s7  ;;  %s3522_s5 = sadd.s32 4294967295, %s3339_s7   ;;  %s3339_s7 = sphi %s3513_s7, %s47_s7  }
  0x1b   : > { %s3952_s30 = sld [smem:[#allocation47_spill]]  ;;  %p2410_p0 = scmp.ge.s32.totalorder %s3339_s7, 1 }
  0x1c   : > { %p655_p1 = scmp.lt.s32.totalorder %s3339_s7, 3  ;;  %p2619_p2 = scmp.eq.s32.totalorder %s3522_s5, 0 }
  0x1d   : > { %s3341_s0 = smov [#allocation4]   ;;  %s3954_s6 = sld [smem:[#allocation49_spill]] }
  0x1e   : > { %p3527_p3 = pnand %p2410_p0, %p655_p1  ;;  %s690_s10 = sshll.u32 %s3341_s0, 4  ;;  %s691_s10 = int_to_ptr.vmem [resolvable:$true] %s690_s10 }
  0x1f   : > { %s3955_s12 = sld [smem:[#allocation53_spill]]  ;;  %s3343_s29 = smov [#allocation10]  }
  0x20   : > { %p2564_p4 = pneg %p3527_p3  ;;  %s744_s1 = sshll.u32 %s3343_s29, 4  ;;  %s745_s1 = int_to_ptr.vmem [resolvable:$true] %s744_s1 }
  0x21   : > { %s688_s9 = sshll.u32 %s3952_s30, 4  ;;  %s3342_s30 = smov [#allocation7]   ;;  %s689_s9 = int_to_ptr.hbm [resolvable:$true] %s688_s9 }
  0x22   : > { %p3541_p5 = pnand %p2619_p2, %p2564_p4  ;;  %s714_s0 = sshll.u32 %s3342_s30, 4  ;;  %s715_s0 = int_to_ptr.vmem [resolvable:$true] %s714_s0 }
  0x23   : > { %s712_s11 = sshll.u32 %s3954_s6, 4  ;;  %s3957_s14 = sld [smem:[#allocation54_spill]]  ;;  %s713_s11 = int_to_ptr.hbm [resolvable:$true] %s712_s11 }
  0x24   : > { %2570 = dma.hbm_to_vmem [thread:$0]  (!%p3541_p5), %s689_s9, 16, %s691_s10, [#allocation5]  }
  0x25   : > { %s742_s4 = sshll.u32 %s3955_s12, 4  ;;  %s792_s7 = sshll.u32 %s3913_s16, 4  ;;  %s743_s4 = int_to_ptr.hbm [resolvable:$true] %s742_s4  ;;  %s793_s7 = int_to_ptr.hbm [resolvable:$true] %s792_s7 }
  0x26   : > { %2576 = dma.hbm_to_vmem [thread:$0]  (!%p3541_p5), %s713_s11, 16, %s715_s0, [#allocation8]  }
  0x27   : > { %2582 = dma.hbm_to_vmem [thread:$0]  (!%p3541_p5), %s743_s4, 16, %s745_s1, [#allocation11]  }
  0x28   : > { %s3344_s27 = smov [#allocation13]   ;;  %s3345_s10 = smov [#allocation16]  }
  0x29   : > { %s768_s3 = sshll.u32 %s3957_s14, 4  ;;  %s770_s9 = sshll.u32 %s3344_s27, 4  ;;  %s769_s3 = int_to_ptr.hbm [resolvable:$true] %s768_s3  ;;  %s771_s9 = int_to_ptr.vmem [resolvable:$true] %s770_s9 }
  0x2a   : > { %2588 = dma.hbm_to_vmem [thread:$0]  (!%p3541_p5), %s769_s3, 16, %s771_s9, [#allocation14]  }
  0x2b   : > { %s794_s11 = sshll.u32 %s3345_s10, 4  ;;  %s818_s6 = sshll.u32 %s3915_s18, 4  ;;  %s795_s11 = int_to_ptr.vmem [resolvable:$true] %s794_s11  ;;  %s819_s6 = int_to_ptr.hbm [resolvable:$true] %s818_s6 }
  0x2c   : > { %2594 = dma.hbm_to_vmem [thread:$0]  (!%p3541_p5), %s793_s7, 16, %s795_s11, [#allocation17]  }
  0x2d   : > { %s845_s1 = sshll.u32 %s3918_s21, 4  ;;  %s3346_s27 = smov [#allocation19]   ;;  %s846_s1 = int_to_ptr.hbm [resolvable:$true] %s845_s1 }
  0x2e   : > { %s820_s2 = sshll.u32 %s3346_s27, 4  ;;  %s3347_s3 = smov [#allocation22]   ;;  %s821_s2 = int_to_ptr.vmem [resolvable:$true] %s820_s2 }
  0x2f   : > { %2600 = dma.hbm_to_vmem [thread:$0]  (!%p3541_p5), %s819_s6, 16, %s821_s2, [#allocation20]  }
  0x30   : > { %s847_s30 = sshll.u32 %s3347_s3, 4  ;;  %s869_s0 = sshll.u32 %s3920_s23, 4  ;;  %s848_s30 = int_to_ptr.vmem [resolvable:$true] %s847_s30  ;;  %s870_s0 = int_to_ptr.hbm [resolvable:$true] %s869_s0 }
  0x31   : > { %2606 = dma.hbm_to_vmem [thread:$0]  (!%p3541_p5), %s846_s1, 16, %s848_s30, [#allocation23]  }
  0x32   : > { %s3958_s29 = sld [smem:[#allocation45_spill]]  ;;  %s3348_s4 = smov [#allocation25]  }
  0x33   : > { %s871_s27 = sshll.u32 %s3348_s4, 4  ;;  %s3349_s6 = smov [#allocation2]   ;;  %s872_s27 = int_to_ptr.vmem [resolvable:$true] %s871_s27 }
  0x34   : > { %2612 = dma.hbm_to_vmem [thread:$0]  (!%p3541_p5), %s870_s0, 16, %s872_s27, [#allocation26]  }
  0x35   : > { %s675_s2 = sshll.u32 %s3349_s6, 4  ;;  %s3959_s10 = sld [smem:[#allocation48_spill]]  ;;  %s676_s2 = int_to_ptr.vmem [resolvable:$true] %s675_s2 }
  0x36   : > { %s3960_s7 = sld [smem:[#allocation51_spill]]  ;;  %s3351_s0 = smov [#allocation9]  }
  0x37   : > { %s729_s27 = sshll.u32 %s3351_s0, 4  ;;  %s753_s9 = sshll.u32 %s3910_s13, 4  ;;  %s730_s27 = int_to_ptr.vmem [resolvable:$true] %s729_s27  ;;  %s754_s9 = int_to_ptr.hbm [resolvable:$true] %s753_s9 }
  0x38   : > { %s673_s12 = sshll.u32 %s3958_s29, 4  ;;  %s3350_s29 = smov [#allocation6]   ;;  %s674_s12 = int_to_ptr.hbm [resolvable:$true] %s673_s12 }
  0x39   : > { %2567 = dma.hbm_to_vmem [thread:$0]  (!%p3541_p5), %s674_s12, 16, %s676_s2, [#allocation3]  }
  0x3a   : > { %s702_s4 = sshll.u32 %s3350_s29, 4  ;;  %s3352_s12 = smov [#allocation12]   ;;  %s703_s4 = int_to_ptr.vmem [resolvable:$true] %s702_s4 }
  0x3b   : > { %s700_s14 = sshll.u32 %s3959_s10, 4  ;;  %s755_s2 = sshll.u32 %s3352_s12, 4  ;;  %s701_s14 = int_to_ptr.hbm [resolvable:$true] %s700_s14  ;;  %s756_s2 = int_to_ptr.vmem [resolvable:$true] %s755_s2 }
  0x3c   : > { %s727_s11 = sshll.u32 %s3960_s7, 4  ;;  %s780_s30 = sshll.u32 %s3912_s15, 4  ;;  %s728_s11 = int_to_ptr.hbm [resolvable:$true] %s727_s11  ;;  %s781_s30 = int_to_ptr.hbm [resolvable:$true] %s780_s30 }
  0x3d   : > { %2573 = dma.hbm_to_vmem [thread:$0]  (!%p3541_p5), %s701_s14, 16, %s703_s4, [#allocation5]  }
  0x3e   : > { %2579 = dma.hbm_to_vmem [thread:$0]  (!%p3541_p5), %s728_s11, 16, %s730_s27, [#allocation8]  }
  0x3f   : > { %s3353_s14 = smov 128   ;;  %s3354_s7 = smov 8  }
  0x40   : > { %2585 = dma.hbm_to_vmem [thread:$0]  (!%p3541_p5), %s754_s9, 512, %s756_s2, [#allocation11], %s3353_s14, %s3353_s14, %s3354_s7  }
  0x41   : > { %s3355_s29 = smov [#allocation15]   ;;  %s803_s11 = sshll.u32 %s3914_s17, 4  ;;  %s804_s11 = int_to_ptr.hbm [resolvable:$true] %s803_s11 }
  0x42   : > { %s782_s4 = sshll.u32 %s3355_s29, 4  ;;  %s833_s12 = sshll.u32 %s3917_s20, 4  ;;  %s783_s4 = int_to_ptr.vmem [resolvable:$true] %s782_s4  ;;  %s834_s12 = int_to_ptr.hbm [resolvable:$true] %s833_s12 }
  0x43   : > { %2591 = dma.hbm_to_vmem [thread:$0]  (!%p3541_p5), %s781_s30, 16, %s783_s4, [#allocation14]  }
  0x44   : > { %s3356_s10 = smov [#allocation18]   ;;  %s3357_s9 = smov [#allocation21]  }
  0x45   : > { %s805_s1 = sshll.u32 %s3356_s10, 4  ;;  %s835_s2 = sshll.u32 %s3357_s9, 4  ;;  %s806_s1 = int_to_ptr.vmem [resolvable:$true] %s805_s1  ;;  %s836_s2 = int_to_ptr.vmem [resolvable:$true] %s835_s2 }
  0x46   : > { %2597 = dma.hbm_to_vmem [thread:$0]  (!%p3541_p5), %s804_s11, 512, %s806_s1, [#allocation17], %s3353_s14, %s3353_s14, %s3354_s7  }
  0x47   : > { %s857_s6 = sshll.u32 %s3919_s22, 4  ;;  %s881_s27 = sshll.u32 %s3921_s24, 4  ;;  %s858_s6 = int_to_ptr.hbm [resolvable:$true] %s857_s6  ;;  %s882_s27 = int_to_ptr.hbm [resolvable:$true] %s881_s27 }
  0x48   : > { %2603 = dma.hbm_to_vmem [thread:$0]  (!%p3541_p5), %s834_s12, 16, %s836_s2, [#allocation20]  }
  0x49   : > { %s3358_s3 = smov [#allocation24]   ;;  %s3359_s14 = smov [#allocation27]  }
  0x4a   : > { %s859_s10 = sshll.u32 %s3358_s3, 4  ;;  %s883_s7 = sshll.u32 %s3359_s14, 4  ;;  %s860_s10 = int_to_ptr.vmem [resolvable:$true] %s859_s10  ;;  %s884_s7 = int_to_ptr.vmem [resolvable:$true] %s883_s7 }
  0x4b   : > { %2609 = dma.hbm_to_vmem [thread:$0]  (!%p3541_p5), %s858_s6, 16, %s860_s10, [#allocation23]  }
  0x4c   : > { %s896_s9 = sshll.u32 %s3923_s26, 4  ;;  %s3360_s12 = smov [#allocation28]   ;;  %s897_s9 = int_to_ptr.hbm [resolvable:$true] %s896_s9 }
  0x4d   : > { %2615 = dma.hbm_to_vmem [thread:$0]  (!%p3541_p5), %s882_s27, 16, %s884_s7, [#allocation26]  }
  0x4e   : > { %s898_s2 = sshll.u32 %s3360_s12, 4  ;;  %925 = sbr.rel (%p3527_p3) target bundleno = 4347 (0x10fb), region = 128  ;;  %s899_s2 = int_to_ptr.vmem [resolvable:$true] %s898_s2 }
  0x4f   : > { %2618 = dma.hbm_to_vmem [thread:$0]  (!%p3541_p5), %s897_s9, 16, %s899_s2, [#allocation29]  }
  0x53   : > { %3298 = dma.done.wait (%p2619_p2), [#allocation3], 16  }
  0x54   : > { %3300 = vsyncadd (%p2619_p2), [#allocation3], 4294967280 }
  0x55   : > { %3302 = dma.done.wait (%p2619_p2), [#allocation5], 32  }
  0x56   : > { %3304 = vsyncadd (%p2619_p2), [#allocation5], 4294967264 }
  0x57   : > { %3306 = dma.done.wait (%p2619_p2), [#allocation8], 32  }
  0x58   : > { %3308 = vsyncadd (%p2619_p2), [#allocation8], 4294967264 }
  0x59   : > { %3310 = dma.done.wait (%p2619_p2), [#allocation11], 528  }
  0x5a   : > { %3312 = vsyncadd (%p2619_p2), [#allocation11], 4294966768 }
  0x5b   : > { %3314 = dma.done.wait (%p2619_p2), [#allocation14], 32  }
  0x5c   : > { %3316 = vsyncadd (%p2619_p2), [#allocation14], 4294967264 }
  0x5d   : > { %3318 = dma.done.wait (%p2619_p2), [#allocation17], 528  }
  0x5e   : > { %3320 = vsyncadd (%p2619_p2), [#allocation17], 4294966768 }
  0x5f   : > { %3322 = dma.done.wait (%p2619_p2), [#allocation20], 32  }
  0x60   : > { %3324 = vsyncadd (%p2619_p2), [#allocation20], 4294967264 }
  0x61   : > { %3326 = dma.done.wait (%p2619_p2), [#allocation23], 32  }
  0x62   : > { %3328 = vsyncadd (%p2619_p2), [#allocation23], 4294967264 }
  0x63   : > { %3330 = dma.done.wait (%p2619_p2), [#allocation26], 32  }
  0x64   : > { %3332 = vsyncadd (%p2619_p2), [#allocation26], 4294967264 }
  0x65   : > { %3334 = dma.done.wait (%p2619_p2), [#allocation29], 16  }
  0x66   : > { %3336 = vsyncadd (%p2619_p2), [#allocation29], 4294967280  ;;  %p1085_p6 = scmp.lt.s32.totalorder %s3522_s5, 1  ;;  %s3961_s0 = sld [smem:[#allocation44_spill]]  ;;  %vm1113_vm0 = vcmask 261120   ;;  %vm1140_vm1 = vcmask 64512  }
  0x67   : > { %s3962_s3 = sld [smem:[#allocation41_spill]]  ;;  %v2695_v5 = vld [vmem:[#allocation2] ss:$0 sm:$0xff]  ;;  %s3931_s1 = smov 88   ;;  %vm2047_vm9 = vcmask 523264  }
  0x68   : > { %s3977_s5 = smov (!%p1085_p6, %s3522_s5), 1  ;;  %s3935_s9 = smov 96  }
  0x69   : > { %s3670_s28 = sshll.u32 %s3977_s5, 3  ;;  %s3363_s12 = smov 120  }
  0x6a   : > { %s3930_s2 = smov 72   ;;  %s3933_s8 = smov 104  }
  0x6b   : > { %s3932_s29 = smov 80   ;;  %s3963_s4 = sld [smem:[#allocation43_spill]] }
  0x6c   : > { %v1102_v0 = vld [vmem:[%s3961_s0 + $0x18] sm:$0xff]  ;;  %v1101_v1 = vld [vmem:[%s3961_s0 + $0x10] sm:$0xff]  ;;  %v1100_v2 = vld [vmem:[%s3961_s0 + $0x8] sm:$0xff]  ;;  %s3367_s27 = smov 64   ;;  %s3964_s7 = sld [smem:[#allocation46_spill]] }
  0x6d   : > { %s1088_s10 = scalar_lea.vmem %s3962_s3, %s3670_s28  ;;  %1129 = vmatpush.msra.mxu0 %v1102_v0  ;;  %v1099_v3 = vld [vmem:[%s3961_s0] sm:$0xff]  ;;  %s3368_s3 = smov 112  }
  0x6e   : > { %v3688_v4 = vld [vmem:[%s1088_s10] sm:$0xff]  ;;  %s3369_s11 = smov 48   ;;  %s3370_s6 = smov 56  }
  0x6f   : > { %1130 = vmatpush.msra.mxu0 %v1101_v1  ;;  %s3371_s30 = smov 40  }
  0x71   : > { %1131 = vmatpush.msra.mxu0 %v1100_v2  ;;  %v1109_v15 = vld [vmem:[%s3963_s4] sm:$0xff]  ;;  %s3966_s4 = sld [smem:[#allocation52_spill]] }
  0x72   : > { %s3965_s5 = smov %s3964_s7  ;;  %v1104_v28 = vld [vmem:[%s3964_s7] sm:$0xff]  ;;  %s3972_s7 = smov 88  }
  0x73   : > { %1132 = vmatpush.msra.mxu0 %v1099_v3 }
  0x74   : > { %2452 = vmatmul.msk.f32.vlgmr.msra.gmra.mxu0 %vm1113_vm0, %v3688_v4 }
  0xf1   : > { %v1134_v6 = vpop.f32.mrf.mxu0 }
  0xf2   : > { %v3692_v7 = vadd.f32 %v2695_v5, %v1134_v6 }
  0xf4   : > { %1206 = vrot.lane.b32.xlu2 %v3692_v7, %s3931_s1  ;;  %1138 = vrot.lane.b32.xlu0 %v3692_v7, %s3935_s9  ;;  %s3967_s1 = sld [smem:[#allocation42_spill]] }
  0xfc   : > { %1204 = vrot.lane.b32.xlu2 %v3692_v7, %s3363_s12 }
 0x104   : > { %1410 = vrot.lane.b32.xlu2 %v3692_v7, %s3930_s2 }
 0x10c   : > { %1408 = vrot.lane.b32.xlu2 %v3692_v7, %s3933_s8 }
 0x114   : > { %1319 = vrot.lane.b32.xlu2 %v3692_v7, %s3932_s29  ;;  %s1092_s29 = scalar_lea.vmem %s3967_s1, %s3670_s28 }
 0x14e   : > { %v1207_v8 = vpop.permute.xlu2 %1206 }
 0x156   : > { %v1205_v9 = vpop.permute.xlu2 %1204 }
 0x15e   : > { %v1411_v10 = vpop.permute.xlu2 %1410 }
 0x166   : > { %v1409_v11 = vpop.permute.xlu2 %1408  ;;  %v1139_v12 = vpop.permute.xlu0 %1138 }
 0x167   : > { %2453 = vmatpush.xpose.msk.msra.mxu1 %vm1140_vm1, %v1139_v12  ;;  %v1107_v12 = vld [vmem:[%s3965_s5 + $0x18] sm:$0xff] }
 0x16a   : > { %2454 = vmatmul.msk.f32.vlgmr.msra.gmra.mxu1 %vm1140_vm1, %v3692_v7 }
 0x16e   : > { %v1320_v13 = vpop.permute.xlu2 %1319 }
 0x16f   : > { %2461 = vmatpush.xpose.msk.msrb.mxu0 %vm1140_vm1, %v1320_v13 }
 0x1e7   : > { %v1162_v14 = vpop.f32.mrf.mxu1 }
 0x1e8   : > { %v1165_v16 = vmul.f32 0.35355338, %v1162_v14 }
 0x1ea   : > { %v1166_v17 = vadd.f32 %v1165_v16, %v1109_v15 }
 0x1ec   : > { %v1167_v18 = vsel %vm1140_vm1, %v1166_v17, -inf }
 0x1ed   : > { %1168 = vmax.xlane.f32.xlu0 %v1167_v18  ;;  %v2696_v18 = vld [vmem:[#allocation4] ss:$0 sm:$0xff] }
 0x260   : > { %v1169_v19 = vpop.xlane.xlu0 %1168 }
 0x261   : > { %v1170_v20 = vsub.f32 %v1166_v17, %v1169_v19 }
 0x263   : > { %v1171_v21 = vmul.f32 1.442695, %v1170_v20 }
 0x265   : > { %2711 = vpow2.f32 %v1171_v21 }
 0x26b   : > { %v2712_v22 = vpop.eup %2711 }
 0x26c   : > { %v1173_v23 = vsel %vm1140_vm1, %v2712_v22, 0.0 }
 0x26d   : > { %1174 = vadd.xlane.f32.xlu1 %v1173_v23 }
 0x286   : > { %1178 = vrot.lane.b32.xlu1 %v3692_v7, %s3367_s27  ;;  %s3968_s27 = sld [smem:[#allocation50_spill]] }
 0x28e   : > { %1317 = vrot.lane.b32.xlu1 %v3692_v7, %s3368_s3 }
 0x2e0   : > { %v1175_v24 = vpop.xlane.xlu1 %1174 }
 0x2e1   : > { %2713 = vrcp.f32 %v1175_v24  ;;  %v3372_v24 = vmov 32.0  }
 0x2e7   : > { %v2714_v25 = vpop.eup %2713 }
 0x2e8   : > { %v1177_v27 = vmul.f32 %v2714_v25, %v2712_v22 }
 0x2f8   : > { %v1179_v26 = vpop.permute.xlu1 %1178 }
 0x2f9   : > { %1199 = vmatpush.msra.mxu3 %v1179_v26 }
 0x2fa   : > { %2455 = vmatmul.msk.f32.vlgmr.msra.gmra.mxu3 %vm1140_vm1, %v1177_v27 }
 0x2fb   : > { %2456 = vmatpush.xpose.msk.msrb.mxu3 %vm1140_vm1, %v1207_v8 }
 0x2ff   : > { %1312 = vmatpush.msra.mxu3 %v1104_v28 }
 0x300   : > { %v1318_v29 = vpop.permute.xlu1 %1317 }
 0x301   : > { %2462 = vmatmul.msk.f32.vlgmr.msrb.gmra.mxu0 %vm1140_vm1, %v1318_v29 }
 0x302   : > { %2457 = vmatmul.msk.f32.vlgmr.msrb.gmra.mxu3 %vm1140_vm1, %v1205_v9  ;;  %v1105_v9 = vld [vmem:[%s3965_s5 + $0x8] sm:$0xff] }
 0x303   : > { %2465 = vmatpush.xpose.msk.msrb.mxu3 %vm1140_vm1, %v1411_v10  ;;  %1289 = vmatpush.msrb.mxu1 %v1105_v9 }
 0x37d   : > { %v1201_v30 = vpop.f32.mrf.mxu3 }
 0x37e   : > { %2460 = vmatmul.msk.f32.vlgmr.msra.gmra.mxu3 %vm1140_vm1, %v1201_v30  ;;  %v1342_v31 = vpop.f32.mrf.mxu0 }
 0x37f   : > { %v1345_v32 = vmul.f32 0.35355338, %v1342_v31 }
 0x381   : > { %v1346_v33 = vadd.f32 %v1345_v32, %v1109_v15 }
 0x383   : > { %v1347_v34 = vsel %vm1140_vm1, %v1346_v33, -inf }
 0x384   : > { %1348 = vmax.xlane.f32.xlu1 %v1347_v34 }
 0x385   : > { %v1229_v35 = vpop.f32.mrf.mxu3 }
 0x386   : > { %v1232_v36 = vmul.f32 0.35355338, %v1229_v35  ;;  %2466 = vmatmul.msk.f32.vlgmr.msrb.gmra.mxu3 %vm1140_vm1, %v1409_v11  ;;  %v1551_v35 = vld [vmem:[%s3966_s4 + $0x18] sm:$0xff] }
 0x387   : > { %1602 = vmatpush.msra.mxu3 %v1551_v35 }
 0x388   : > { %v1233_v37 = vadd.f32 %v1232_v36, %v1109_v15  ;;  %v1550_v36 = vld [vmem:[%s3966_s4 + $0x10] sm:$0xff] }
 0x389   : > { %1603 = vmatpush.msra.mxu3 %v1550_v36 }
 0x38a   : > { %v1234_v38 = vsel %vm1140_vm1, %v1233_v37, -inf }
 0x38b   : > { %1235 = vmax.xlane.f32.xlu2 %v1234_v38  ;;  %v1548_v38 = vld [vmem:[%s3966_s4] sm:$0xff] }
 0x39d   : > { %1358 = vrot.lane.b32.xlu1 %v3692_v7, %s3369_s11  ;;  %s3973_s11 = smov 72  }
 0x3f7   : > { %v1349_v44 = vpop.xlane.xlu1 %1348 }
 0x3f8   : > { %v1350_v47 = vsub.f32 %v1346_v33, %v1349_v44 }
 0x3fa   : > { %v1351_v49 = vmul.f32 1.442695, %v1350_v47 }
 0x3fe   : > { %v1236_v40 = vpop.xlane.xlu2 %1235 }
 0x3ff   : > { %v1237_v41 = vsub.f32 %v1233_v37, %v1236_v40  ;;  %v1549_v37 = vld [vmem:[%s3966_s4 + $0x8] sm:$0xff]  ;;  %v1546_v40 = vld [vmem:[%s3968_s27 + $0x18] sm:$0xff] }
 0x400   : > { %1604 = vmatpush.msra.mxu3 %v1549_v37 }
 0x401   : > { %v3731_v39 = vpop.f32.mrf.mxu3  ;;  %v1238_v42 = vmul.f32 1.442695, %v1237_v41  ;;  %v1545_v41 = vld [vmem:[%s3968_s27 + $0x10] sm:$0xff] }
 0x402   : > { %1605 = vmatpush.msra.mxu3 %v1548_v38 }
 0x403   : > { %2715 = vpow2.f32 %v1238_v42  ;;  %v1544_v42 = vld [vmem:[%s3968_s27 + $0x8] sm:$0xff] }
 0x404   : > { %2717 = vpow2.f32 %v1351_v49 }
 0x409   : > { %v1433_v43 = vpop.f32.mrf.mxu3  ;;  %v2716_v50 = vpop.eup %2715 }
 0x40a   : > { %v1436_v45 = vmul.f32 0.35355338, %v1433_v43  ;;  %v1240_v51 = vsel %vm1140_vm1, %v2716_v50, 0.0  ;;  %v2718_v52 = vpop.eup %2717  ;;  %v1543_v43 = vld [vmem:[%s3968_s27] sm:$0xff] }
 0x40b   : > { %v1353_v53 = vsel %vm1140_vm1, %v2718_v52, 0.0 }
 0x40c   : > { %v1437_v46 = vadd.f32 %v1436_v45, %v1109_v15 }
 0x40e   : > { %v1438_v48 = vsel %vm1140_vm1, %v1437_v46, -inf }
 0x40f   : > { %1439 = vmax.xlane.f32.xlu0 %v1438_v48  ;;  %v1359_v0 = vpop.permute.xlu1 %1358 }
 0x417   : > { %1241 = vadd.xlane.f32.xlu0 %v1240_v51 }
 0x41f   : > { %1354 = vadd.xlane.f32.xlu0 %v1353_v53  ;;  %v2697_v53 = vld [vmem:[#allocation6] ss:$0 sm:$0xff] }
 0x433   : > { %1245 = vrot.lane.b32.xlu0 %v3692_v7, %s3370_s6  ;;  %s3974_s6 = sld [smem:[#allocation55_spill]] }
 0x482   : > { %v1440_v54 = vpop.xlane.xlu0 %1439 }
 0x483   : > { %v1441_v55 = vsub.f32 %v1437_v46, %v1440_v54 }
 0x485   : > { %v1442_v56 = vmul.f32 1.442695, %v1441_v55 }
 0x487   : > { %2719 = vpow2.f32 %v1442_v56  ;;  %v2698_v56 = vld [vmem:[#allocation7] ss:$0 sm:$0xff] }
 0x48a   : > { %v1242_v59 = vpop.xlane.xlu0 %1241 }
 0x48b   : > { %2721 = vrcp.f32 %v1242_v59  ;;  %v2699_v59 = vld [vmem:[#allocation10] ss:$0 sm:$0xff] }
 0x48d   : > { %v2720_v57 = vpop.eup %2719 }
 0x48e   : > { %v1444_v58 = vsel %vm1140_vm1, %v2720_v57, 0.0 }
 0x48f   : > { %1445 = vadd.xlane.f32.xlu2 %v1444_v58 }
 0x491   : > { %v2722_v61 = vpop.eup %2721 }
 0x492   : > { %v1355_v60 = vpop.xlane.xlu0 %1354  ;;  %v1244_v63 = vmul.f32 %v2722_v61, %v2716_v50 }
 0x493   : > { %2723 = vrcp.f32 %v1355_v60 }
 0x499   : > { %v2724_v1 = vpop.eup %2723 }
 0x49a   : > { %v1357_v2 = vmul.f32 %v2724_v1, %v2718_v52 }
 0x4a5   : > { %v1246_v62 = vpop.permute.xlu0 %1245 }
 0x4a6   : > { %1266 = vmatpush.msra.mxu2 %v1246_v62  ;;  %v2700_v62 = vld [vmem:[#allocation9] ss:$0 sm:$0xff] }
 0x4a7   : > { %1449 = vrot.lane.b32.xlu2 %v3692_v7, %s3371_s30  ;;  %2458 = vmatmul.msk.f32.vlgmr.msra.gmra.mxu2 %vm1140_vm1, %v1244_v63  ;;  %v1106_v7 = vld [vmem:[%s3965_s5 + $0x10] sm:$0xff]  ;;  %s1096_s30 = scalar_lea.vmem %s3974_s6, %s3670_s28 }
 0x4a8   : > { %1379 = vmatpush.msrb.mxu2 %v1359_v0  ;;  %1402 = vmatpush.msra.mxu1 %v1106_v7 }
 0x4aa   : > { %1493 = vmatpush.msra.mxu2 %v1107_v12 }
 0x4af   : > { %2463 = vmatmul.msk.f32.vlgmr.msrb.gmra.mxu2 %vm1140_vm1, %v1357_v2 }
 0x502   : > { %v1446_v3 = vpop.xlane.xlu2 %1445 }
 0x503   : > { %2725 = vrcp.f32 %v1446_v3 }
 0x504   : > { %2727 = vrcp.f32 %v3372_v24  ;;  %v1553_v24 = vld [vmem:[#allocation12] sm:$0xff] }
 0x509   : > { %v2726_v5 = vpop.eup %2725 }
 0x50a   : > { %v1448_v6 = vmul.f32 %v2726_v5, %v2720_v57  ;;  %v1450_v8 = vpop.permute.xlu2 %1449  ;;  %v2728_v25 = vpop.eup %2727 }
 0x50b   : > { %1470 = vmatpush.msra.mxu0 %v1450_v8  ;;  %v1510_v26 = vmul.f32 32.0, %v2728_v25  ;;  %vm1514_vm2 = vweird.f32 %v2728_v25 }
 0x50c   : > { %2467 = vmatmul.msk.f32.vlgmr.msra.gmra.mxu0 %vm1140_vm1, %v1448_v6 }
 0x50d   : > { %v1511_v27 = vsub.f32 1.0, %v1510_v26 }
 0x50f   : > { %v1512_v28 = vmul.f32 %v2728_v25, %v1511_v27 }
 0x511   : > { %v1513_v29 = vadd.f32 %v2728_v25, %v1512_v28 }
 0x513   : > { %v3757_v30 = vsel %vm1514_vm2, %v2728_v25, %v1513_v29 }
 0x52a   : > { %v1268_v10 = vpop.f32.mrf.mxu2 }
 0x52b   : > { %2459 = vmatmul.msk.f32.vlgmr.msrb.gmra.mxu1 %vm1140_vm1, %v1268_v10 }
 0x52c   : > { %1576 = vmatpush.msrb.mxu1 %v1546_v40 }
 0x52e   : > { %1577 = vmatpush.msrb.mxu1 %v1545_v41 }
 0x530   : > { %1578 = vmatpush.msrb.mxu1 %v1544_v42 }
 0x532   : > { %v1381_v11 = vpop.f32.mrf.mxu2  ;;  %1579 = vmatpush.msrb.mxu1 %v1543_v43 }
 0x533   : > { %2464 = vmatmul.msk.f32.vlgmr.msra.gmra.mxu1 %vm1140_vm1, %v1381_v11 }
 0x589   : > { %v1472_v13 = vpop.f32.mrf.mxu0 }
 0x58a   : > { %2468 = vmatmul.msk.f32.vlgmr.msra.gmra.mxu2 %vm1140_vm1, %v1472_v13 }
 0x5a8   : > { %v1291_v14 = vpop.f32.mrf.mxu1 }
 0x5a9   : > { %v1315_v16 = vadd.f32 %v3731_v39, %v1291_v14  ;;  %v1098_v39 = vld [vmem:[%s1092_s29] sm:$0xff]  ;;  %s3969_s29 = smov 96  }
 0x5aa   : > { %2470 = vmatmul.msk.f32.vlgmr.msra.gmra.mxu3 %vm1113_vm0, %v1098_v39 }
 0x5b0   : > { %v1404_v15 = vpop.f32.mrf.mxu1 }
 0x5b1   : > { %v1407_v17 = vadd.f32 %v1404_v15, %v1315_v16 }
 0x60d   : > { %v1495_v19 = vpop.f32.mrf.mxu2 }
 0x60e   : > { %v1498_v20 = vadd.f32 %v1495_v19, %v1407_v17 }
 0x610   : > { %v1502_v21 = vadd.f32 %v2696_v18, %v1498_v20 }
 0x612   : > { %v1503_v22 = vadd.f32 %v1502_v21, %v3688_v4 }
 0x614   : > { %v1506_v23 = vsel %vm1113_vm0, %v1503_v22, 0.0 }
 0x615   : > { %1507 = vadd.xlane.f32.xlu0 %v1506_v23 }
 0x62d   : > { %v1607_v60 = vpop.f32.mrf.mxu3 }
 0x62e   : > { %v3795_v61 = vadd.f32 %v2699_v59, %v1607_v60 }
 0x630   : > { %2471 = vmatpush.xpose.msk.msrb.mxu0 %vm1140_vm1, %v3795_v61 }
 0x688   : > { %v1508_v31 = vpop.xlane.xlu0 %1507 }
 0x689   : > { %v1516_v32 = vmul.f32 %v3757_v30, %v1508_v31 }
 0x68b   : > { %v1517_v33 = vsub.f32 %v1503_v22, %v1516_v32 }
 0x68d   : > { %v1518_v34 = vmul.f32 %v1517_v33, %v1517_v33 }
 0x68f   : > { %v1519_v4 = vsel %vm1113_vm0, %v1518_v34, 0.0 }
 0x690   : > { %1520 = vadd.xlane.f32.xlu1 %v1519_v4 }
 0x6a9   : > { %1676 = vrot.lane.b32.xlu1 %v3795_v61, %s3363_s12 }
 0x6b1   : > { %1788 = vrot.lane.b32.xlu1 %v3795_v61, %s3368_s3 }
 0x703   : > { %v1521_v44 = vpop.xlane.xlu1 %1520 }
 0x704   : > { %v1522_v45 = vmul.f32 %v1521_v44, %v3757_v30 }
 0x706   : > { %v1523_v46 = vadd.f32 1e-05, %v1522_v45 }
 0x708   : > { %2729 = vrsqrt.f32 %v1523_v46  ;;  %vm1530_vm4 = vweird.f32 %v1523_v46 }
 0x70e   : > { %v2730_v47 = vpop.eup %2729 }
 0x70f   : > { %v1525_v48 = vmul.f32 %v2730_v47, %v1523_v46  ;;  %vm1531_vm3 = vweird.f32 %v2730_v47 }
 0x710   : > { %vm1532_vm5 = vmor %vm1530_vm4, %vm1531_vm3 }
 0x711   : > { %v1526_v49 = vmul.f32 %v2730_v47, %v1525_v48 }
 0x713   : > { %v1527_v50 = vmul.f32 0.5, %v1526_v49 }
 0x715   : > { %v1528_v51 = vsub.f32 1.5, %v1527_v50 }
 0x717   : > { %v1529_v52 = vmul.f32 %v2730_v47, %v1528_v51 }
 0x719   : > { %v1533_v54 = vsel %vm1532_vm5, %v2730_v47, %v1529_v52 }
 0x71a   : > { %v1534_v55 = vmul.f32 %v1533_v54, %v1517_v33 }
 0x71b   : > { %v1677_v1 = vpop.permute.xlu1 %1676 }
 0x71c   : > { %v1538_v57 = vmul.f32 %v2697_v53, %v1534_v55  ;;  %2474 = vmatpush.xpose.msk.msra.mxu1 %vm1140_vm1, %v1677_v1  ;;  %v1554_v55 = vld [vmem:[#allocation12 + $0x8] sm:$0xff]  ;;  %v1556_v1 = vld [vmem:[#allocation12 + $0x18] sm:$0xff] }
 0x71d   : > { %1758 = vmatpush.msra.mxu0 %v1554_v55 }
 0x71e   : > { %v3791_v58 = vadd.f32 %v2698_v56, %v1538_v57  ;;  %v1555_v56 = vld [vmem:[#allocation12 + $0x10] sm:$0xff] }
 0x720   : > { %2469 = vmatmul.msk.f32.vlgmr.msrb.gmra.mxu1 %vm1113_vm0, %v3791_v58 }
 0x723   : > { %v1789_v2 = vpop.permute.xlu1 %1788 }
 0x724   : > { %2479 = vmatpush.xpose.msk.msrb.mxu1 %vm1140_vm1, %v1789_v2 }
 0x79d   : > { %v1581_v63 = vpop.f32.mrf.mxu1 }
 0x79e   : > { %v1582_v0 = vadd.f32 %v2700_v62, %v1581_v63 }
 0x7a0   : > { %2472 = vmatmul.msk.f32.vlgmr.msrb.gmra.mxu0 %vm1140_vm1, %v1582_v0 }
 0x7a1   : > { %1870 = vmatpush.msrb.mxu0 %v1555_v56 }
 0x81d   : > { %v1633_v3 = vpop.f32.mrf.mxu0 }
 0x81e   : > { %v1636_v5 = vmul.f32 0.35355338, %v1633_v3 }
 0x820   : > { %v1637_v6 = vsel %vm1140_vm1, %v1636_v5, -inf }
 0x821   : > { %1638 = vmax.xlane.f32.xlu2 %v1637_v6 }
 0x839   : > { %1674 = vrot.lane.b32.xlu2 %v1582_v0, %s3363_s12  ;;  %s3970_s12 = smov 104  }
 0x841   : > { %1786 = vrot.lane.b32.xlu2 %v1582_v0, %s3368_s3  ;;  %s3971_s3 = smov 80  }
 0x894   : > { %v1639_v8 = vpop.xlane.xlu2 %1638 }
 0x895   : > { %v1640_v9 = vsub.f32 %v1636_v5, %v1639_v8  ;;  %v2701_v8 = vld [vmem:[#allocation13] ss:$0 sm:$0xff] }
 0x897   : > { %v1641_v7 = vmul.f32 1.442695, %v1640_v9 }
 0x899   : > { %2731 = vpow2.f32 %v1641_v7 }
 0x89c   : > { %v1675_v10 = vpop.permute.xlu2 %1674 }
 0x89d   : > { %2475 = vmatmul.msk.f32.vlgmr.msra.gmra.mxu1 %vm1140_vm1, %v1675_v10 }
 0x89f   : > { %v2732_v11 = vpop.eup %2731 }
 0x8a0   : > { %v1643_v12 = vsel %vm1140_vm1, %v2732_v11, 0.0 }
 0x8a1   : > { %1644 = vadd.xlane.f32.xlu0 %v1643_v12 }
 0x8a4   : > { %v1787_v13 = vpop.permute.xlu2 %1786 }
 0x8a5   : > { %2480 = vmatmul.msk.f32.vlgmr.msrb.gmra.mxu1 %vm1140_vm1, %v1787_v13 }
 0x8b5   : > { %1648 = vrot.lane.b32.xlu0 %v3795_v61, %s3969_s29 }
 0x8bd   : > { %1878 = vrot.lane.b32.xlu0 %v3795_v61, %s3970_s12 }
 0x8c5   : > { %1876 = vrot.lane.b32.xlu0 %v1582_v0, %s3970_s12 }
 0x914   : > { %v1645_v15 = vpop.xlane.xlu0 %1644 }
 0x915   : > { %2733 = vrcp.f32 %v1645_v15 }
 0x91a   : > { %v1699_v14 = vpop.f32.mrf.mxu1 }
 0x91b   : > { %v1702_v16 = vmul.f32 0.35355338, %v1699_v14  ;;  %v2734_v20 = vpop.eup %2733 }
 0x91c   : > { %v1647_v22 = vmul.f32 %v2734_v20, %v2732_v11  ;;  %v2004_v20 = vld [vmem:[#allocation18 + $0x8] sm:$0xff] }
 0x91d   : > { %v1703_v17 = vsel %vm1140_vm1, %v1702_v16, -inf }
 0x91e   : > { %1704 = vmax.xlane.f32.xlu0 %v1703_v17 }
 0x922   : > { %v1811_v18 = vpop.f32.mrf.mxu1 }
 0x923   : > { %v1814_v19 = vmul.f32 0.35355338, %v1811_v18  ;;  %v2006_v18 = vld [vmem:[#allocation18 + $0x18] sm:$0xff] }
 0x925   : > { %v1815_v21 = vsel %vm1140_vm1, %v1814_v19, -inf }
 0x926   : > { %1816 = vmax.xlane.f32.xlu1 %v1815_v21  ;;  %v2003_v21 = vld [vmem:[#allocation18] sm:$0xff] }
 0x927   : > { %v1649_v23 = vpop.permute.xlu0 %1648 }
 0x928   : > { %1669 = vmatpush.msrb.mxu2 %v1649_v23  ;;  %v2040_v23 = vld [vmem:[%s3916_s19 + $0x28] sm:$0xff] }
 0x929   : > { %2473 = vmatmul.msk.f32.vlgmr.msrb.gmra.mxu2 %vm1140_vm1, %v1647_v22  ;;  %v2041_v22 = vld [vmem:[%s3916_s19 + $0x30] sm:$0xff] }
 0x92a   : > { %1781 = vmatpush.msra.mxu2 %v1553_v24 }
 0x92f   : > { %v1879_v25 = vpop.permute.xlu0 %1878 }
 0x930   : > { %2483 = vmatpush.xpose.msk.msrb.mxu2 %vm1140_vm1, %v1879_v25 }
 0x937   : > { %v1877_v26 = vpop.permute.xlu0 %1876 }
 0x991   : > { %v1705_v27 = vpop.xlane.xlu0 %1704 }
 0x992   : > { %v1706_v28 = vsub.f32 %v1702_v16, %v1705_v27 }
 0x994   : > { %v1707_v29 = vmul.f32 1.442695, %v1706_v28  ;;  %v2038_v28 = vld [vmem:[%s3916_s19 + $0x18] sm:$0xff] }
 0x996   : > { %2735 = vpow2.f32 %v1707_v29 }
 0x999   : > { %v1817_v31 = vpop.xlane.xlu1 %1816 }
 0x99a   : > { %v1818_v32 = vsub.f32 %v1814_v19, %v1817_v31  ;;  %v2005_v19 = vld [vmem:[#allocation18 + $0x10] sm:$0xff] }
 0x99c   : > { %v2736_v33 = vpop.eup %2735  ;;  %v1819_v34 = vmul.f32 1.442695, %v1818_v32 }
 0x99d   : > { %v1709_v4 = vsel %vm1140_vm1, %v2736_v33, 0.0 }
 0x99e   : > { %2737 = vpow2.f32 %v1819_v34  ;;  %1710 = vadd.xlane.f32.xlu0 %v1709_v4 }
 0x9a4   : > { %v2738_v35 = vpop.eup %2737 }
 0x9a5   : > { %v1821_v36 = vsel %vm1140_vm1, %v2738_v35, 0.0 }
 0x9a6   : > { %1822 = vadd.xlane.f32.xlu1 %v1821_v36 }
 0x9ac   : > { %v1671_v37 = vpop.f32.mrf.mxu2 }
 0x9ad   : > { %2478 = vmatmul.msk.f32.vlgmr.msra.gmra.mxu2 %vm1140_vm1, %v1671_v37 }
 0x9b5   : > { %2484 = vmatmul.msk.f32.vlgmr.msrb.gmra.mxu2 %vm1140_vm1, %v1877_v26  ;;  %v2039_v26 = vld [vmem:[%s3916_s19 + $0x20] sm:$0xff] }
 0x9bf   : > { %1826 = vrot.lane.b32.xlu1 %v3795_v61, %s3971_s3 }
 0xa11   : > { %v1711_v42 = vpop.xlane.xlu0 %1710 }
 0xa12   : > { %2739 = vrcp.f32 %v1711_v42  ;;  %v2036_v42 = vld [vmem:[%s3916_s19 + $0x8] sm:$0xff] }
 0xa18   : > { %v2740_v47 = vpop.eup %2739 }
 0xa19   : > { %v1823_v45 = vpop.xlane.xlu1 %1822  ;;  %v1713_v48 = vmul.f32 %v2740_v47, %v2736_v33 }
 0xa30   : > { %v1783_v38 = vpop.f32.mrf.mxu2 }
 0xa31   : > { %v1827_v50 = vpop.permute.xlu1 %1826 }
 0xa38   : > { %v1901_v39 = vpop.f32.mrf.mxu2 }
 0xa39   : > { %v1904_v40 = vmul.f32 0.35355338, %v1901_v39 }
 0xa3b   : > { %v1905_v41 = vsel %vm1140_vm1, %v1904_v40, -inf }
 0xa3c   : > { %1906 = vmax.xlane.f32.xlu2 %v1905_v41  ;;  %v2037_v41 = vld [vmem:[%s3916_s19 + $0x10] sm:$0xff] }
 0xa54   : > { %1714 = vrot.lane.b32.xlu2 %v3795_v61, %s3972_s7 }
 0xaaf   : > { %v1907_v43 = vpop.xlane.xlu2 %1906 }
 0xab0   : > { %v1908_v44 = vsub.f32 %v1904_v40, %v1907_v43  ;;  %v2035_v43 = vld [vmem:[%s3916_s19] sm:$0xff] }
 0xab2   : > { %v1909_v46 = vmul.f32 1.442695, %v1908_v44  ;;  %v2704_v44 = vld [vmem:[#allocation19] ss:$0 sm:$0xff] }
 0xab4   : > { %2741 = vpow2.f32 %v1909_v46 }
 0xab5   : > { %2743 = vrcp.f32 %v1823_v45 }
 0xab7   : > { %v1715_v49 = vpop.permute.xlu2 %1714 }
 0xab8   : > { %1735 = vmatpush.msrb.mxu3 %v1715_v49 }
 0xab9   : > { %2476 = vmatmul.msk.f32.vlgmr.msrb.gmra.mxu3 %vm1140_vm1, %v1713_v48  ;;  %v2705_v48 = vld [vmem:[#allocation21] ss:$0 sm:$0xff] }
 0xaba   : > { %v2742_v51 = vpop.eup %2741  ;;  %1847 = vmatpush.msra.mxu3 %v1827_v50 }
 0xabb   : > { %v1911_v52 = vsel %vm1140_vm1, %v2742_v51, 0.0  ;;  %v2744_v53 = vpop.eup %2743 }
 0xabc   : > { %1912 = vadd.xlane.f32.xlu0 %v1911_v52  ;;  %v1825_v54 = vmul.f32 %v2744_v53, %v2738_v35  ;;  %1960 = vmatpush.msrb.mxu3 %v1556_v1  ;;  %v2702_v35 = vld [vmem:[#allocation15] ss:$0 sm:$0xff] }
 0xac1   : > { %2481 = vmatmul.msk.f32.vlgmr.msra.gmra.mxu3 %vm1140_vm1, %v1825_v54 }
 0xad0   : > { %1916 = vrot.lane.b32.xlu0 %v3795_v61, %s3973_s11 }
 0xb2f   : > { %v1913_v57 = vpop.xlane.xlu0 %1912 }
 0xb30   : > { %2745 = vrcp.f32 %v1913_v57 }
 0xb36   : > { %v2746_v60 = vpop.eup %2745 }
 0xb37   : > { %v1915_v62 = vmul.f32 %v2746_v60, %v2742_v51 }
 0xb3c   : > { %v1737_v59 = vpop.f32.mrf.mxu3 }
 0xb3d   : > { %2477 = vmatmul.msk.f32.vlgmr.msra.gmra.mxu0 %vm1140_vm1, %v1737_v59 }
 0xb3e   : > { %2026 = vmatpush.msra.mxu0 %v2006_v18  ;;  %v2138_v18 = vld [vmem:[%s3922_s25 + $0x10] sm:$0xff] }
 0xb40   : > { %2027 = vmatpush.msra.mxu0 %v2005_v19  ;;  %v2137_v19 = vld [vmem:[%s3922_s25 + $0x8] sm:$0xff] }
 0xb42   : > { %v1917_v63 = vpop.permute.xlu0 %1916  ;;  %2028 = vmatpush.msra.mxu0 %v2004_v20  ;;  %v2136_v20 = vld [vmem:[%s3922_s25] sm:$0xff] }
 0xb43   : > { %1937 = vmatpush.msra.mxu1 %v1917_v63 }
 0xb44   : > { %v1849_v0 = vpop.f32.mrf.mxu3  ;;  %2485 = vmatmul.msk.f32.vlgmr.msra.gmra.mxu1 %vm1140_vm1, %v1915_v62  ;;  %2029 = vmatpush.msra.mxu0 %v2003_v21 }
 0xb45   : > { %2482 = vmatmul.msk.f32.vlgmr.msrb.gmra.mxu0 %vm1140_vm1, %v1849_v0 }
 0xbba   : > { %v1760_v2 = vpop.f32.mrf.mxu0 }
 0xbbb   : > { %v1784_v5 = vadd.f32 %v1783_v38, %v1760_v2  ;;  %v2703_v38 = vld [vmem:[#allocation16] ss:$0 sm:$0xff] }
 0xbc1   : > { %v1939_v61 = vpop.f32.mrf.mxu1 }
 0xbc2   : > { %2486 = vmatmul.msk.f32.vlgmr.msrb.gmra.mxu3 %vm1140_vm1, %v1939_v61  ;;  %v1872_v3 = vpop.f32.mrf.mxu0  ;;  %vm2167_vm1 = vcmask 31744  }
 0xbc3   : > { %v1875_v6 = vadd.f32 %v1872_v3, %v1784_v5  ;;  %v2706_v5 = vld [vmem:[#allocation22] ss:$0 sm:$0xff] }
 0xc45   : > { %v1962_v9 = vpop.f32.mrf.mxu3 }
 0xc46   : > { %v1965_v7 = vadd.f32 %v1962_v9, %v1875_v6  ;;  %v2707_v9 = vld [vmem:[#allocation24] ss:$0 sm:$0xff] }
 0xc48   : > { %v1969_v10 = vadd.f32 %v2701_v8, %v1965_v7 }
 0xc4a   : > { %v1970_v11 = vadd.f32 %v1969_v10, %v3791_v58  ;;  %v2042_v58 = vld [vmem:[%s3916_s19 + $0x38] sm:$0xff] }
 0xc4b   : > { %2059 = vmatpush.msra.mxu2 %v2042_v58 }
 0xc4c   : > { %v1973_v12 = vsel %vm1113_vm0, %v1970_v11, 0.0 }
 0xc4d   : > { %1974 = vadd.xlane.f32.xlu2 %v1973_v12  ;;  %2060 = vmatpush.msra.mxu2 %v2041_v22 }
 0xc4f   : > { %2061 = vmatpush.msra.mxu2 %v2040_v23 }
 0xc51   : > { %2062 = vmatpush.msra.mxu2 %v2039_v26 }
 0xc53   : > { %2063 = vmatpush.msra.mxu2 %v2038_v28 }
 0xc55   : > { %2064 = vmatpush.msra.mxu2 %v2037_v41 }
 0xc57   : > { %2065 = vmatpush.msra.mxu2 %v2036_v42 }
 0xc59   : > { %2066 = vmatpush.msra.mxu2 %v2035_v43 }
 0xcc0   : > { %v1975_v13 = vpop.xlane.xlu2 %1974 }
 0xcc1   : > { %v1976_v14 = vmul.f32 %v1975_v13, %v3757_v30 }
 0xcc3   : > { %v1977_v15 = vsub.f32 %v1970_v11, %v1976_v14 }
 0xcc5   : > { %v1978_v16 = vmul.f32 %v1977_v15, %v1977_v15 }
 0xcc7   : > { %v1979_v17 = vsel %vm1113_vm0, %v1978_v16, 0.0 }
 0xcc8   : > { %1980 = vadd.xlane.f32.xlu0 %v1979_v17  ;;  %v2139_v17 = vld [vmem:[%s3922_s25 + $0x18] sm:$0xff] }
 0xcc9   : > { %2159 = vmatpush.msrb.mxu1 %v2139_v17 }
 0xccb   : > { %2160 = vmatpush.msrb.mxu1 %v2138_v18 }
 0xccd   : > { %2161 = vmatpush.msrb.mxu1 %v2137_v19 }
 0xccf   : > { %2162 = vmatpush.msrb.mxu1 %v2136_v20 }
 0xd3b   : > { %v1981_v24 = vpop.xlane.xlu0 %1980 }
 0xd3c   : > { %v1982_v25 = vmul.f32 %v1981_v24, %v3757_v30 }
 0xd3e   : > { %v1983_v27 = vadd.f32 1e-05, %v1982_v25 }
 0xd40   : > { %2747 = vrsqrt.f32 %v1983_v27  ;;  %vm1990_vm7 = vweird.f32 %v1983_v27 }
 0xd46   : > { %v2748_v29 = vpop.eup %2747 }
 0xd47   : > { %v1985_v31 = vmul.f32 %v2748_v29, %v1983_v27  ;;  %vm1991_vm6 = vweird.f32 %v2748_v29 }
 0xd48   : > { %vm1992_vm8 = vmor %vm1990_vm7, %vm1991_vm6 }
 0xd49   : > { %v1986_v32 = vmul.f32 %v2748_v29, %v1985_v31 }
 0xd4b   : > { %v1987_v33 = vmul.f32 0.5, %v1986_v32 }
 0xd4d   : > { %v1988_v34 = vsub.f32 1.5, %v1987_v33  ;;  %v2709_v33 = vld [vmem:[#allocation27] ss:$0 sm:$0xff] }
 0xd4f   : > { %v1989_v4 = vmul.f32 %v2748_v29, %v1988_v34 }
 0xd51   : > { %v1993_v36 = vsel %vm1992_vm8, %v2748_v29, %v1989_v4  ;;  %v2708_v29 = vld [vmem:[#allocation25] ss:$0 sm:$0xff] }
 0xd52   : > { %v1994_v37 = vmul.f32 %v1993_v36, %v1977_v15 }
 0xd54   : > { %v1998_v39 = vmul.f32 %v2702_v35, %v1994_v37 }
 0xd56   : > { %v2002_v40 = vadd.f32 %v2703_v38, %v1998_v39 }
 0xd58   : > { %2487 = vmatmul.msk.f32.vlgmr.msra.gmra.mxu0 %vm1113_vm0, %v2002_v40 }
 0xdd5   : > { %v2031_v45 = vpop.f32.mrf.mxu0 }
 0xdd6   : > { %v2032_v46 = vadd.f32 %v2704_v44, %v2031_v45 }
 0xdd8   : > { %v2034_v47 = vmax.f32 %v2032_v46, 0.0 }
 0xdda   : > { %2488 = vmatmul.msk.f32.vlgmr.msra.gmra.mxu2 %vm2047_vm9, %v2034_v47 }
 0xe5d   : > { %v2068_v49 = vpop.f32.mrf.mxu2 }
 0xe5e   : > { %v2069_v50 = vadd.f32 %v2705_v48, %v2068_v49 }
 0xe60   : > { %v2071_v51 = vadd.f32 %v2069_v50, %v2002_v40 }
 0xe62   : > { %v2074_v52 = vsel %vm1113_vm0, %v2071_v51, 0.0 }
 0xe63   : > { %2075 = vadd.xlane.f32.xlu1 %v2074_v52 }
 0xed6   : > { %v2076_v53 = vpop.xlane.xlu1 %2075 }
 0xed7   : > { %v2077_v54 = vmul.f32 %v2076_v53, %v3757_v30 }
 0xed9   : > { %v2078_v55 = vsub.f32 %v2071_v51, %v2077_v54 }
 0xedb   : > { %v2079_v56 = vmul.f32 %v2078_v55, %v2078_v55 }
 0xedd   : > { %v2080_v57 = vsel %vm1113_vm0, %v2079_v56, 0.0 }
 0xede   : > { %2081 = vadd.xlane.f32.xlu2 %v2080_v57 }
 0xf51   : > { %v2082_v59 = vpop.xlane.xlu2 %2081 }
 0xf52   : > { %v2083_v60 = vmul.f32 %v2082_v59, %v3757_v30 }
 0xf54   : > { %v2084_v62 = vadd.f32 1e-05, %v2083_v60 }
 0xf56   : > { %2749 = vrsqrt.f32 %v2084_v62  ;;  %vm2091_vm11 = vweird.f32 %v2084_v62 }
 0xf5c   : > { %v2750_v63 = vpop.eup %2749 }
 0xf5d   : > { %v2086_v0 = vmul.f32 %v2750_v63, %v2084_v62  ;;  %vm2092_vm10 = vweird.f32 %v2750_v63 }
 0xf5e   : > { %vm2093_vm12 = vmor %vm2091_vm11, %vm2092_vm10 }
 0xf5f   : > { %v2087_v1 = vmul.f32 %v2750_v63, %v2086_v0 }
 0xf61   : > { %v2088_v61 = vmul.f32 0.5, %v2087_v1 }
 0xf63   : > { %v2089_v2 = vsub.f32 1.5, %v2088_v61 }
 0xf65   : > { %v2090_v3 = vmul.f32 %v2750_v63, %v2089_v2 }
 0xf67   : > { %v2094_v6 = vsel %vm2093_vm12, %v2750_v63, %v2090_v3 }
 0xf68   : > { %v2095_v8 = vmul.f32 %v2094_v6, %v2078_v55 }
 0xf6a   : > { %v2099_v7 = vmul.f32 %v2706_v5, %v2095_v8 }
 0xf6c   : > { %v2103_v10 = vadd.f32 %v2707_v9, %v2099_v7 }
 0xf6e   : > { %v2106_v11 = vsel %vm1113_vm0, %v2103_v10, 0.0 }
 0xf6f   : > { %2107 = vadd.xlane.f32.xlu0 %v2106_v11 }
 0xfe2   : > { %v2108_v12 = vpop.xlane.xlu0 %2107 }
 0xfe3   : > { %v2109_v13 = vmul.f32 %v2108_v12, %v3757_v30 }
 0xfe5   : > { %v2110_v14 = vsub.f32 %v2103_v10, %v2109_v13 }
 0xfe7   : > { %v2111_v15 = vmul.f32 %v2110_v14, %v2110_v14 }
 0xfe9   : > { %v2112_v16 = vsel %vm1113_vm0, %v2111_v15, 0.0 }
 0xfea   : > { %2113 = vadd.xlane.f32.xlu1 %v2112_v16 }
0x105d   : > { %v2114_v21 = vpop.xlane.xlu1 %2113 }
0x105e   : > { %v2115_v58 = vmul.f32 %v2114_v21, %v3757_v30  ;;  %v2710_v30 = vld [vmem:[#allocation28] ss:$0 sm:$0xff] }
0x1060   : > { %v2116_v22 = vadd.f32 1e-05, %v2115_v58 }
0x1062   : > { %2751 = vrsqrt.f32 %v2116_v22  ;;  %vm2123_vm14 = vweird.f32 %v2116_v22 }
0x1068   : > { %v2752_v23 = vpop.eup %2751 }
0x1069   : > { %v2118_v24 = vmul.f32 %v2752_v23, %v2116_v22  ;;  %vm2124_vm13 = vweird.f32 %v2752_v23 }
0x106a   : > { %vm2125_vm15 = vmor %vm2123_vm14, %vm2124_vm13 }
0x106b   : > { %v2119_v25 = vmul.f32 %v2752_v23, %v2118_v24 }
0x106d   : > { %v2120_v26 = vmul.f32 0.5, %v2119_v25 }
0x106f   : > { %v2121_v27 = vsub.f32 1.5, %v2120_v26 }
0x1071   : > { %v2122_v28 = vmul.f32 %v2752_v23, %v2121_v27 }
0x1073   : > { %v2126_v31 = vsel %vm2125_vm15, %v2752_v23, %v2122_v28 }
0x1074   : > { %v2127_v32 = vmul.f32 %v2126_v31, %v2110_v14 }
0x1076   : > { %v2131_v34 = vmul.f32 %v2708_v29, %v2127_v32 }
0x1078   : > { %v2135_v4 = vadd.f32 %v2709_v33, %v2131_v34 }
0x107a   : > { %2489 = vmatmul.msk.f32.vlgmr.msrb.gmra.mxu1 %vm1113_vm0, %v2135_v4 }
0x10f7   : > { %v2164_v35 = vpop.f32.mrf.mxu1 }
0x10f8   : > { %v2165_v36 = vadd.f32 %v2710_v30, %v2164_v35 }
0x10fa   : > { %2168 = vst.msk [vmem:[%s1096_s30] sm:$0xff] %vm2167_vm1, %v2165_v36 }
0x10fb PF: > { %s3975_s10 = sld [smem:[#allocation40_spill]] }
0x1101   : > { %s47_s7 = sadd.s32 1, %s3975_s10  }
0x1102   : > { %p44_p7 = scmp.ge.s32.totalorder %s47_s7, 4  }
0x1104   :  { %46 = sbr.rel (!%p44_p7) target bundleno = 26 (0x1a), region = 234 }
0x1109   :  { %2188 = vsyncpa [#allocation3], 1 }
0x110a   :  { %2190 = vsyncpa [#allocation3 + $0x1], 1 }
0x110b   :  { %2191 = vsyncpa [#allocation5], 1 }
0x110c   :  { %2192 = vsyncpa [#allocation8], 1 }
0x110d   :  { %2193 = vsyncpa [#allocation11], 1 }
0x110e   :  { %2194 = vsyncpa [#allocation14], 1 }
0x110f   :  { %2195 = vsyncpa [#allocation17], 1 }
0x1110   :  { %2196 = vsyncpa [#allocation20], 1 }
0x1111   :  { %2197 = vsyncpa [#allocation23], 1 }
0x1112   :  { %2198 = vsyncpa [#allocation26], 1 }
0x1113   :  { %2199 = vsyncpa [#allocation29], 1 }

</bundles_post_ra>
